<compile_context>
chip_gen: v7x
topology: tpu7x:2x2x1
jax: 0.10.0
libtpu: 0.0.40
codegen_flags: <defaults>
</compile_context>

<pallas_src>
import jax
import jax.numpy as jnp
from jax.experimental import pallas as pl
from jax.experimental.pallas import tpu as pltpu

EPS = 1e-5
LANE = 128


def _basic_block_kernel(x_ref, w1_ref, b1_ref, w2_ref, b2_ref, out_ref,
                        xpad_ref, mid_ref):
    """Fused BasicBlock for one batch element.

    x_ref   : (1, H, W, C)      input block (C lane-padded to a multiple of 128)
    w*_ref  : (9*C, C)          conv weights, HWIO flattened, BN scale pre-folded
    b*_ref  : (1, C)            folded BN bias (f32)
    out_ref : (1, H, W, C)
    xpad_ref, mid_ref : (H+2, W+2, C) VMEM scratch (halo-padded input / conv1 out)
    """
    _, H, W, C = x_ref.shape
    HW = H * W

    def conv3x3(src_ref, w_ref):
        # im2col over the halo-padded VMEM buffer -> one deep MXU matmul (K = 9*C).
        cols = [src_ref[kh:kh + H, kw:kw + W, :].reshape(HW, C)
                for kh in range(3) for kw in range(3)]
        patch = jnp.concatenate(cols, axis=-1)                 # (H*W, 9*C)
        return jnp.dot(patch, w_ref[...],
                       preferred_element_type=jnp.float32)     # f32 accumulate

    # --- stage 1: halo-pad x inside VMEM (no padded copy in HBM) ---------------
    xpad_ref[...] = jnp.zeros_like(xpad_ref)
    xpad_ref[1:H + 1, 1:W + 1, :] = x_ref[0]

    # conv1 (BN1 scale folded into w1) + bias + ReLU
    y1 = conv3x3(xpad_ref, w1_ref) + b1_ref[...]
    y1 = jnp.maximum(y1, 0.0)

    # --- stage 2: intermediate stays in VMEM, halo-padded for conv2 ------------
    mid_ref[...] = jnp.zeros_like(mid_ref)
    mid_ref[1:H + 1, 1:W + 1, :] = y1.reshape(H, W, C).astype(mid_ref.dtype)

    # conv2 (BN2 scale folded into w2) + bias + residual + ReLU
    y2 = conv3x3(mid_ref, w2_ref) + b2_ref[...]
    y2 = y2 + x_ref[0].reshape(HW, C).astype(jnp.float32)
    y2 = jnp.maximum(y2, 0.0)
    out_ref[0] = y2.reshape(H, W, C).astype(out_ref.dtype)


def _fold_bn_into_conv(w_oihw, gamma, beta, mean, var):
    """Eval-mode BN folded into the conv: w' = w*scale (per out-channel), b' = beta - mean*scale."""
    scale = gamma / jnp.sqrt(var + EPS)
    bias = beta - mean * scale
    w_hwio = jnp.transpose(w_oihw, (2, 3, 1, 0)) * scale[None, None, None, :]
    return w_hwio, bias


def _pad_axis(a, axis, target):
    pad = target - a.shape[axis]
    if pad <= 0:
        return a
    widths = [(0, 0)] * a.ndim
    widths[axis] = (0, pad)
    return jnp.pad(a, widths)


@jax.jit
def basic_block_forward(x_nchw, params):
    """BasicBlock forward (stride=1, downsample=None). NCHW in / NCHW out like PyTorch."""
    # TODO(synk): stride!=1 / downsample branch not implemented (not used by default BasicBlock).
    # TODO(synk): for very large H*W per image, add H-row tiling with a 1-row recomputed halo.
    w1, g1, b1, m1, v1, w2, g2, b2, m2, v2 = params
    N, C, H, W = x_nchw.shape
    Cp = ((C + LANE - 1) // LANE) * LANE          # lane-dense channel count

    x = jnp.transpose(x_nchw, (0, 2, 3, 1))       # NCHW -> NHWC
    x = _pad_axis(x, 3, Cp)

    w1f, bias1 = _fold_bn_into_conv(w1, g1, b1, m1, v1)
    w2f, bias2 = _fold_bn_into_conv(w2, g2, b2, m2, v2)

    def prep_w(w_hwio):
        w_hwio = _pad_axis(_pad_axis(w_hwio, 2, Cp), 3, Cp)   # pad Cin and Cout
        return w_hwio.reshape(9 * Cp, Cp).astype(x.dtype)     # (kh,kw,cin) major order

    w1p = prep_w(w1f)
    w2p = prep_w(w2f)
    b1p = _pad_axis(bias1, 0, Cp).reshape(1, Cp).astype(jnp.float32)
    b2p = _pad_axis(bias2, 0, Cp).reshape(1, Cp).astype(jnp.float32)

    dt_bytes = jnp.dtype(x.dtype).itemsize
    cost = pl.CostEstimate(
        flops=2 * 2 * 9 * N * H * W * Cp * Cp,                     # two 3x3 convs
        transcendentals=0,
        bytes_accessed=(2 * N * H * W * Cp + 2 * 9 * Cp * Cp) * dt_bytes + 2 * Cp * 4,
    )

    out = pl.pallas_call(
        _basic_block_kernel,
        out_shape=jax.ShapeDtypeStruct((N, H, W, Cp), x.dtype),
        grid_spec=pltpu.PrefetchScalarGridSpec(
            num_scalar_prefetch=0,
            grid=(N,),
            in_specs=[
                pl.BlockSpec((1, H, W, Cp), lambda n: (n, 0, 0, 0)),   # x
                pl.BlockSpec((9 * Cp, Cp), lambda n: (0, 0)),          # w1 (resident)
                pl.BlockSpec((1, Cp), lambda n: (0, 0)),               # bias1
                pl.BlockSpec((9 * Cp, Cp), lambda n: (0, 0)),          # w2 (resident)
                pl.BlockSpec((1, Cp), lambda n: (0, 0)),               # bias2
            ],
            out_specs=pl.BlockSpec((1, H, W, Cp), lambda n: (n, 0, 0, 0)),
            scratch_shapes=[
                pltpu.VMEM((H + 2, W + 2, Cp), x.dtype),   # halo-padded input
                pltpu.VMEM((H + 2, W + 2, Cp), x.dtype),   # halo-padded conv1 output
            ],
        ),
        compiler_params=pltpu.CompilerParams(
            dimension_semantics=("parallel",),             # batch axis -> megacore on v7x
            vmem_limit_bytes=32 * 1024 * 1024,             # safe on v5e/v6e/v7x
        ),
        cost_estimate=cost,
    )(x, w1p, b1p, w2p, b2p)

    out = out[..., :C]                                      # drop lane padding
    return jnp.transpose(out, (0, 3, 1, 2))                 # NHWC -> NCHW


def _reference(x, params):
    """Pure-JAX reference mirroring PyTorch semantics (eval-mode BN)."""
    w1, g1, b1, m1, v1, w2, g2, b2, m2, v2 = params

    def conv(x_, w_):
        return jax.lax.conv_general_dilated(
            x_, w_, window_strides=(1, 1), padding=((1, 1), (1, 1)),
            dimension_numbers=('NCHW', 'OIHW', 'NCHW'))

    def bn(x_, g, b, m, v):
        sc = (g / jnp.sqrt(v + EPS))[None, :, None, None]
        return (x_ - m[None, :, None, None]) * sc + b[None, :, None, None]

    out = jnp.maximum(bn(conv(x, w1), g1, b1, m1, v1), 0.0)
    out = bn(conv(out, w2), g2, b2, m2, v2) + x
    return jnp.maximum(out, 0.0)


if __name__ == "__main__":
    # Small shapes consistent with BasicBlock(inplanes=4, planes=4, stride=1)
    N, C, H, W = 2, 4, 16, 16
    key = jax.random.PRNGKey(0)
    ks = jax.random.split(key, 11)

    x = jax.random.normal(ks[0], (N, C, H, W), jnp.float32)

    w1 = jax.random.normal(ks[1], (C, C, 3, 3), jnp.float32) * 0.1   # conv1.weight (OIHW)
    g1 = jax.random.normal(ks[2], (C,), jnp.float32) * 0.1 + 1.0     # bn1.weight
    b1 = jax.random.normal(ks[3], (C,), jnp.float32) * 0.1           # bn1.bias
    m1 = jax.random.normal(ks[4], (C,), jnp.float32) * 0.1           # bn1.running_mean
    v1 = jax.random.uniform(ks[5], (C,), jnp.float32, 0.5, 1.5)      # bn1.running_var

    w2 = jax.random.normal(ks[6], (C, C, 3, 3), jnp.float32) * 0.1   # conv2.weight (OIHW)
    g2 = jax.random.normal(ks[7], (C,), jnp.float32) * 0.1 + 1.0
    b2 = jax.random.normal(ks[8], (C,), jnp.float32) * 0.1
    m2 = jax.random.normal(ks[9], (C,), jnp.float32) * 0.1
    v2 = jax.random.uniform(ks[10], (C,), jnp.float32, 0.5, 1.5)

    params = (w1, g1, b1, m1, v1, w2, g2, b2, m2, v2)

    out = jax.block_until_ready(basic_block_forward(x, params))
    ref = jax.block_until_ready(_reference(x, params))

    assert out.shape == (N, C, H, W)
    assert jnp.allclose(out, ref, atol=1e-4, rtol=1e-4), float(jnp.max(jnp.abs(out - ref)))

    print("KERNEL_OK")
</pallas_src>

<mosaic_0001>
module attributes {stable_mosaic.version = 11 : i64} {
  func.func @_basic_block_kernel(%arg0: i32, %arg1: memref<1x16x16x128xf32, #tpu.memory_space<vmem>>, %arg2: memref<1152x128xf32, #tpu.memory_space<vmem>>, %arg3: memref<1x128xf32, #tpu.memory_space<vmem>>, %arg4: memref<1152x128xf32, #tpu.memory_space<vmem>>, %arg5: memref<1x128xf32, #tpu.memory_space<vmem>>, %arg6: memref<1x16x16x128xf32, #tpu.memory_space<vmem>>, %arg7: memref<18x18x128xf32, #tpu.memory_space<vmem>>, %arg8: memref<18x18x128xf32, #tpu.memory_space<vmem>>) attributes {dimension_semantics = [#tpu.dimension_semantics<parallel>], iteration_bounds = array<i64: 2>, scalar_prefetch = 0 : i64, scratch_operands = 2 : i64, tpu.core_type = #tpu.core_type<tc>, window_params = [{transform_indices = @transform_0, window_bounds = array<i64: 1, 16, 16, 128>}, {pipeline_mode = #tpu.pipeline_mode<synchronous>, transform_indices = @transform_1, window_bounds = array<i64: 1152, 128>}, {pipeline_mode = #tpu.pipeline_mode<synchronous>, transform_indices = @transform_2, window_bounds = array<i64: 1, 128>}, {pipeline_mode = #tpu.pipeline_mode<synchronous>, transform_indices = @transform_3, window_bounds = array<i64: 1152, 128>}, {pipeline_mode = #tpu.pipeline_mode<synchronous>, transform_indices = @transform_4, window_bounds = array<i64: 1, 128>}, {transform_indices = @transform_5, window_bounds = array<i64: 1, 16, 16, 128>}]} {
    %cst = arith.constant 0.000000e+00 : f32
    %0 = vector.broadcast %cst : f32 to vector<18x18x128xf32>
    %c0 = arith.constant 0 : index
    %c0_0 = arith.constant 0 : index
    %c0_1 = arith.constant 0 : index
    %1 = vector.load %arg7[%c0, %c0_0, %c0_1] : memref<18x18x128xf32, #tpu.memory_space<vmem>>, vector<18x18x128xf32>
    tpu.vector_store %arg7[%c0, %c0_0, %c0_1], %0 {strides = array<i32>} : memref<18x18x128xf32, #tpu.memory_space<vmem>>, vector<18x18x128xf32>,
    %c0_2 = arith.constant 0 : index
    %c0_3 = arith.constant 0 : index
    %c0_4 = arith.constant 0 : index
    %c0_5 = arith.constant 0 : index
    %2 = vector.load %arg1[%c0_2, %c0_3, %c0_4, %c0_5] : memref<1x16x16x128xf32, #tpu.memory_space<vmem>>, vector<1x16x16x128xf32>
    %3 = vector.shape_cast %2 : vector<1x16x16x128xf32> to vector<16x16x128xf32>
    %c1 = arith.constant 1 : index
    %c1_6 = arith.constant 1 : index
    %c0_7 = arith.constant 0 : index
    %4 = vector.load %arg7[%c1, %c1_6, %c0_7] : memref<18x18x128xf32, #tpu.memory_space<vmem>>, vector<16x16x128xf32>
    tpu.vector_store %arg7[%c1, %c1_6, %c0_7], %3 {strides = array<i32>} : memref<18x18x128xf32, #tpu.memory_space<vmem>>, vector<16x16x128xf32>,
    %c0_8 = arith.constant 0 : index
    %c0_9 = arith.constant 0 : index
    %c0_10 = arith.constant 0 : index
    %5 = vector.load %arg7[%c0_8, %c0_9, %c0_10] : memref<18x18x128xf32, #tpu.memory_space<vmem>>, vector<16x16x128xf32>
    %6 = vector.shape_cast %5 : vector<16x16x128xf32> to vector<256x128xf32>
    %c0_11 = arith.constant 0 : index
    %c1_12 = arith.constant 1 : index
    %c0_13 = arith.constant 0 : index
    %7 = vector.load %arg7[%c0_11, %c1_12, %c0_13] : memref<18x18x128xf32, #tpu.memory_space<vmem>>, vector<16x16x128xf32>
    %8 = vector.shape_cast %7 : vector<16x16x128xf32> to vector<256x128xf32>
    %c0_14 = arith.constant 0 : index
    %c2 = arith.constant 2 : index
    %c0_15 = arith.constant 0 : index
    %9 = vector.load %arg7[%c0_14, %c2, %c0_15] : memref<18x18x128xf32, #tpu.memory_space<vmem>>, vector<16x16x128xf32>
    %10 = vector.shape_cast %9 : vector<16x16x128xf32> to vector<256x128xf32>
    %c1_16 = arith.constant 1 : index
    %c0_17 = arith.constant 0 : index
    %c0_18 = arith.constant 0 : index
    %11 = vector.load %arg7[%c1_16, %c0_17, %c0_18] : memref<18x18x128xf32, #tpu.memory_space<vmem>>, vector<16x16x128xf32>
    %12 = vector.shape_cast %11 : vector<16x16x128xf32> to vector<256x128xf32>
    %c1_19 = arith.constant 1 : index
    %c1_20 = arith.constant 1 : index
    %c0_21 = arith.constant 0 : index
    %13 = vector.load %arg7[%c1_19, %c1_20, %c0_21] : memref<18x18x128xf32, #tpu.memory_space<vmem>>, vector<16x16x128xf32>
    %14 = vector.shape_cast %13 : vector<16x16x128xf32> to vector<256x128xf32>
    %c1_22 = arith.constant 1 : index
    %c2_23 = arith.constant 2 : index
    %c0_24 = arith.constant 0 : index
    %15 = vector.load %arg7[%c1_22, %c2_23, %c0_24] : memref<18x18x128xf32, #tpu.memory_space<vmem>>, vector<16x16x128xf32>
    %16 = vector.shape_cast %15 : vector<16x16x128xf32> to vector<256x128xf32>
    %c2_25 = arith.constant 2 : index
    %c0_26 = arith.constant 0 : index
    %c0_27 = arith.constant 0 : index
    %17 = vector.load %arg7[%c2_25, %c0_26, %c0_27] : memref<18x18x128xf32, #tpu.memory_space<vmem>>, vector<16x16x128xf32>
    %18 = vector.shape_cast %17 : vector<16x16x128xf32> to vector<256x128xf32>
    %c2_28 = arith.constant 2 : index
    %c1_29 = arith.constant 1 : index
    %c0_30 = arith.constant 0 : index
    %19 = vector.load %arg7[%c2_28, %c1_29, %c0_30] : memref<18x18x128xf32, #tpu.memory_space<vmem>>, vector<16x16x128xf32>
    %20 = vector.shape_cast %19 : vector<16x16x128xf32> to vector<256x128xf32>
    %c2_31 = arith.constant 2 : index
    %c2_32 = arith.constant 2 : index
    %c0_33 = arith.constant 0 : index
    %21 = vector.load %arg7[%c2_31, %c2_32, %c0_33] : memref<18x18x128xf32, #tpu.memory_space<vmem>>, vector<16x16x128xf32>
    %22 = vector.shape_cast %21 : vector<16x16x128xf32> to vector<256x128xf32>
    %23 = tpu.concatenate %6, %8, %10, %12, %14, %16, %18, %20, %22 in 1 : vector<256x128xf32>, vector<256x128xf32>, vector<256x128xf32>, vector<256x128xf32>, vector<256x128xf32>, vector<256x128xf32>, vector<256x128xf32>, vector<256x128xf32>, vector<256x128xf32> -> vector<256x1152xf32>
    %c0_34 = arith.constant 0 : index
    %c0_35 = arith.constant 0 : index
    %24 = vector.load %arg2[%c0_34, %c0_35] : memref<1152x128xf32, #tpu.memory_space<vmem>>, vector<1152x128xf32>
    %cst_36 = arith.constant dense<0.000000e+00> : vector<256x128xf32>
    %25 = tpu.matmul %23, %24, %cst_36 {dimension_numbers = #tpu.dot_dimension_numbers<[1], [0], [0], [1], [0, 0, 1, 1], [], []>} : vector<256x1152xf32>, vector<1152x128xf32>, vector<256x128xf32> -> vector<256x128xf32>
    %c0_37 = arith.constant 0 : index
    %c0_38 = arith.constant 0 : index
    %26 = vector.load %arg3[%c0_37, %c0_38] : memref<1x128xf32, #tpu.memory_space<vmem>>, vector<1x128xf32>
    %27 = vector.broadcast %26 : vector<1x128xf32> to vector<256x128xf32>
    %28 = arith.addf %25, %27 : vector<256x128xf32>
    %cst_39 = arith.constant 0.000000e+00 : f32
    %29 = vector.broadcast %cst_39 : f32 to vector<256x128xf32>
    %30 = arith.maximumf %28, %29 : vector<256x128xf32>
    %cst_40 = arith.constant 0.000000e+00 : f32
    %31 = vector.broadcast %cst_40 : f32 to vector<18x18x128xf32>
    %c0_41 = arith.constant 0 : index
    %c0_42 = arith.constant 0 : index
    %c0_43 = arith.constant 0 : index
    %32 = vector.load %arg8[%c0_41, %c0_42, %c0_43] : memref<18x18x128xf32, #tpu.memory_space<vmem>>, vector<18x18x128xf32>
    tpu.vector_store %arg8[%c0_41, %c0_42, %c0_43], %31 {strides = array<i32>} : memref<18x18x128xf32, #tpu.memory_space<vmem>>, vector<18x18x128xf32>,
    %33 = vector.shape_cast %30 : vector<256x128xf32> to vector<16x16x128xf32>
    %c1_44 = arith.constant 1 : index
    %c1_45 = arith.constant 1 : index
    %c0_46 = arith.constant 0 : index
    %34 = vector.load %arg8[%c1_44, %c1_45, %c0_46] : memref<18x18x128xf32, #tpu.memory_space<vmem>>, vector<16x16x128xf32>
    tpu.vector_store %arg8[%c1_44, %c1_45, %c0_46], %33 {strides = array<i32>} : memref<18x18x128xf32, #tpu.memory_space<vmem>>, vector<16x16x128xf32>,
    %c0_47 = arith.constant 0 : index
    %c0_48 = arith.constant 0 : index
    %c0_49 = arith.constant 0 : index
    %35 = vector.load %arg8[%c0_47, %c0_48, %c0_49] : memref<18x18x128xf32, #tpu.memory_space<vmem>>, vector<16x16x128xf32>
    %36 = vector.shape_cast %35 : vector<16x16x128xf32> to vector<256x128xf32>
    %c0_50 = arith.constant 0 : index
    %c1_51 = arith.constant 1 : index
    %c0_52 = arith.constant 0 : index
    %37 = vector.load %arg8[%c0_50, %c1_51, %c0_52] : memref<18x18x128xf32, #tpu.memory_space<vmem>>, vector<16x16x128xf32>
    %38 = vector.shape_cast %37 : vector<16x16x128xf32> to vector<256x128xf32>
    %c0_53 = arith.constant 0 : index
    %c2_54 = arith.constant 2 : index
    %c0_55 = arith.constant 0 : index
    %39 = vector.load %arg8[%c0_53, %c2_54, %c0_55] : memref<18x18x128xf32, #tpu.memory_space<vmem>>, vector<16x16x128xf32>
    %40 = vector.shape_cast %39 : vector<16x16x128xf32> to vector<256x128xf32>
    %c1_56 = arith.constant 1 : index
    %c0_57 = arith.constant 0 : index
    %c0_58 = arith.constant 0 : index
    %41 = vector.load %arg8[%c1_56, %c0_57, %c0_58] : memref<18x18x128xf32, #tpu.memory_space<vmem>>, vector<16x16x128xf32>
    %42 = vector.shape_cast %41 : vector<16x16x128xf32> to vector<256x128xf32>
    %c1_59 = arith.constant 1 : index
    %c1_60 = arith.constant 1 : index
    %c0_61 = arith.constant 0 : index
    %43 = vector.load %arg8[%c1_59, %c1_60, %c0_61] : memref<18x18x128xf32, #tpu.memory_space<vmem>>, vector<16x16x128xf32>
    %44 = vector.shape_cast %43 : vector<16x16x128xf32> to vector<256x128xf32>
    %c1_62 = arith.constant 1 : index
    %c2_63 = arith.constant 2 : index
    %c0_64 = arith.constant 0 : index
    %45 = vector.load %arg8[%c1_62, %c2_63, %c0_64] : memref<18x18x128xf32, #tpu.memory_space<vmem>>, vector<16x16x128xf32>
    %46 = vector.shape_cast %45 : vector<16x16x128xf32> to vector<256x128xf32>
    %c2_65 = arith.constant 2 : index
    %c0_66 = arith.constant 0 : index
    %c0_67 = arith.constant 0 : index
    %47 = vector.load %arg8[%c2_65, %c0_66, %c0_67] : memref<18x18x128xf32, #tpu.memory_space<vmem>>, vector<16x16x128xf32>
    %48 = vector.shape_cast %47 : vector<16x16x128xf32> to vector<256x128xf32>
    %c2_68 = arith.constant 2 : index
    %c1_69 = arith.constant 1 : index
    %c0_70 = arith.constant 0 : index
    %49 = vector.load %arg8[%c2_68, %c1_69, %c0_70] : memref<18x18x128xf32, #tpu.memory_space<vmem>>, vector<16x16x128xf32>
    %50 = vector.shape_cast %49 : vector<16x16x128xf32> to vector<256x128xf32>
    %c2_71 = arith.constant 2 : index
    %c2_72 = arith.constant 2 : index
    %c0_73 = arith.constant 0 : index
    %51 = vector.load %arg8[%c2_71, %c2_72, %c0_73] : memref<18x18x128xf32, #tpu.memory_space<vmem>>, vector<16x16x128xf32>
    %52 = vector.shape_cast %51 : vector<16x16x128xf32> to vector<256x128xf32>
    %53 = tpu.concatenate %36, %38, %40, %42, %44, %46, %48, %50, %52 in 1 : vector<256x128xf32>, vector<256x128xf32>, vector<256x128xf32>, vector<256x128xf32>, vector<256x128xf32>, vector<256x128xf32>, vector<256x128xf32>, vector<256x128xf32>, vector<256x128xf32> -> vector<256x1152xf32>
    %c0_74 = arith.constant 0 : index
    %c0_75 = arith.constant 0 : index
    %54 = vector.load %arg4[%c0_74, %c0_75] : memref<1152x128xf32, #tpu.memory_space<vmem>>, vector<1152x128xf32>
    %cst_76 = arith.constant dense<0.000000e+00> : vector<256x128xf32>
    %55 = tpu.matmul %53, %54, %cst_76 {dimension_numbers = #tpu.dot_dimension_numbers<[1], [0], [0], [1], [0, 0, 1, 1], [], []>} : vector<256x1152xf32>, vector<1152x128xf32>, vector<256x128xf32> -> vector<256x128xf32>
    %c0_77 = arith.constant 0 : index
    %c0_78 = arith.constant 0 : index
    %56 = vector.load %arg5[%c0_77, %c0_78] : memref<1x128xf32, #tpu.memory_space<vmem>>, vector<1x128xf32>
    %57 = vector.broadcast %56 : vector<1x128xf32> to vector<256x128xf32>
    %58 = arith.addf %55, %57 : vector<256x128xf32>
    %c0_79 = arith.constant 0 : index
    %c0_80 = arith.constant 0 : index
    %c0_81 = arith.constant 0 : index
    %c0_82 = arith.constant 0 : index
    %59 = vector.load %arg1[%c0_79, %c0_80, %c0_81, %c0_82] : memref<1x16x16x128xf32, #tpu.memory_space<vmem>>, vector<1x16x16x128xf32>
    %60 = vector.shape_cast %59 : vector<1x16x16x128xf32> to vector<16x16x128xf32>
    %61 = vector.shape_cast %60 : vector<16x16x128xf32> to vector<256x128xf32>
    %62 = arith.addf %58, %61 : vector<256x128xf32>
    %cst_83 = arith.constant 0.000000e+00 : f32
    %63 = vector.broadcast %cst_83 : f32 to vector<256x128xf32>
    %64 = arith.maximumf %62, %63 : vector<256x128xf32>
    %65 = vector.shape_cast %64 : vector<256x128xf32> to vector<16x16x128xf32>
    %c0_84 = arith.constant 0 : index
    %c0_85 = arith.constant 0 : index
    %c0_86 = arith.constant 0 : index
    %c0_87 = arith.constant 0 : index
    %66 = vector.load %arg6[%c0_84, %c0_85, %c0_86, %c0_87] : memref<1x16x16x128xf32, #tpu.memory_space<vmem>>, vector<1x16x16x128xf32>
    %67 = vector.shape_cast %66 : vector<1x16x16x128xf32> to vector<16x16x128xf32>
    %68 = vector.shape_cast %65 : vector<16x16x128xf32> to vector<1x16x16x128xf32>
    tpu.vector_store %arg6[%c0_84, %c0_85, %c0_86, %c0_87], %68 {strides = array<i32>} : memref<1x16x16x128xf32, #tpu.memory_space<vmem>>, vector<1x16x16x128xf32>,
    return
  }
  func.func @transform_0(%arg0: i32) -> (i32, i32, i32, i32) {
    %c0_i32 = arith.constant 0 : i32
    %c0_i32_0 = arith.constant 0 : i32
    %c0_i32_1 = arith.constant 0 : i32
    %c0_i32_2 = arith.constant 0 : i32
    return %arg0, %c0_i32, %c0_i32_0, %c0_i32_1 : i32, i32, i32, i32
  }
  func.func @transform_1(%arg0: i32) -> (i32, i32) {
    %c0_i32 = arith.constant 0 : i32
    %c0_i32_0 = arith.constant 0 : i32
    %c0_i32_1 = arith.constant 0 : i32
    return %c0_i32, %c0_i32_0 : i32, i32
  }
  func.func @transform_2(%arg0: i32) -> (i32, i32) {
    %c0_i32 = arith.constant 0 : i32
    %c0_i32_0 = arith.constant 0 : i32
    %c0_i32_1 = arith.constant 0 : i32
    return %c0_i32, %c0_i32_0 : i32, i32
  }
  func.func @transform_3(%arg0: i32) -> (i32, i32) {
    %c0_i32 = arith.constant 0 : i32
    %c0_i32_0 = arith.constant 0 : i32
    %c0_i32_1 = arith.constant 0 : i32
    return %c0_i32, %c0_i32_0 : i32, i32
  }
  func.func @transform_4(%arg0: i32) -> (i32, i32) {
    %c0_i32 = arith.constant 0 : i32
    %c0_i32_0 = arith.constant 0 : i32
    %c0_i32_1 = arith.constant 0 : i32
    return %c0_i32, %c0_i32_0 : i32, i32
  }
  func.func @transform_5(%arg0: i32) -> (i32, i32, i32, i32) {
    %c0_i32 = arith.constant 0 : i32
    %c0_i32_0 = arith.constant 0 : i32
    %c0_i32_1 = arith.constant 0 : i32
    %c0_i32_2 = arith.constant 0 : i32
    return %arg0, %c0_i32, %c0_i32_0, %c0_i32_1 : i32, i32, i32, i32
  }
}

</mosaic_0001>

<bundles_post_ra>
// kernel: basic_block_forward.1
= control target key start
LH: loop header
LB: loop body
LE: loop exit
PB: predicated region body
PF: predicated region fallthrough
CT: control target
= control target key end

     0   :  { %s5043_s18 = smov 0   ;;  %s7396_s0 = inlined_call_operand.vmem [shape: f32[2,16,16,128], index: 0, kind: input, shape index: {}]   ;;  %s7397_s1 = inlined_call_operand.vmem [shape: f32[1152,128], index: 1, kind: input, shape index: {}]   ;;  %s7398_s2 = inlined_call_operand.vmem [shape: f32[1,128], index: 2, kind: input, shape index: {}]   ;;  %s7399_s3 = inlined_call_operand.vmem [shape: f32[1152,128], index: 3, kind: input, shape index: {}]   ;;  %s7400_s4 = inlined_call_operand.vmem [shape: f32[1,128], index: 4, kind: input, shape index: {}]   ;;  %s7401_s5 = inlined_call_operand.vmem [shape: f32[2,16,16,128], index: 5, kind: output, shape index: {}]  }
   0x1 LB: > { %s3776_s19 = sadd.s32 4294967295, %s5009_s18   ;;  %p3780_p0 = scmp.ge.s32.totalorder %s5009_s18, 1  ;;  %s5009_s18 = sphi %s5043_s18, %s15_s18  }
   0x2   : > { %p187_p1 = scmp.lt.s32.totalorder %s5009_s18, 3 }
   0x4   : > { %p188_p2 = pnand %p3780_p0, %p187_p1 }
   0x6   : > { %191 = sbr.rel (%p188_p2) target bundleno = 1426 (0x592), region = 40 }
   0xd   : > { %v5054_v0 = vld [vmem:[%s7397_s1] sm:$0xff]  ;;  %v5059_v1 = vld [vmem:[%s7397_s1 + $0x8] sm:$0xff]  ;;  %v5064_v2 = vld [vmem:[%s7397_s1 + $0x10] sm:$0xff]  ;;  %p5068_p3 = scmp.lt.s32.totalorder %s3776_s19, 1  ;;  %v7402_v3 = vmov 0.0|0.0   ;;  %v5012_v6 = vmov 0.0  }
   0xe   : > { %4047 = vmatprep.subr.bf16.mxu0 %v7402_v3  ;;  %v4048_v4 = vpack.c.bf16 %v5059_v1, %v5054_v0  ;;  %v5078_v5 = vld [vmem:[%s7397_s1 + $0x18] sm:$0xff]  ;;  %225 = vst [vmem:[#allocation2] sm:$0xff] %v5012_v6  ;;  %226 = vst [vmem:[#allocation2 + $0x8] sm:$0xff] %v5012_v6  ;;  %v637_v8 = vld [vmem:[%s7397_s1 + $0x20] sm:$0xff] }
   0xf   : > { %227 = vst [vmem:[#allocation2 + $0x10] sm:$0x3] %v5012_v6  ;;  %228 = vst [vmem:[#allocation2 + $0x18] sm:$0xff] %v5012_v6  ;;  %s7466_s19 = smov (!%p5068_p3, %s3776_s19), 1  ;;  %v4051_v7 = vpack.c.bf16 %v5078_v5, %v5064_v2  ;;  %v638_v9 = vld [vmem:[%s7397_s1 + $0x28] sm:$0xff]  ;;  %v639_v11 = vld [vmem:[%s7397_s1 + $0x30] sm:$0xff] }
  0x10   : > { %229 = vst [vmem:[#allocation2 + $0x20] sm:$0xff] %v5012_v6  ;;  %230 = vst [vmem:[#allocation2 + $0x28] sm:$0x3] %v5012_v6  ;;  %4049 = vmatpush1.bf16.msra.mxu0 %v4048_v4  ;;  %s3789_s8 = sshll.u32 %s7466_s19, 8  ;;  %v4054_v10 = vpack.c.bf16 %v638_v9, %v637_v8  ;;  %v640_v12 = vld [vmem:[%s7397_s1 + $0x38] sm:$0xff]  ;;  %v641_v15 = vld [vmem:[%s7397_s1 + $0x40] sm:$0xff] }
  0x11   : > { %231 = vst [vmem:[#allocation2 + $0x30] sm:$0xff] %v5012_v6  ;;  %232 = vst [vmem:[#allocation2 + $0x38] sm:$0xff] %v5012_v6  ;;  %4050 = vmatprep.subr.bf16.mxu0 %v7402_v3  ;;  %s5219_s15 = scalar_lea.vmem %s7396_s0, %s3789_s8  ;;  %v4057_v14 = vpack.c.bf16 %v640_v12, %v639_v11  ;;  %v642_v16 = vld [vmem:[%s7397_s1 + $0x48] sm:$0xff]  ;;  %v643_v24 = vld [vmem:[%s7397_s1 + $0x50] sm:$0xff]  ;;  %s7275_s14 = scalar_lea.vmem %s7401_s5, %s3789_s8 }
  0x12   : > { %233 = vst [vmem:[#allocation2 + $0x40] sm:$0x3] %v5012_v6  ;;  %234 = vst [vmem:[#allocation2 + $0x48] sm:$0xff] %v5012_v6  ;;  %v5229_v17 = vld [vmem:[%s5219_s15] sm:$0xff]  ;;  %v5233_v18 = vld [vmem:[%s5219_s15 + $0x8] sm:$0xff]  ;;  %v4060_v22 = vpack.c.bf16 %v642_v16, %v641_v15 }
  0x13   : > { %235 = vst [vmem:[#allocation2 + $0x50] sm:$0xff] %v5012_v6  ;;  %236 = vst [vmem:[#allocation2 + $0x58] sm:$0x3] %v5012_v6  ;;  %v5236_v19 = vld [vmem:[%s5219_s15 + $0x10] sm:$0xff]  ;;  %v5241_v20 = vld [vmem:[%s5219_s15 + $0x18] sm:$0xff] }
  0x14   : > { %237 = vst [vmem:[#allocation2 + $0x60] sm:$0xff] %v5012_v6  ;;  %238 = vst [vmem:[#allocation2 + $0x68] sm:$0xff] %v5012_v6  ;;  %4052 = vmatpush1.bf16.msra.mxu0 %v4051_v7  ;;  %v5244_v21 = vld [vmem:[%s5219_s15 + $0x20] sm:$0xff]  ;;  %v5249_v23 = vld [vmem:[%s5219_s15 + $0x28] sm:$0xff] }
  0x15   : > { %239 = vst [vmem:[#allocation2 + $0x70] sm:$0x3] %v5012_v6  ;;  %240 = vst [vmem:[#allocation2 + $0x78] sm:$0xff] %v5012_v6  ;;  %4053 = vmatprep.subr.bf16.mxu0 %v7402_v3  ;;  %v376_v13 = vld [vmem:[#allocation2 + $0x1] sm:$0xff]  ;;  %v644_v25 = vld [vmem:[%s7397_s1 + $0x58] sm:$0xff] }
  0x16   : > { %241 = vst [vmem:[#allocation2 + $0x80] sm:$0xff] %v5012_v6  ;;  %242 = vst [vmem:[#allocation2 + $0x88] sm:$0x3] %v5012_v6  ;;  %848 = vmatprep.mubr.f32.mxu0 %v376_v13  ;;  %v5260_v26 = vld [vmem:[%s5219_s15 + $0x30] sm:$0xff]  ;;  %v5264_v27 = vld [vmem:[%s5219_s15 + $0x38] sm:$0xff]  ;;  %v4063_v31 = vpack.c.bf16 %v644_v25, %v643_v24 }
  0x17   : > { %243 = vst [vmem:[#allocation2 + $0x90] sm:$0xff] %v5012_v6  ;;  %244 = vst [vmem:[#allocation2 + $0x98] sm:$0xff] %v5012_v6  ;;  %v5267_v28 = vld [vmem:[%s5219_s15 + $0x40] sm:$0xff]  ;;  %v5272_v29 = vld [vmem:[%s5219_s15 + $0x48] sm:$0xff] }
  0x18   : > { %245 = vst [vmem:[#allocation2 + $0xa0] sm:$0x3] %v5012_v6  ;;  %246 = vst [vmem:[#allocation2 + $0xa8] sm:$0xff] %v5012_v6  ;;  %4055 = vmatpush1.bf16.msra.mxu0 %v4054_v10  ;;  %v5275_v30 = vld [vmem:[%s5219_s15 + $0x50] sm:$0xff]  ;;  %v5280_v32 = vld [vmem:[%s5219_s15 + $0x58] sm:$0xff] }
  0x19   : > { %247 = vst [vmem:[#allocation2 + $0xb0] sm:$0xff] %v5012_v6  ;;  %248 = vst [vmem:[#allocation2 + $0xb8] sm:$0x3] %v5012_v6  ;;  %4056 = vmatprep.subr.bf16.mxu0 %v7402_v3  ;;  %v645_v33 = vld [vmem:[%s7397_s1 + $0x60] sm:$0xff]  ;;  %v646_v34 = vld [vmem:[%s7397_s1 + $0x68] sm:$0xff] }
  0x1a   : > { %249 = vst [vmem:[#allocation2 + $0xc0] sm:$0xff] %v5012_v6  ;;  %250 = vst [vmem:[#allocation2 + $0xc8] sm:$0xff] %v5012_v6  ;;  %v5291_v35 = vld [vmem:[%s5219_s15 + $0x60] sm:$0xff]  ;;  %v5295_v36 = vld [vmem:[%s5219_s15 + $0x68] sm:$0xff]  ;;  %v4066_v37 = vpack.c.bf16 %v646_v34, %v645_v33 }
  0x1b   : > { %251 = vst [vmem:[#allocation2 + $0xd0] sm:$0x3] %v5012_v6  ;;  %252 = vst [vmem:[#allocation2 + $0xd8] sm:$0xff] %v5012_v6  ;;  %v5299_v38 = vld [vmem:[%s5219_s15 + $0x70] sm:$0xff]  ;;  %v648_v40 = vld [vmem:[%s7397_s1 + $0x78] sm:$0xff] }
  0x1c   : > { %253 = vst [vmem:[#allocation2 + $0xe0] sm:$0xff] %v5012_v6  ;;  %254 = vst [vmem:[#allocation2 + $0xe8] sm:$0x3] %v5012_v6  ;;  %4058 = vmatpush1.bf16.msra.mxu0 %v4057_v14  ;;  %v647_v39 = vld [vmem:[%s7397_s1 + $0x70] sm:$0xff]  ;;  %v5310_v41 = vld [vmem:[%s5219_s15 + $0x78] sm:$0xff] }
  0x1d   : > { %255 = vst [vmem:[#allocation2 + $0xf0] sm:$0xff] %v5012_v6  ;;  %256 = vst [vmem:[#allocation2 + $0xf8] sm:$0xff] %v5012_v6  ;;  %4059 = vmatprep.subr.bf16.mxu0 %v7402_v3  ;;  %v5314_v42 = vld [vmem:[%s5219_s15 + $0x80] sm:$0xff]  ;;  %v4069_v43 = vpack.c.bf16 %v648_v40, %v647_v39  ;;  %v5318_v44 = vld [vmem:[%s5219_s15 + $0x88] sm:$0xff] }
  0x1e   : > { %257 = vst [vmem:[#allocation2 + $0x100] sm:$0x3] %v5012_v6  ;;  %258 = vst [vmem:[#allocation2 + $0x108] sm:$0xff] %v5012_v6  ;;  %v649_v45 = vld [vmem:[%s7397_s1 + $0x80] sm:$0xff]  ;;  %v650_v46 = vld [vmem:[%s7397_s1 + $0x88] sm:$0xff] }
  0x1f   : > { %259 = vst [vmem:[#allocation2 + $0x110] sm:$0xff] %v5012_v6  ;;  %260 = vst [vmem:[#allocation2 + $0x118] sm:$0x3] %v5012_v6  ;;  %v5329_v47 = vld [vmem:[%s5219_s15 + $0x90] sm:$0xff]  ;;  %v5333_v48 = vld [vmem:[%s5219_s15 + $0x98] sm:$0xff]  ;;  %v4072_v50 = vpack.c.bf16 %v650_v46, %v649_v45 }
  0x20   : > { %261 = vst [vmem:[#allocation2 + $0x120] sm:$0xff] %v5012_v6  ;;  %262 = vst [vmem:[#allocation2 + $0x128] sm:$0xff] %v5012_v6  ;;  %4061 = vmatpush1.bf16.msra.mxu0 %v4060_v22  ;;  %v5336_v49 = vld [vmem:[%s5219_s15 + $0xa0] sm:$0xff]  ;;  %v5341_v51 = vld [vmem:[%s5219_s15 + $0xa8] sm:$0xff] }
  0x21   : > { %263 = vst [vmem:[#allocation2 + $0x130] sm:$0x3] %v5012_v6  ;;  %264 = vst [vmem:[#allocation2 + $0x138] sm:$0xff] %v5012_v6  ;;  %4062 = vmatprep.subr.bf16.mxu0 %v7402_v3  ;;  %v5344_v52 = vld [vmem:[%s5219_s15 + $0xb0] sm:$0xff]  ;;  %v652_v54 = vld [vmem:[%s7397_s1 + $0x98] sm:$0xff] }
  0x22   : > { %265 = vst [vmem:[#allocation2 + $0x140] sm:$0xff] %v5012_v6  ;;  %266 = vst [vmem:[#allocation2 + $0x148] sm:$0x3] %v5012_v6  ;;  %v651_v53 = vld [vmem:[%s7397_s1 + $0x90] sm:$0xff]  ;;  %v5356_v55 = vld [vmem:[%s5219_s15 + $0xb8] sm:$0xff] }
  0x23   : > { %267 = vst [vmem:[#allocation2 + $0x150] sm:$0xff] %v5012_v6  ;;  %268 = vst [vmem:[#allocation2 + $0x158] sm:$0xff] %v5012_v6  ;;  %v5360_v56 = vld [vmem:[%s5219_s15 + $0xc0] sm:$0xff]  ;;  %v4075_v57 = vpack.c.bf16 %v652_v54, %v651_v53  ;;  %v654_v59 = vld [vmem:[%s7397_s1 + $0xa8] sm:$0xff] }
  0x24   : > { %269 = vst [vmem:[#allocation2 + $0x160] sm:$0x3] %v5012_v6  ;;  %270 = vst [vmem:[#allocation2 + $0x168] sm:$0xff] %v5012_v6  ;;  %4064 = vmatpush1.bf16.msra.mxu0 %v4063_v31  ;;  %v653_v58 = vld [vmem:[%s7397_s1 + $0xa0] sm:$0xff]  ;;  %v5371_v60 = vld [vmem:[%s5219_s15 + $0xc8] sm:$0xff] }
  0x25   : > { %271 = vst [vmem:[#allocation2 + $0x170] sm:$0xff] %v5012_v6  ;;  %272 = vst [vmem:[#allocation2 + $0x178] sm:$0x3] %v5012_v6  ;;  %4065 = vmatprep.subr.bf16.mxu0 %v7402_v3  ;;  %v4078_v61 = vpack.c.bf16 %v654_v59, %v653_v58  ;;  %v655_v62 = vld [vmem:[%s7397_s1 + $0xb0] sm:$0xff]  ;;  %v656_v63 = vld [vmem:[%s7397_s1 + $0xb8] sm:$0xff] }
  0x26   : > { %273 = vst [vmem:[#allocation2 + $0x180] sm:$0xff] %v5012_v6  ;;  %274 = vst [vmem:[#allocation2 + $0x188] sm:$0xff] %v5012_v6  ;;  %v5382_v0 = vld [vmem:[%s5219_s15 + $0xd0] sm:$0xff]  ;;  %v4081_v1 = vpack.c.bf16 %v656_v63, %v655_v62  ;;  %v657_v2 = vld [vmem:[%s7397_s1 + $0xc0] sm:$0xff] }
  0x27   : > { %275 = vst [vmem:[#allocation2 + $0x190] sm:$0x3] %v5012_v6  ;;  %276 = vst [vmem:[#allocation2 + $0x198] sm:$0xff] %v5012_v6  ;;  %v658_v4 = vld [vmem:[%s7397_s1 + $0xc8] sm:$0xff]  ;;  %v5393_v5 = vld [vmem:[%s5219_s15 + $0xd8] sm:$0xff] }
  0x28   : > { %277 = vst [vmem:[#allocation2 + $0x1a0] sm:$0xff] %v5012_v6  ;;  %278 = vst [vmem:[#allocation2 + $0x1a8] sm:$0x3] %v5012_v6  ;;  %4067 = vmatpush1.bf16.msra.mxu0 %v4066_v37  ;;  %v4084_v7 = vpack.c.bf16 %v658_v4, %v657_v2  ;;  %v659_v8 = vld [vmem:[%s7397_s1 + $0xd0] sm:$0xff]  ;;  %v660_v9 = vld [vmem:[%s7397_s1 + $0xd8] sm:$0xff] }
  0x29   : > { %1941 = vst [vmem:[#allocation3] sm:$0xff] %v5012_v6  ;;  %1942 = vst [vmem:[#allocation3 + $0x8] sm:$0xff] %v5012_v6  ;;  %4068 = vmatprep.subr.bf16.mxu0 %v7402_v3  ;;  %v5404_v10 = vld [vmem:[%s5219_s15 + $0xe0] sm:$0xff]  ;;  %v4087_v11 = vpack.c.bf16 %v660_v9, %v659_v8  ;;  %v662_v13 = vld [vmem:[%s7397_s1 + $0xe8] sm:$0xff] }
  0x2a   : > { %1943 = vst [vmem:[#allocation3 + $0x10] sm:$0x3] %v5012_v6  ;;  %1944 = vst [vmem:[#allocation3 + $0x18] sm:$0xff] %v5012_v6  ;;  %v661_v12 = vld [vmem:[%s7397_s1 + $0xe0] sm:$0xff]  ;;  %v5415_v14 = vld [vmem:[%s5219_s15 + $0xe8] sm:$0xff] }
  0x2b   : > { %1945 = vst [vmem:[#allocation3 + $0x20] sm:$0xff] %v5012_v6  ;;  %1946 = vst [vmem:[#allocation3 + $0x28] sm:$0x3] %v5012_v6  ;;  %v4090_v15 = vpack.c.bf16 %v662_v13, %v661_v12  ;;  %v663_v16 = vld [vmem:[%s7397_s1 + $0xf0] sm:$0xff]  ;;  %v664_v22 = vld [vmem:[%s7397_s1 + $0xf8] sm:$0xff] }
  0x2c   : > { %1947 = vst [vmem:[#allocation3 + $0x30] sm:$0xff] %v5012_v6  ;;  %1948 = vst [vmem:[#allocation3 + $0x38] sm:$0xff] %v5012_v6  ;;  %4070 = vmatpush1.bf16.msra.mxu0 %v4069_v43  ;;  %v4093_v24 = vpack.c.bf16 %v664_v22, %v663_v16  ;;  %v665_v25 = vld [vmem:[%s7397_s1 + $0x100] sm:$0xff]  ;;  %v666_v31 = vld [vmem:[%s7397_s1 + $0x108] sm:$0xff] }
  0x2d   : > { %1949 = vst [vmem:[#allocation3 + $0x40] sm:$0x3] %v5012_v6  ;;  %1950 = vst [vmem:[#allocation3 + $0x48] sm:$0xff] %v5012_v6  ;;  %4071 = vmatprep.subr.bf16.mxu0 %v7402_v3  ;;  %v4096_v33 = vpack.c.bf16 %v666_v31, %v665_v25  ;;  %v377_v34 = vld [vmem:[#allocation2 + $0x9] sm:$0xff]  ;;  %v668_v39 = vld [vmem:[%s7397_s1 + $0x118] sm:$0xff] }
  0x2e   : > { %1951 = vst [vmem:[#allocation3 + $0x50] sm:$0xff] %v5012_v6  ;;  %1952 = vst [vmem:[#allocation3 + $0x58] sm:$0x3] %v5012_v6  ;;  %v667_v37 = vld [vmem:[%s7397_s1 + $0x110] sm:$0xff]  ;;  %v669_v43 = vld [vmem:[%s7397_s1 + $0x120] sm:$0xff] }
  0x2f   : > { %1953 = vst [vmem:[#allocation3 + $0x60] sm:$0xff] %v5012_v6  ;;  %1954 = vst [vmem:[#allocation3 + $0x68] sm:$0xff] %v5012_v6  ;;  %v4099_v40 = vpack.c.bf16 %v668_v39, %v667_v37  ;;  %v670_v45 = vld [vmem:[%s7397_s1 + $0x128] sm:$0xff]  ;;  %v671_v53 = vld [vmem:[%s7397_s1 + $0x130] sm:$0xff] }
  0x30   : > { %1955 = vst [vmem:[#allocation3 + $0x70] sm:$0x3] %v5012_v6  ;;  %1956 = vst [vmem:[#allocation3 + $0x78] sm:$0xff] %v5012_v6  ;;  %4073 = vmatpush1.bf16.msra.mxu0 %v4072_v50  ;;  %v4102_v50 = vpack.c.bf16 %v670_v45, %v669_v43  ;;  %v672_v54 = vld [vmem:[%s7397_s1 + $0x138] sm:$0xff]  ;;  %v674_v58 = vld [vmem:[%s7397_s1 + $0x148] sm:$0xff] }
  0x31   : > { %1957 = vst [vmem:[#allocation3 + $0x80] sm:$0xff] %v5012_v6  ;;  %1958 = vst [vmem:[#allocation3 + $0x88] sm:$0x3] %v5012_v6  ;;  %4074 = vmatprep.subr.bf16.mxu0 %v7402_v3  ;;  %v675_v62 = vld [vmem:[%s7397_s1 + $0x150] sm:$0xff]  ;;  %v676_v63 = vld [vmem:[%s7397_s1 + $0x158] sm:$0xff] }
  0x32   : > { %1959 = vst [vmem:[#allocation3 + $0x90] sm:$0xff] %v5012_v6  ;;  %1960 = vst [vmem:[#allocation3 + $0x98] sm:$0xff] %v5012_v6  ;;  %v677_v2 = vld [vmem:[%s7397_s1 + $0x160] sm:$0xff]  ;;  %v678_v4 = vld [vmem:[%s7397_s1 + $0x168] sm:$0xff] }
  0x33   : > { %1961 = vst [vmem:[#allocation3 + $0xa0] sm:$0x3] %v5012_v6  ;;  %1962 = vst [vmem:[#allocation3 + $0xa8] sm:$0xff] %v5012_v6  ;;  %v679_v8 = vld [vmem:[%s7397_s1 + $0x170] sm:$0xff]  ;;  %v680_v9 = vld [vmem:[%s7397_s1 + $0x178] sm:$0xff] }
  0x34   : > { %1963 = vst [vmem:[#allocation3 + $0xb0] sm:$0xff] %v5012_v6  ;;  %1964 = vst [vmem:[#allocation3 + $0xb8] sm:$0x3] %v5012_v6  ;;  %4076 = vmatpush1.bf16.msra.mxu0 %v4075_v57  ;;  %v673_v57 = vld [vmem:[%s7397_s1 + $0x140] sm:$0xff]  ;;  %v682_v13 = vld [vmem:[%s7397_s1 + $0x188] sm:$0xff] }
  0x35   : > { %1965 = vst [vmem:[#allocation3 + $0xc0] sm:$0xff] %v5012_v6  ;;  %1966 = vst [vmem:[#allocation3 + $0xc8] sm:$0xff] %v5012_v6  ;;  %4077 = vmatprep.subr.bf16.mxu0 %v7402_v3  ;;  %v681_v12 = vld [vmem:[%s7397_s1 + $0x180] sm:$0xff]  ;;  %v683_v16 = vld [vmem:[%s7397_s1 + $0x190] sm:$0xff] }
  0x36   : > { %1967 = vst [vmem:[#allocation3 + $0xd0] sm:$0x3] %v5012_v6  ;;  %1968 = vst [vmem:[#allocation3 + $0xd8] sm:$0xff] %v5012_v6  ;;  %v684_v22 = vld [vmem:[%s7397_s1 + $0x198] sm:$0xff]  ;;  %v685_v25 = vld [vmem:[%s7397_s1 + $0x1a0] sm:$0xff] }
  0x37   : > { %1969 = vst [vmem:[#allocation3 + $0xe0] sm:$0xff] %v5012_v6  ;;  %1970 = vst [vmem:[#allocation3 + $0xe8] sm:$0x3] %v5012_v6  ;;  %v686_v31 = vld [vmem:[%s7397_s1 + $0x1a8] sm:$0xff]  ;;  %v688_v37 = vld [vmem:[%s7397_s1 + $0x1b8] sm:$0xff] }
  0x38   : > { %1971 = vst [vmem:[#allocation3 + $0xf0] sm:$0xff] %v5012_v6  ;;  %1972 = vst [vmem:[#allocation3 + $0xf8] sm:$0xff] %v5012_v6  ;;  %4079 = vmatpush1.bf16.msra.mxu0 %v4078_v61  ;;  %v690_v43 = vld [vmem:[%s7397_s1 + $0x1c8] sm:$0xff] }
  0x39   : > { %1973 = vst [vmem:[#allocation3 + $0x100] sm:$0x3] %v5012_v6  ;;  %1974 = vst [vmem:[#allocation3 + $0x108] sm:$0xff] %v5012_v6  ;;  %4080 = vmatprep.subr.bf16.mxu0 %v7402_v3 }
  0x3a   : > { %1975 = vst [vmem:[#allocation3 + $0x110] sm:$0xff] %v5012_v6  ;;  %1976 = vst [vmem:[#allocation3 + $0x118] sm:$0x3] %v5012_v6 }
  0x3b   : > { %1977 = vst [vmem:[#allocation3 + $0x120] sm:$0xff] %v5012_v6  ;;  %1978 = vst [vmem:[#allocation3 + $0x128] sm:$0xff] %v5012_v6 }
  0x3c   : > { %1979 = vst [vmem:[#allocation3 + $0x130] sm:$0x3] %v5012_v6  ;;  %1980 = vst [vmem:[#allocation3 + $0x138] sm:$0xff] %v5012_v6  ;;  %4082 = vmatpush1.bf16.msra.mxu0 %v4081_v1  ;;  %v4111_v1 = vpack.c.bf16 %v676_v63, %v675_v62  ;;  %v696_v62 = vld [vmem:[%s7397_s1 + $0x1f8] sm:$0xff] }
  0x3d   : > { %1981 = vst [vmem:[#allocation3 + $0x140] sm:$0xff] %v5012_v6  ;;  %1982 = vst [vmem:[#allocation3 + $0x148] sm:$0x3] %v5012_v6  ;;  %4083 = vmatprep.subr.bf16.mxu0 %v7402_v3 }
  0x3e   : > { %1983 = vst [vmem:[#allocation3 + $0x150] sm:$0xff] %v5012_v6  ;;  %1984 = vst [vmem:[#allocation3 + $0x158] sm:$0xff] %v5012_v6 }
  0x3f   : > { %1985 = vst [vmem:[#allocation3 + $0x160] sm:$0x3] %v5012_v6  ;;  %1986 = vst [vmem:[#allocation3 + $0x168] sm:$0xff] %v5012_v6 }
  0x40   : > { %1987 = vst [vmem:[#allocation3 + $0x170] sm:$0xff] %v5012_v6  ;;  %1988 = vst [vmem:[#allocation3 + $0x178] sm:$0x3] %v5012_v6  ;;  %4085 = vmatpush1.bf16.msra.mxu0 %v4084_v7 }
  0x41   : > { %1989 = vst [vmem:[#allocation3 + $0x180] sm:$0xff] %v5012_v6  ;;  %1990 = vst [vmem:[#allocation3 + $0x188] sm:$0xff] %v5012_v6  ;;  %4086 = vmatprep.subr.bf16.mxu0 %v7402_v3 }
  0x42   : > { %1991 = vst [vmem:[#allocation3 + $0x190] sm:$0x3] %v5012_v6  ;;  %1992 = vst [vmem:[#allocation3 + $0x198] sm:$0xff] %v5012_v6 }
  0x43   : > { %1993 = vst [vmem:[#allocation3 + $0x1a0] sm:$0xff] %v5012_v6  ;;  %1994 = vst [vmem:[#allocation3 + $0x1a8] sm:$0x3] %v5012_v6 }
  0x44   : > { %312 = vst [vmem:[#allocation2 + $0x19] sm:$0xff] %v5229_v17  ;;  %313 = vst [vmem:[#allocation2 + $0x21] sm:$0xff] %v5233_v18  ;;  %4088 = vmatpush1.bf16.msra.mxu0 %v4087_v11 }
  0x45   : > { %314 = vst [vmem:[#allocation2 + $0x31] sm:$0xff] %v5236_v19  ;;  %315 = vst [vmem:[#allocation2 + $0x39] sm:$0xff] %v5241_v20  ;;  %4089 = vmatprep.subr.bf16.mxu0 %v7402_v3 }
  0x46   : > { %316 = vst [vmem:[#allocation2 + $0x49] sm:$0xff] %v5244_v21  ;;  %317 = vst [vmem:[#allocation2 + $0x51] sm:$0xff] %v5249_v23 }
  0x47   : > { %318 = vst [vmem:[#allocation2 + $0x61] sm:$0xff] %v5260_v26  ;;  %319 = vst [vmem:[#allocation2 + $0x69] sm:$0xff] %v5264_v27 }
  0x48   : > { %320 = vst [vmem:[#allocation2 + $0x79] sm:$0xff] %v5267_v28  ;;  %321 = vst [vmem:[#allocation2 + $0x81] sm:$0xff] %v5272_v29  ;;  %4091 = vmatpush1.bf16.msra.mxu0 %v4090_v15 }
  0x49   : > { %322 = vst [vmem:[#allocation2 + $0x91] sm:$0xff] %v5275_v30  ;;  %323 = vst [vmem:[#allocation2 + $0x99] sm:$0xff] %v5280_v32  ;;  %4092 = vmatprep.subr.bf16.mxu0 %v7402_v3 }
  0x4a   : > { %324 = vst [vmem:[#allocation2 + $0xa9] sm:$0xff] %v5291_v35  ;;  %325 = vst [vmem:[#allocation2 + $0xb1] sm:$0xff] %v5295_v36 }
  0x4b   : > { %326 = vst [vmem:[#allocation2 + $0xc1] sm:$0xff] %v5299_v38  ;;  %327 = vst [vmem:[#allocation2 + $0xc9] sm:$0xff] %v5310_v41  ;;  %v5449_v46 = vld [vmem:[#allocation2 + $0x18] sm:$0xff] }
  0x4c   : > { %328 = vst [vmem:[#allocation2 + $0xd9] sm:$0xff] %v5314_v42  ;;  %329 = vst [vmem:[#allocation2 + $0xe1] sm:$0xff] %v5318_v44  ;;  %4094 = vmatpush1.bf16.msra.mxu0 %v4093_v24  ;;  %v5471_v59 = vld [vmem:[#allocation2 + $0x30] sm:$0xff] }
  0x4d   : > { %330 = vst [vmem:[#allocation2 + $0xf1] sm:$0xff] %v5329_v47  ;;  %331 = vst [vmem:[#allocation2 + $0xf9] sm:$0xff] %v5333_v48  ;;  %4095 = vmatprep.subr.bf16.mxu0 %v7402_v3  ;;  %v5473_v61 = vld [vmem:[#allocation2 + $0x32] sm:$0xff]  ;;  %v5496_v7 = vld [vmem:[#allocation2 + $0x48] sm:$0xff] }
  0x4e   : > { %332 = vst [vmem:[#allocation2 + $0x109] sm:$0xff] %v5336_v49  ;;  %333 = vst [vmem:[#allocation2 + $0x111] sm:$0xff] %v5341_v51  ;;  %3919 = vmatprep.mubr.f32.mxu1 %v5473_v61  ;;  %v5507_v11 = vld [vmem:[#allocation2 + $0x50] sm:$0xff]  ;;  %v5518_v15 = vld [vmem:[#allocation2 + $0x60] sm:$0xff] }
  0x4f   : > { %334 = vst [vmem:[#allocation2 + $0x121] sm:$0xff] %v5344_v52  ;;  %335 = vst [vmem:[#allocation2 + $0x129] sm:$0xff] %v5356_v55  ;;  %849 = vmatmul.mubr.f32.vlgmr.msra.gmra.mrb[0].mxu0 %v5012_v6  ;;  %v5529_v24 = vld [vmem:[#allocation2 + $0x68] sm:$0xff]  ;;  %v5551_v39 = vld [vmem:[#allocation2 + $0x80] sm:$0xff] }
  0x50   : > { %336 = vst [vmem:[#allocation2 + $0x139] sm:$0xff] %v5360_v56  ;;  %337 = vst [vmem:[#allocation2 + $0x141] sm:$0xff] %v5371_v60  ;;  %4097 = vmatpush1.bf16.msra.mxu0 %v4096_v33  ;;  %853 = vmatprep.mubr.f32.mxu0 %v377_v34  ;;  %v5540_v33 = vld [vmem:[#allocation2 + $0x78] sm:$0xff]  ;;  %v687_v34 = vld [vmem:[%s7397_s1 + $0x1b0] sm:$0xff] }
  0x51   : > { %338 = vst [vmem:[#allocation2 + $0x151] sm:$0xff] %v5382_v0  ;;  %339 = vst [vmem:[#allocation2 + $0x159] sm:$0xff] %v5393_v5  ;;  %4098 = vmatprep.subr.bf16.mxu0 %v7402_v3  ;;  %v5562_v45 = vld [vmem:[#allocation2 + $0x90] sm:$0xff] }
  0x52   : > { %340 = vst [vmem:[#allocation2 + $0x169] sm:$0xff] %v5404_v10  ;;  %341 = vst [vmem:[#allocation2 + $0x171] sm:$0xff] %v5415_v14  ;;  %v5595_v63 = vld [vmem:[#allocation2 + $0xb0] sm:$0xff] }
  0x53   : > { %854 = vmatmul.mubr.f32.gmra.mrb[2].mxu0 %v5012_v6  ;;  %v5460_v6 = vld [vmem:[#allocation2 + $0x20] sm:$0xff] }
  0x54   : > { %858 = vmatprep.mubr.f32.mxu0 %v5229_v17  ;;  %4100 = vmatpush1.bf16.msra.mxu0 %v4099_v40  ;;  %v4105_v17 = vpack.c.bf16 %v672_v54, %v671_v53  ;;  %v689_v40 = vld [vmem:[%s7397_s1 + $0x1c0] sm:$0xff]  ;;  %v692_v53 = vld [vmem:[%s7397_s1 + $0x1d8] sm:$0xff] }
  0x55   : > { %4101 = vmatprep.subr.bf16.mxu0 %v7402_v3  ;;  %v5573_v54 = vld [vmem:[#allocation2 + $0x98] sm:$0xff] }
  0x57   : > { %859 = vmatmul.mubr.f32.gmra.mrb[4].mxu0 %v5449_v46 }
  0x58   : > { %863 = vmatprep.mubr.f32.mxu0 %v5233_v18  ;;  %4103 = vmatpush1.bf16.msra.mxu0 %v4102_v50  ;;  %v4108_v18 = vpack.c.bf16 %v674_v58, %v673_v57  ;;  %v691_v50 = vld [vmem:[%s7397_s1 + $0x1d0] sm:$0xff]  ;;  %v694_v57 = vld [vmem:[%s7397_s1 + $0x1e8] sm:$0xff] }
  0x59   : > { %4104 = vmatprep.subr.bf16.mxu0 %v7402_v3  ;;  %v5584_v58 = vld [vmem:[#allocation2 + $0xa8] sm:$0xff] }
  0x5b   : > { %864 = vmatmul.mubr.f32.gmra.mrb[6].mxu0 %v5460_v6 }
  0x5c   : > { %868 = vmatprep.mubr.f32.mxu0 %v5236_v19  ;;  %4106 = vmatpush1.bf16.msra.mxu0 %v4105_v17  ;;  %v5485_v19 = vld [vmem:[#allocation2 + $0x38] sm:$0xff]  ;;  %v693_v17 = vld [vmem:[%s7397_s1 + $0x1e0] sm:$0xff] }
  0x5d   : > { %4107 = vmatprep.subr.bf16.mxu0 %v7402_v3 }
  0x5f   : > { %869 = vmatmul.mubr.f32.gmra.mrb[8].mxu0 %v5471_v59 }
  0x60   : > { %873 = vmatprep.mubr.f32.mxu0 %v5241_v20  ;;  %4109 = vmatpush1.bf16.msra.mxu0 %v4108_v18  ;;  %v4114_v20 = vpack.c.bf16 %v678_v4, %v677_v2  ;;  %v695_v18 = vld [vmem:[%s7397_s1 + $0x1f0] sm:$0xff]  ;;  %v5609_v2 = vld [vmem:[#allocation2 + $0xd8] sm:$0xff] }
  0x61   : > { %4110 = vmatprep.subr.bf16.mxu0 %v7402_v3  ;;  %v5617_v4 = vld [vmem:[#allocation2 + $0xf0] sm:$0xff] }
  0x63   : > { %874 = vmatmul.mubr.f32.gmra.mrb[10].mxu0 %v5485_v19 }
  0x64   : > { %878 = vmatprep.mubr.f32.mxu0 %v5244_v21  ;;  %4112 = vmatpush1.bf16.msra.mxu0 %v4111_v1  ;;  %v4117_v21 = vpack.c.bf16 %v680_v9, %v679_v8  ;;  %v5600_v1 = vld [vmem:[#allocation2 + $0xc0] sm:$0xff]  ;;  %v698_v8 = vld [vmem:[%s7397_s1 + $0x208] sm:$0xff] }
  0x65   : > { %4113 = vmatprep.subr.bf16.mxu0 %v7402_v3 }
  0x67   : > { %879 = vmatmul.mubr.f32.gmra.mrb[12].mxu0 %v5496_v7 }
  0x68   : > { %883 = vmatprep.mubr.f32.mxu0 %v5249_v23  ;;  %4115 = vmatpush1.bf16.msra.mxu0 %v4114_v20  ;;  %v4120_v23 = vpack.c.bf16 %v682_v13, %v681_v12  ;;  %v5660_v20 = vld [vmem:[%s5219_s15 + $0xf8] sm:$0xff]  ;;  %v409_v12 = vld [vmem:[#allocation2 + $0xa] sm:$0xff] }
  0x69   : > { %4116 = vmatprep.subr.bf16.mxu0 %v7402_v3  ;;  %343 = vst [vmem:[#allocation2 + $0x189] sm:$0xff] %v5660_v20 }
  0x6b   : > { %884 = vmatmul.mubr.f32.gmra.mrb[14].mxu0 %v5507_v11 }
  0x6c   : > { %888 = vmatprep.mubr.f32.mxu0 %v5260_v26  ;;  %4118 = vmatpush1.bf16.msra.mxu0 %v4117_v21  ;;  %v4123_v26 = vpack.c.bf16 %v684_v22, %v683_v16  ;;  %v700_v21 = vld [vmem:[%s7397_s1 + $0x218] sm:$0xff] }
  0x6d   : > { %4119 = vmatprep.subr.bf16.mxu0 %v7402_v3  ;;  %v5694_v16 = vld [vmem:[#allocation2 + $0x1a] sm:$0xff] }
  0x6f   : > { %889 = vmatmul.mubr.f32.gmra.mrb[16].mxu0 %v5518_v15 }
  0x70   : > { %893 = vmatprep.mubr.f32.mxu0 %v5264_v27  ;;  %4121 = vmatpush1.bf16.msra.mxu0 %v4120_v23  ;;  %v4126_v27 = vpack.c.bf16 %v686_v31, %v685_v25  ;;  %v702_v23 = vld [vmem:[%s7397_s1 + $0x228] sm:$0xff]  ;;  %v705_v31 = vld [vmem:[%s7397_s1 + $0x240] sm:$0xff] }
  0x71   : > { %4122 = vmatprep.subr.bf16.mxu0 %v7402_v3  ;;  %v5705_v25 = vld [vmem:[#allocation2 + $0x22] sm:$0xff] }
  0x73   : > { %894 = vmatmul.mubr.f32.gmra.mrb[18].mxu0 %v5529_v24 }
  0x74   : > { %898 = vmatprep.mubr.f32.mxu0 %v5267_v28  ;;  %4124 = vmatpush1.bf16.msra.mxu0 %v4123_v26  ;;  %v4129_v28 = vpack.c.bf16 %v688_v37, %v687_v34  ;;  %v704_v26 = vld [vmem:[%s7397_s1 + $0x238] sm:$0xff]  ;;  %v707_v34 = vld [vmem:[%s7397_s1 + $0x250] sm:$0xff] }
  0x75   : > { %4125 = vmatprep.subr.bf16.mxu0 %v7402_v3  ;;  %v708_v37 = vld [vmem:[%s7397_s1 + $0x258] sm:$0xff] }
  0x77   : > { %899 = vmatmul.mubr.f32.gmra.mrb[20].mxu0 %v5540_v33 }
  0x78   : > { %903 = vmatprep.mubr.f32.mxu0 %v5272_v29  ;;  %4127 = vmatpush1.bf16.msra.mxu0 %v4126_v27  ;;  %v4132_v29 = vpack.c.bf16 %v690_v43, %v689_v40  ;;  %v706_v27 = vld [vmem:[%s7397_s1 + $0x248] sm:$0xff]  ;;  %v709_v40 = vld [vmem:[%s7397_s1 + $0x260] sm:$0xff] }
  0x79   : > { %4128 = vmatprep.subr.bf16.mxu0 %v7402_v3  ;;  %v710_v43 = vld [vmem:[%s7397_s1 + $0x268] sm:$0xff] }
  0x7b   : > { %904 = vmatmul.mubr.f32.gmra.mrb[22].mxu0 %v5551_v39 }
  0x7c   : > { %908 = vmatprep.mubr.f32.mxu0 %v5275_v30  ;;  %4130 = vmatpush1.bf16.msra.mxu0 %v4129_v28  ;;  %v4135_v30 = vpack.c.bf16 %v692_v53, %v691_v50  ;;  %v5725_v28 = vld [vmem:[#allocation2 + $0x3a] sm:$0xff]  ;;  %v711_v50 = vld [vmem:[%s7397_s1 + $0x270] sm:$0xff] }
  0x7d   : > { %4131 = vmatprep.subr.bf16.mxu0 %v7402_v3  ;;  %v712_v53 = vld [vmem:[%s7397_s1 + $0x278] sm:$0xff] }
  0x7f   : > { %909 = vmatmul.mubr.f32.gmra.mrb[24].mxu0 %v5562_v45 }
  0x80   : > { %913 = vmatprep.mubr.f32.mxu0 %v5280_v32  ;;  %4133 = vmatpush1.bf16.msra.mxu0 %v4132_v29  ;;  %v4138_v32 = vpack.c.bf16 %v694_v57, %v693_v17  ;;  %v5736_v29 = vld [vmem:[#allocation2 + $0x4a] sm:$0xff]  ;;  %v713_v17 = vld [vmem:[%s7397_s1 + $0x280] sm:$0xff] }
  0x81   : > { %4134 = vmatprep.subr.bf16.mxu0 %v7402_v3  ;;  %v714_v57 = vld [vmem:[%s7397_s1 + $0x288] sm:$0xff] }
  0x83   : > { %914 = vmatmul.mubr.f32.gmra.mrb[26].mxu0 %v5573_v54 }
  0x84   : > { %918 = vmatprep.mubr.f32.mxu0 %v5291_v35  ;;  %4136 = vmatpush1.bf16.msra.mxu0 %v4135_v30  ;;  %v4141_v35 = vpack.c.bf16 %v696_v62, %v695_v18  ;;  %v5747_v30 = vld [vmem:[#allocation2 + $0x52] sm:$0xff] }
  0x85   : > { %4137 = vmatprep.subr.bf16.mxu0 %v7402_v3  ;;  %v715_v18 = vld [vmem:[%s7397_s1 + $0x290] sm:$0xff]  ;;  %v716_v62 = vld [vmem:[%s7397_s1 + $0x298] sm:$0xff] }
  0x87   : > { %919 = vmatmul.mubr.f32.gmra.mrb[28].mxu0 %v5584_v58 }
  0x88   : > { %923 = vmatprep.mubr.f32.mxu0 %v5295_v36  ;;  %4139 = vmatpush1.bf16.msra.mxu0 %v4138_v32  ;;  %v5605_v36 = vld [vmem:[#allocation2 + $0xc8] sm:$0xff] }
  0x89   : > { %4140 = vmatprep.subr.bf16.mxu0 %v7402_v3  ;;  %v5758_v32 = vld [vmem:[#allocation2 + $0x62] sm:$0xff] }
  0x8b   : > { %924 = vmatmul.mubr.f32.gmra.mrb[30].mxu0 %v5595_v63 }
  0x8c   : > { %928 = vmatprep.mubr.f32.mxu0 %v5299_v38  ;;  %4142 = vmatpush1.bf16.msra.mxu0 %v4141_v35  ;;  %v5613_v38 = vld [vmem:[#allocation2 + $0xe0] sm:$0xff]  ;;  %v5769_v35 = vld [vmem:[#allocation2 + $0x6a] sm:$0xff] }
  0x8d   : > { %4143 = vmatprep.subr.bf16.mxu0 %v7402_v3 }
  0x8f   : > { %929 = vmatmul.mubr.f32.gmra.mrb[32].mxu0 %v5600_v1 }
  0x90   : > { %933 = vmatprep.mubr.f32.mxu0 %v5310_v41  ;;  %v5621_v41 = vld [vmem:[#allocation2 + $0xf8] sm:$0xff] }
  0x93   : > { %934 = vmatmul.mubr.f32.gmra.mrb[34].mxu0 %v5605_v36 }
  0x94   : > { %938 = vmatprep.mubr.f32.mxu0 %v5314_v42  ;;  %v5625_v42 = vld [vmem:[#allocation2 + $0x108] sm:$0xff] }
  0x97   : > { %939 = vmatmul.mubr.f32.gmra.mrb[36].mxu0 %v5609_v2 }
  0x98   : > { %943 = vmatprep.mubr.f32.mxu0 %v5318_v44  ;;  %v5629_v44 = vld [vmem:[#allocation2 + $0x110] sm:$0xff] }
  0x9b   : > { %944 = vmatmul.mubr.f32.gmra.mrb[38].mxu0 %v5613_v38 }
  0x9c   : > { %948 = vmatprep.mubr.f32.mxu0 %v5329_v47  ;;  %v5633_v47 = vld [vmem:[#allocation2 + $0x120] sm:$0xff] }
  0x9f   : > { %949 = vmatmul.mubr.f32.gmra.mrb[40].mxu0 %v5617_v4 }
  0xa0   : > { %953 = vmatprep.mubr.f32.mxu0 %v5333_v48  ;;  %v5637_v48 = vld [vmem:[#allocation2 + $0x128] sm:$0xff] }
  0xa3   : > { %954 = vmatmul.mubr.f32.gmra.mrb[42].mxu0 %v5621_v41 }
  0xa4   : > { %958 = vmatprep.mubr.f32.mxu0 %v5336_v49  ;;  %v5641_v49 = vld [vmem:[#allocation2 + $0x138] sm:$0xff] }
  0xa7   : > { %959 = vmatmul.mubr.f32.gmra.mrb[44].mxu0 %v5625_v42 }
  0xa8   : > { %963 = vmatprep.mubr.f32.mxu0 %v5341_v51  ;;  %v5645_v51 = vld [vmem:[#allocation2 + $0x140] sm:$0xff] }
  0xab   : > { %964 = vmatmul.mubr.f32.gmra.mrb[46].mxu0 %v5629_v44 }
  0xac   : > { %968 = vmatprep.mubr.f32.mxu0 %v5344_v52  ;;  %v5649_v52 = vld [vmem:[#allocation2 + $0x150] sm:$0xff] }
  0xaf   : > { %969 = vmatmul.mubr.f32.gmra.mrb[48].mxu0 %v5633_v47 }
  0xb0   : > { %973 = vmatprep.mubr.f32.mxu0 %v5356_v55  ;;  %v5652_v55 = vld [vmem:[%s5219_s15 + $0xf0] sm:$0xff] }
  0xb1   : > { %342 = vst [vmem:[#allocation2 + $0x181] sm:$0xff] %v5652_v55 }
  0xb3   : > { %974 = vmatmul.mubr.f32.gmra.mrb[50].mxu0 %v5637_v48 }
  0xb4   : > { %978 = vmatprep.mubr.f32.mxu0 %v5360_v56  ;;  %v5657_v56 = vld [vmem:[#allocation2 + $0x158] sm:$0xff] }
  0xb7   : > { %979 = vmatmul.mubr.f32.gmra.mrb[52].mxu0 %v5641_v49 }
  0xb8   : > { %983 = vmatprep.mubr.f32.mxu0 %v5371_v60  ;;  %v5665_v60 = vld [vmem:[#allocation2 + $0x168] sm:$0xff] }
  0xbb   : > { %984 = vmatmul.mubr.f32.gmra.mrb[54].mxu0 %v5645_v51 }
  0xbc   : > { %988 = vmatprep.mubr.f32.mxu0 %v5382_v0  ;;  %v5669_v0 = vld [vmem:[#allocation2 + $0x170] sm:$0xff] }
  0xbf   : > { %989 = vmatmul.mubr.f32.gmra.mrb[56].mxu0 %v5649_v52 }
  0xc0   : > { %993 = vmatprep.mubr.f32.mxu0 %v5393_v5  ;;  %v697_v5 = vld [vmem:[%s7397_s1 + $0x200] sm:$0xff] }
  0xc1   : > { %v4144_v9 = vpack.c.bf16 %v698_v8, %v697_v5  ;;  %v717_v5 = vld [vmem:[%s7397_s1 + $0x2a0] sm:$0xff]  ;;  %v718_v8 = vld [vmem:[%s7397_s1 + $0x2a8] sm:$0xff] }
  0xc3   : > { %994 = vmatmul.mubr.f32.gmra.mrb[58].mxu0 %v5657_v56 }
  0xc4   : > { %998 = vmatprep.mubr.f32.mxu0 %v5404_v10  ;;  %v408_v10 = vld [vmem:[#allocation2 + $0x2] sm:$0xff] }
  0xc7   : > { %999 = vmatmul.mubr.f32.gmra.mrb[60].mxu0 %v5665_v60 }
  0xc8   : > { %1003 = vmatprep.mubr.f32.mxu0 %v5415_v14  ;;  %v699_v14 = vld [vmem:[%s7397_s1 + $0x210] sm:$0xff] }
  0xc9   : > { %v4147_v13 = vpack.c.bf16 %v700_v21, %v699_v14  ;;  %v720_v14 = vld [vmem:[%s7397_s1 + $0x2b8] sm:$0xff]  ;;  %v5791_v21 = vld [vmem:[#allocation2 + $0x82] sm:$0xff] }
  0xcb   : > { %1004 = vmatmul.mubr.f32.gmra.mrb[62].mxu0 %v5669_v0 }
  0xcc   : > { %1073 = vmatprep.mubr.f32.mxu0 %v5449_v46  ;;  %v701_v46 = vld [vmem:[%s7397_s1 + $0x220] sm:$0xff] }
  0xcd   : > { %v4150_v22 = vpack.c.bf16 %v702_v23, %v701_v46  ;;  %v5802_v46 = vld [vmem:[#allocation2 + $0x92] sm:$0xff] }
  0xce   : > { %v723_v23 = vld [vmem:[%s7397_s1 + $0x2d0] sm:$0xff] }
  0xcf   : > { %1074 = vmatmul.mubr.f32.vlgmr.msra.gmra.mrb[0].mxu0 %v408_v10  ;;  %v5780_v10 = vld [vmem:[#allocation2 + $0x7a] sm:$0xff] }
  0xd0   : > { %4145 = vmatpush1.bf16.msra.mxu0 %v4144_v9  ;;  %1078 = vmatprep.mubr.f32.mxu0 %v5460_v6  ;;  %v703_v6 = vld [vmem:[%s7397_s1 + $0x230] sm:$0xff] }
  0xd1   : > { %4146 = vmatprep.subr.bf16.mxu0 %v7402_v3  ;;  %v719_v9 = vld [vmem:[%s7397_s1 + $0x2b0] sm:$0xff] }
  0xd3   : > { %1079 = vmatmul.mubr.f32.gmra.mrb[2].mxu0 %v409_v12  ;;  %v721_v12 = vld [vmem:[%s7397_s1 + $0x2c0] sm:$0xff] }
  0xd4   : > { %1083 = vmatprep.mubr.f32.mxu0 %v5471_v59  ;;  %4148 = vmatpush1.bf16.msra.mxu0 %v4147_v13  ;;  %v4153_v59 = vpack.c.bf16 %v704_v26, %v703_v6  ;;  %v722_v13 = vld [vmem:[%s7397_s1 + $0x2c8] sm:$0xff]  ;;  %v5813_v6 = vld [vmem:[#allocation2 + $0x9a] sm:$0xff] }
  0xd5   : > { %4149 = vmatprep.subr.bf16.mxu0 %v7402_v3  ;;  %v725_v26 = vld [vmem:[%s7397_s1 + $0x2e0] sm:$0xff] }
  0xd7   : > { %1084 = vmatmul.mubr.f32.gmra.mrb[4].mxu0 %v5694_v16 }
  0xd8   : > { %1088 = vmatprep.mubr.f32.mxu0 %v5485_v19  ;;  %4151 = vmatpush1.bf16.msra.mxu0 %v4150_v22  ;;  %v4156_v19 = vpack.c.bf16 %v706_v27, %v705_v31  ;;  %v724_v22 = vld [vmem:[%s7397_s1 + $0x2d8] sm:$0xff]  ;;  %v5824_v31 = vld [vmem:[#allocation2 + $0xaa] sm:$0xff] }
  0xd9   : > { %4152 = vmatprep.subr.bf16.mxu0 %v7402_v3  ;;  %v727_v27 = vld [vmem:[%s7397_s1 + $0x2f0] sm:$0xff] }
  0xdb   : > { %1089 = vmatmul.mubr.f32.gmra.mrb[6].mxu0 %v5705_v25 }
  0xdc   : > { %1093 = vmatprep.mubr.f32.mxu0 %v5496_v7  ;;  %4154 = vmatpush1.bf16.msra.mxu0 %v4153_v59  ;;  %v4159_v7 = vpack.c.bf16 %v708_v37, %v707_v34  ;;  %v726_v59 = vld [vmem:[%s7397_s1 + $0x2e8] sm:$0xff]  ;;  %v5835_v34 = vld [vmem:[#allocation2 + $0xb2] sm:$0xff] }
  0xdd   : > { %4155 = vmatprep.subr.bf16.mxu0 %v7402_v3  ;;  %v5840_v37 = vld [vmem:[#allocation2 + $0xc2] sm:$0xff] }
  0xdf   : > { %1094 = vmatmul.mubr.f32.gmra.mrb[8].mxu0 %v5473_v61 }
  0xe0   : > { %1098 = vmatprep.mubr.f32.mxu0 %v5507_v11  ;;  %4157 = vmatpush1.bf16.msra.mxu0 %v4156_v19  ;;  %v4162_v11 = vpack.c.bf16 %v710_v43, %v709_v40  ;;  %v728_v19 = vld [vmem:[%s7397_s1 + $0x2f8] sm:$0xff] }
  0xe1   : > { %4158 = vmatprep.subr.bf16.mxu0 %v7402_v3  ;;  %v5857_v40 = vld [vmem:[#allocation2 + $0xf2] sm:$0xff] }
  0xe3   : > { %1099 = vmatmul.mubr.f32.gmra.mrb[10].mxu0 %v5725_v28 }
  0xe4   : > { %1103 = vmatprep.mubr.f32.mxu0 %v5518_v15  ;;  %4160 = vmatpush1.bf16.msra.mxu0 %v4159_v7  ;;  %v4165_v15 = vpack.c.bf16 %v712_v53, %v711_v50  ;;  %v5849_v7 = vld [vmem:[#allocation2 + $0xda] sm:$0xff] }
  0xe5   : > { %4161 = vmatprep.subr.bf16.mxu0 %v7402_v3  ;;  %v5893_v53 = vld [vmem:[#allocation2 + $0x13a] sm:$0xff] }
  0xe7   : > { %1104 = vmatmul.mubr.f32.gmra.mrb[12].mxu0 %v5736_v29 }
  0xe8   : > { %1108 = vmatprep.mubr.f32.mxu0 %v5529_v24  ;;  %4163 = vmatpush1.bf16.msra.mxu0 %v4162_v11  ;;  %v4168_v24 = vpack.c.bf16 %v714_v57, %v713_v17  ;;  %v764_v11 = vld [vmem:[%s7397_s1 + $0x418] sm:$0xff]  ;;  %v5903_v57 = vld [vmem:[#allocation2 + $0x142] sm:$0xff] }
  0xe9   : > { %4164 = vmatprep.subr.bf16.mxu0 %v7402_v3 }
  0xeb   : > { %1109 = vmatmul.mubr.f32.gmra.mrb[14].mxu0 %v5747_v30 }
  0xec   : > { %1113 = vmatprep.mubr.f32.mxu0 %v5540_v33  ;;  %4166 = vmatpush1.bf16.msra.mxu0 %v4165_v15  ;;  %v4171_v33 = vpack.c.bf16 %v716_v62, %v715_v18  ;;  %v766_v15 = vld [vmem:[%s7397_s1 + $0x428] sm:$0xff]  ;;  %v5913_v62 = vld [vmem:[#allocation2 + $0x152] sm:$0xff] }
  0xed   : > { %4167 = vmatprep.subr.bf16.mxu0 %v7402_v3 }
  0xef   : > { %1114 = vmatmul.mubr.f32.gmra.mrb[16].mxu0 %v5758_v32 }
  0xf0   : > { %1118 = vmatprep.mubr.f32.mxu0 %v5551_v39  ;;  %4169 = vmatpush1.bf16.msra.mxu0 %v4168_v24  ;;  %v4174_v39 = vpack.c.bf16 %v718_v8, %v717_v5  ;;  %v768_v24 = vld [vmem:[%s7397_s1 + $0x438] sm:$0xff] }
  0xf1   : > { %4170 = vmatprep.subr.bf16.mxu0 %v7402_v3  ;;  %v5923_v8 = vld [vmem:[#allocation2 + $0x15a] sm:$0xff] }
  0xf3   : > { %1119 = vmatmul.mubr.f32.gmra.mrb[18].mxu0 %v5769_v35 }
  0xf4   : > { %1123 = vmatprep.mubr.f32.mxu0 %v5562_v45  ;;  %4172 = vmatpush1.bf16.msra.mxu0 %v4171_v33  ;;  %v4177_v45 = vpack.c.bf16 %v720_v14, %v719_v9  ;;  %v770_v33 = vld [vmem:[%s7397_s1 + $0x448] sm:$0xff]  ;;  %v5931_v9 = vld [vmem:[#allocation2 + $0x180] sm:$0xff] }
  0xf5   : > { %4173 = vmatprep.subr.bf16.mxu0 %v7402_v3 }
  0xf7   : > { %1124 = vmatmul.mubr.f32.gmra.mrb[20].mxu0 %v5780_v10 }
  0xf8   : > { %1128 = vmatprep.mubr.f32.mxu0 %v5573_v54  ;;  %4175 = vmatpush1.bf16.msra.mxu0 %v4174_v39  ;;  %v4180_v54 = vpack.c.bf16 %v722_v13, %v721_v12  ;;  %v772_v39 = vld [vmem:[%s7397_s1 + $0x458] sm:$0xff]  ;;  %v774_v12 = vld [vmem:[%s7397_s1 + $0x468] sm:$0xff] }
  0xf9   : > { %4176 = vmatprep.subr.bf16.mxu0 %v7402_v3  ;;  %v5943_v13 = vld [vmem:[#allocation2 + $0x188] sm:$0xff] }
  0xfb   : > { %1129 = vmatmul.mubr.f32.gmra.mrb[22].mxu0 %v5791_v21 }
  0xfc   : > { %1133 = vmatprep.mubr.f32.mxu0 %v5584_v58  ;;  %4178 = vmatpush1.bf16.msra.mxu0 %v4177_v45  ;;  %v4183_v58 = vpack.c.bf16 %v724_v22, %v723_v23  ;;  %v773_v45 = vld [vmem:[%s7397_s1 + $0x460] sm:$0xff]  ;;  %v5947_v23 = vld [vmem:[#allocation2 + $0x172] sm:$0xff] }
  0xfd   : > { %4179 = vmatprep.subr.bf16.mxu0 %v7402_v3  ;;  %v775_v22 = vld [vmem:[%s7397_s1 + $0x470] sm:$0xff] }
  0xff   : > { %1134 = vmatmul.mubr.f32.gmra.mrb[24].mxu0 %v5802_v46 }
 0x100   : > { %1138 = vmatprep.mubr.f32.mxu0 %v5595_v63  ;;  %4181 = vmatpush1.bf16.msra.mxu0 %v4180_v54  ;;  %v4186_v63 = vpack.c.bf16 %v726_v59, %v725_v26  ;;  %v4263_v54 = vpack.c.bf16 %v774_v12, %v773_v45  ;;  %v729_v26 = vld [vmem:[%s7397_s1 + $0x300] sm:$0xff]  ;;  %v730_v59 = vld [vmem:[%s7397_s1 + $0x308] sm:$0xff] }
 0x101   : > { %4182 = vmatprep.subr.bf16.mxu0 %v7402_v3  ;;  %v4975_v45 = vld [vmem:[#allocation2 + $0x61] sm:$0xff] }
 0x102   : > { %v745_v12 = vld [vmem:[%s7397_s1 + $0x380] sm:$0xff] }
 0x103   : > { %1139 = vmatmul.mubr.f32.gmra.mrb[26].mxu0 %v5813_v6 }
 0x104   : > { %1143 = vmatprep.mubr.f32.mxu0 %v5600_v1  ;;  %4184 = vmatpush1.bf16.msra.mxu0 %v4183_v58  ;;  %v4189_v1 = vpack.c.bf16 %v728_v19, %v727_v27  ;;  %v776_v58 = vld [vmem:[%s7397_s1 + $0x478] sm:$0xff]  ;;  %v4192_v27 = vpack.c.bf16 %v730_v59, %v729_v26  ;;  %v731_v19 = vld [vmem:[%s7397_s1 + $0x310] sm:$0xff] }
 0x105   : > { %4185 = vmatprep.subr.bf16.mxu0 %v7402_v3  ;;  %v748_v26 = vld [vmem:[%s7397_s1 + $0x398] sm:$0xff] }
 0x106   : > { %v4977_v59 = vld [vmem:[#allocation2 + $0x79] sm:$0xff] }
 0x107   : > { %1144 = vmatmul.mubr.f32.gmra.mrb[28].mxu0 %v5824_v31 }
 0x108   : > { %1148 = vmatprep.mubr.f32.mxu0 %v5605_v36  ;;  %4187 = vmatpush1.bf16.msra.mxu0 %v4186_v63  ;;  %v5845_v36 = vld [vmem:[#allocation2 + $0xca] sm:$0xff]  ;;  %v4267_v63 = vpack.c.bf16 %v776_v58, %v775_v22 }
 0x109   : > { %4188 = vmatprep.subr.bf16.mxu0 %v7402_v3  ;;  %v4976_v22 = vld [vmem:[#allocation2 + $0x69] sm:$0xff] }
 0x10a   : > { %v747_v58 = vld [vmem:[%s7397_s1 + $0x390] sm:$0xff] }
 0x10b   : > { %1149 = vmatmul.mubr.f32.gmra.mrb[30].mxu0 %v5835_v34 }
 0x10c   : > { %1153 = vmatprep.mubr.f32.mxu0 %v5609_v2  ;;  %4190 = vmatpush1.bf16.msra.mxu0 %v4189_v1  ;;  %v5853_v2 = vld [vmem:[#allocation2 + $0xe2] sm:$0xff]  ;;  %v732_v1 = vld [vmem:[%s7397_s1 + $0x318] sm:$0xff] }
 0x10d   : > { %4191 = vmatprep.subr.bf16.mxu0 %v7402_v3 }
 0x10f   : > { %1154 = vmatmul.mubr.f32.gmra.mrb[32].mxu0 %v5840_v37 }
 0x110   : > { %1158 = vmatprep.mubr.f32.mxu0 %v5613_v38  ;;  %v5861_v38 = vld [vmem:[#allocation2 + $0xfa] sm:$0xff] }
 0x113   : > { %1159 = vmatmul.mubr.f32.gmra.mrb[34].mxu0 %v5845_v36 }
 0x114   : > { %1163 = vmatprep.mubr.f32.mxu0 %v5617_v4  ;;  %v5865_v4 = vld [vmem:[#allocation2 + $0x10a] sm:$0xff] }
 0x117   : > { %1164 = vmatmul.mubr.f32.gmra.mrb[36].mxu0 %v5849_v7 }
 0x118   : > { %1168 = vmatprep.mubr.f32.mxu0 %v5621_v41  ;;  %v5869_v41 = vld [vmem:[#allocation2 + $0x112] sm:$0xff] }
 0x11b   : > { %1169 = vmatmul.mubr.f32.gmra.mrb[38].mxu0 %v5853_v2 }
 0x11c   : > { %1173 = vmatprep.mubr.f32.mxu0 %v5625_v42  ;;  %v5873_v42 = vld [vmem:[#allocation2 + $0x122] sm:$0xff] }
 0x11f   : > { %1174 = vmatmul.mubr.f32.gmra.mrb[40].mxu0 %v5857_v40 }
 0x120   : > { %1178 = vmatprep.mubr.f32.mxu0 %v5629_v44  ;;  %v761_v44 = vld [vmem:[%s7397_s1 + $0x400] sm:$0xff] }
 0x123   : > { %1179 = vmatmul.mubr.f32.gmra.mrb[42].mxu0 %v5861_v38 }
 0x124   : > { %1183 = vmatprep.mubr.f32.mxu0 %v5633_v47  ;;  %v762_v47 = vld [vmem:[%s7397_s1 + $0x408] sm:$0xff] }
 0x125   : > { %v4239_v43 = vpack.c.bf16 %v762_v47, %v761_v44  ;;  %v4969_v44 = vld [vmem:[#allocation2 + $0x19] sm:$0xff] }
 0x126   : > { %v733_v47 = vld [vmem:[%s7397_s1 + $0x320] sm:$0xff] }
 0x127   : > { %1184 = vmatmul.mubr.f32.gmra.mrb[44].mxu0 %v5865_v4  ;;  %4240 = vmatprep.subr.bf16.mxu1 %v4239_v43 }
 0x128   : > { %1188 = vmatprep.mubr.f32.mxu0 %v5637_v48  ;;  %v5883_v48 = vld [vmem:[#allocation2 + $0x12a] sm:$0xff]  ;;  %4242 = vmatpush3.bf16.msra.mxu1 %v4239_v43 }
 0x129   : > { %v734_v43 = vld [vmem:[%s7397_s1 + $0x328] sm:$0xff] }
 0x12b   : > { %1189 = vmatmul.mubr.f32.gmra.mrb[46].mxu0 %v5869_v41 }
 0x12c   : > { %1193 = vmatprep.mubr.f32.mxu0 %v5641_v49  ;;  %v763_v49 = vld [vmem:[%s7397_s1 + $0x410] sm:$0xff] }
 0x12d   : > { %v4243_v50 = vpack.c.bf16 %v764_v11, %v763_v49  ;;  %v4970_v49 = vld [vmem:[#allocation2 + $0x21] sm:$0xff]  ;;  %v735_v11 = vld [vmem:[%s7397_s1 + $0x330] sm:$0xff] }
 0x12f   : > { %1194 = vmatmul.mubr.f32.gmra.mrb[48].mxu0 %v5873_v42  ;;  %4244 = vmatprep.subr.bf16.mxu1 %v4243_v50 }
 0x130   : > { %1198 = vmatprep.mubr.f32.mxu0 %v5645_v51  ;;  %4246 = vmatpush3.bf16.msra.mxu1 %v4243_v50  ;;  %v765_v51 = vld [vmem:[%s7397_s1 + $0x420] sm:$0xff]  ;;  %v736_v50 = vld [vmem:[%s7397_s1 + $0x338] sm:$0xff] }
 0x131   : > { %v4247_v17 = vpack.c.bf16 %v766_v15, %v765_v51  ;;  %v4971_v51 = vld [vmem:[#allocation2 + $0x31] sm:$0xff]  ;;  %v737_v15 = vld [vmem:[%s7397_s1 + $0x340] sm:$0xff] }
 0x133   : > { %1199 = vmatmul.mubr.f32.gmra.mrb[50].mxu0 %v5883_v48  ;;  %4248 = vmatprep.subr.bf16.mxu1 %v4247_v17 }
 0x134   : > { %1203 = vmatprep.mubr.f32.mxu0 %v5649_v52  ;;  %4250 = vmatpush3.bf16.msra.mxu1 %v4247_v17  ;;  %v767_v52 = vld [vmem:[%s7397_s1 + $0x430] sm:$0xff]  ;;  %v738_v17 = vld [vmem:[%s7397_s1 + $0x348] sm:$0xff] }
 0x135   : > { %v4251_v18 = vpack.c.bf16 %v768_v24, %v767_v52  ;;  %v4972_v52 = vld [vmem:[#allocation2 + $0x39] sm:$0xff]  ;;  %v739_v24 = vld [vmem:[%s7397_s1 + $0x350] sm:$0xff] }
 0x137   : > { %1204 = vmatmul.mubr.f32.gmra.mrb[52].mxu0 %v5893_v53  ;;  %4252 = vmatprep.subr.bf16.mxu1 %v4251_v18 }
 0x138   : > { %1208 = vmatprep.mubr.f32.mxu0 %v5657_v56  ;;  %4254 = vmatpush3.bf16.msra.mxu1 %v4251_v18  ;;  %v769_v56 = vld [vmem:[%s7397_s1 + $0x440] sm:$0xff]  ;;  %v740_v18 = vld [vmem:[%s7397_s1 + $0x358] sm:$0xff] }
 0x139   : > { %v4255_v5 = vpack.c.bf16 %v770_v33, %v769_v56  ;;  %v4973_v56 = vld [vmem:[#allocation2 + $0x49] sm:$0xff]  ;;  %v741_v33 = vld [vmem:[%s7397_s1 + $0x360] sm:$0xff] }
 0x13b   : > { %1209 = vmatmul.mubr.f32.gmra.mrb[54].mxu0 %v5903_v57  ;;  %4256 = vmatprep.subr.bf16.mxu1 %v4255_v5 }
 0x13c   : > { %1213 = vmatprep.mubr.f32.mxu0 %v5665_v60  ;;  %4258 = vmatpush3.bf16.msra.mxu1 %v4255_v5  ;;  %v771_v60 = vld [vmem:[%s7397_s1 + $0x450] sm:$0xff]  ;;  %v742_v5 = vld [vmem:[%s7397_s1 + $0x368] sm:$0xff] }
 0x13d   : > { %v4259_v14 = vpack.c.bf16 %v772_v39, %v771_v60  ;;  %v4974_v60 = vld [vmem:[#allocation2 + $0x51] sm:$0xff] }
 0x13e   : > { %v743_v39 = vld [vmem:[%s7397_s1 + $0x370] sm:$0xff] }
 0x13f   : > { %1214 = vmatmul.mubr.f32.gmra.mrb[56].mxu0 %v5913_v62  ;;  %4260 = vmatprep.subr.bf16.mxu1 %v4259_v14 }
 0x140   : > { %1218 = vmatprep.mubr.f32.mxu0 %v5669_v0  ;;  %v5935_v0 = vld [vmem:[#allocation2 + $0x16a] sm:$0xff]  ;;  %4262 = vmatpush3.bf16.msra.mxu1 %v4259_v14  ;;  %v744_v14 = vld [vmem:[%s7397_s1 + $0x378] sm:$0xff] }
 0x141   : > { %4264 = vmatprep.subr.bf16.mxu1 %v4263_v54 }
 0x143   : > { %1219 = vmatmul.mubr.f32.gmra.mrb[58].mxu0 %v5923_v8 }
 0x144   : > { %1223 = vmatprep.mubr.f32.mxu0 %v5931_v9  ;;  %4266 = vmatpush3.bf16.msra.mxu1 %v4263_v54  ;;  %v746_v54 = vld [vmem:[%s7397_s1 + $0x388] sm:$0xff] }
 0x145   : > { %4268 = vmatprep.subr.bf16.mxu1 %v4267_v63 }
 0x147   : > { %1224 = vmatmul.mubr.f32.gmra.mrb[60].mxu0 %v5935_v0 }
 0x148   : > { %1228 = vmatprep.mubr.f32.mxu0 %v5943_v13  ;;  %4270 = vmatpush3.bf16.msra.mxu1 %v4267_v63  ;;  %v749_v63 = vld [vmem:[%s7397_s1 + $0x3a0] sm:$0xff] }
 0x149   : > { %4271 = vmatprep.subr.bf16.mxu1 %v7402_v3 }
 0x14b   : > { %1229 = vmatmul.mubr.f32.gmra.mrb[62].mxu0 %v5947_v23  ;;  %3920 = vmatmul.mubr.f32.vlgmr.msra.gmra.mrb[0].mxu1 %v5725_v28 }
 0x14c   : > { %1298 = vmatprep.mubr.f32.mxu0 %v5694_v16  ;;  %v4195_v16 = vpack.c.bf16 %v732_v1, %v731_v19  ;;  %3922 = vmatprep.mubr.f32.mxu1 %v5736_v29  ;;  %v4978_v19 = vld [vmem:[#allocation2 + $0x81] sm:$0xff]  ;;  %v751_v1 = vld [vmem:[%s7397_s1 + $0x3b0] sm:$0xff] }
 0x14f   : > { %1299 = vmatmul.mubr.f32.vlgmr.msra.gmra.mrb[0].mxu0 %v4969_v44  ;;  %3923 = vmatmul.mubr.f32.gmra.mrb[2].mxu1 %v5747_v30  ;;  %v752_v44 = vld [vmem:[%s7397_s1 + $0x3b8] sm:$0xff] }
 0x150   : > { %4193 = vmatpush1.bf16.msra.mxu0 %v4192_v27  ;;  %1303 = vmatprep.mubr.f32.mxu0 %v5705_v25  ;;  %v4198_v25 = vpack.c.bf16 %v734_v43, %v733_v47  ;;  %v750_v27 = vld [vmem:[%s7397_s1 + $0x3a8] sm:$0xff]  ;;  %v753_v47 = vld [vmem:[%s7397_s1 + $0x3c0] sm:$0xff] }
 0x151   : > { %4194 = vmatprep.subr.bf16.mxu0 %v7402_v3  ;;  %3925 = vmatprep.mubr.f32.mxu1 %v5758_v32  ;;  %v754_v43 = vld [vmem:[%s7397_s1 + $0x3c8] sm:$0xff] }
 0x153   : > { %1304 = vmatmul.mubr.f32.gmra.mrb[2].mxu0 %v4970_v49  ;;  %3926 = vmatmul.mubr.f32.gmra.mrb[4].mxu1 %v5769_v35  ;;  %v4980_v49 = vld [vmem:[#allocation2 + $0x99] sm:$0xff] }
 0x154   : > { %1308 = vmatprep.mubr.f32.mxu0 %v5473_v61  ;;  %4196 = vmatpush1.bf16.msra.mxu0 %v4195_v16  ;;  %v4201_v61 = vpack.c.bf16 %v736_v50, %v735_v11  ;;  %v4979_v16 = vld [vmem:[#allocation2 + $0x91] sm:$0xff]  ;;  %v4981_v50 = vld [vmem:[#allocation2 + $0xa9] sm:$0xff] }
 0x155   : > { %4197 = vmatprep.subr.bf16.mxu0 %v7402_v3  ;;  %3928 = vmatprep.mubr.f32.mxu1 %v5780_v10  ;;  %v756_v11 = vld [vmem:[%s7397_s1 + $0x3d8] sm:$0xff] }
 0x157   : > { %1309 = vmatmul.mubr.f32.gmra.mrb[4].mxu0 %v4971_v51  ;;  %3929 = vmatmul.mubr.f32.gmra.mrb[6].mxu1 %v5791_v21  ;;  %v757_v51 = vld [vmem:[%s7397_s1 + $0x3e0] sm:$0xff] }
 0x158   : > { %1313 = vmatprep.mubr.f32.mxu0 %v5725_v28  ;;  %4199 = vmatpush1.bf16.msra.mxu0 %v4198_v25  ;;  %v4204_v28 = vpack.c.bf16 %v738_v17, %v737_v15  ;;  %v755_v25 = vld [vmem:[%s7397_s1 + $0x3d0] sm:$0xff]  ;;  %v534_v17 = vld [vmem:[#allocation2 + $0x182] sm:$0xff] }
 0x159   : > { %4200 = vmatprep.subr.bf16.mxu0 %v7402_v3  ;;  %3931 = vmatprep.mubr.f32.mxu1 %v5802_v46  ;;  %v4982_v15 = vld [vmem:[#allocation2 + $0xb1] sm:$0xff] }
 0x15b   : > { %1314 = vmatmul.mubr.f32.gmra.mrb[6].mxu0 %v4972_v52  ;;  %3932 = vmatmul.mubr.f32.gmra.mrb[8].mxu1 %v5813_v6  ;;  %v759_v52 = vld [vmem:[%s7397_s1 + $0x3f0] sm:$0xff] }
 0x15c   : > { %1318 = vmatprep.mubr.f32.mxu0 %v5736_v29  ;;  %4202 = vmatpush1.bf16.msra.mxu0 %v4201_v61  ;;  %v4207_v29 = vpack.c.bf16 %v740_v18, %v739_v24  ;;  %v758_v61 = vld [vmem:[%s7397_s1 + $0x3e8] sm:$0xff] }
 0x15d   : > { %4203 = vmatprep.subr.bf16.mxu0 %v7402_v3  ;;  %3934 = vmatprep.mubr.f32.mxu1 %v5824_v31  ;;  %v535_v24 = vld [vmem:[#allocation2 + $0x18a] sm:$0xff]  ;;  %v4983_v18 = vld [vmem:[#allocation2 + $0xc1] sm:$0xff] }
 0x15f   : > { %1319 = vmatmul.mubr.f32.gmra.mrb[8].mxu0 %v4973_v56  ;;  %3935 = vmatmul.mubr.f32.gmra.mrb[10].mxu1 %v5835_v34  ;;  %v4984_v56 = vld [vmem:[#allocation2 + $0xc9] sm:$0xff] }
 0x160   : > { %1323 = vmatprep.mubr.f32.mxu0 %v5747_v30  ;;  %4205 = vmatpush1.bf16.msra.mxu0 %v4204_v28  ;;  %v4210_v30 = vpack.c.bf16 %v742_v5, %v741_v33  ;;  %v760_v28 = vld [vmem:[%s7397_s1 + $0x3f8] sm:$0xff]  ;;  %v4986_v33 = vld [vmem:[#allocation2 + $0xe1] sm:$0xff] }
 0x161   : > { %4206 = vmatprep.subr.bf16.mxu0 %v7402_v3  ;;  %3937 = vmatprep.mubr.f32.mxu1 %v5840_v37  ;;  %v4987_v5 = vld [vmem:[#allocation2 + $0xf1] sm:$0xff] }
 0x163   : > { %1324 = vmatmul.mubr.f32.gmra.mrb[10].mxu0 %v4974_v60  ;;  %3938 = vmatmul.mubr.f32.gmra.mrb[12].mxu1 %v5845_v36  ;;  %v4989_v60 = vld [vmem:[#allocation2 + $0x109] sm:$0xff] }
 0x164   : > { %1328 = vmatprep.mubr.f32.mxu0 %v5758_v32  ;;  %4208 = vmatpush1.bf16.msra.mxu0 %v4207_v29  ;;  %v4213_v32 = vpack.c.bf16 %v744_v14, %v743_v39  ;;  %v4985_v29 = vld [vmem:[#allocation2 + $0xd9] sm:$0xff] }
 0x165   : > { %4209 = vmatprep.subr.bf16.mxu0 %v7402_v3  ;;  %3940 = vmatprep.mubr.f32.mxu1 %v5849_v7  ;;  %v2320_v14 = vld [vmem:[%s7399_s3 + $0x18] sm:$0xff] }
 0x167   : > { %1329 = vmatmul.mubr.f32.gmra.mrb[12].mxu0 %v4975_v45  ;;  %3941 = vmatmul.mubr.f32.gmra.mrb[14].mxu1 %v5853_v2 }
 0x168   : > { %1333 = vmatprep.mubr.f32.mxu0 %v5769_v35  ;;  %4211 = vmatpush1.bf16.msra.mxu0 %v4210_v30  ;;  %v4216_v35 = vpack.c.bf16 %v746_v54, %v745_v12  ;;  %v569_v30 = vld [vmem:[#allocation2 + $0x31] sm:$0xff]  ;;  %v2322_v12 = vld [vmem:[%s7399_s3 + $0x28] sm:$0xff] }
 0x169   : > { %4212 = vmatprep.subr.bf16.mxu0 %v7402_v3  ;;  %3943 = vmatprep.mubr.f32.mxu1 %v5857_v40  ;;  %v538_v54 = vld [vmem:[#allocation2 + $0x38] sm:$0xff] }
 0x16b   : > { %1334 = vmatmul.mubr.f32.gmra.mrb[14].mxu0 %v4976_v22  ;;  %3944 = vmatmul.mubr.f32.gmra.mrb[16].mxu1 %v5861_v38  ;;  %v571_v22 = vld [vmem:[#allocation2 + $0x49] sm:$0xff] }
 0x16c   : > { %1338 = vmatprep.mubr.f32.mxu0 %v5780_v10  ;;  %4214 = vmatpush1.bf16.msra.mxu0 %v4213_v32  ;;  %v4219_v10 = vpack.c.bf16 %v748_v26, %v747_v58  ;;  %v2321_v32 = vld [vmem:[%s7399_s3 + $0x20] sm:$0xff]  ;;  %v2323_v58 = vld [vmem:[%s7399_s3 + $0x30] sm:$0xff]  ;;  %v2324_v26 = vld [vmem:[%s7399_s3 + $0x38] sm:$0xff] }
 0x16d   : > { %4215 = vmatprep.subr.bf16.mxu0 %v7402_v3  ;;  %3946 = vmatprep.mubr.f32.mxu1 %v5865_v4 }
 0x16f   : > { %1339 = vmatmul.mubr.f32.gmra.mrb[16].mxu0 %v4977_v59  ;;  %3947 = vmatmul.mubr.f32.gmra.mrb[18].mxu1 %v5869_v41  ;;  %v2445_v59 = vld [vmem:[%s7399_s3 + $0x400] sm:$0xff] }
 0x170   : > { %1343 = vmatprep.mubr.f32.mxu0 %v5791_v21  ;;  %4217 = vmatpush1.bf16.msra.mxu0 %v4216_v35  ;;  %v4222_v21 = vpack.c.bf16 %v750_v27, %v749_v63  ;;  %v4278_v35 = vpack.c.bf16 %v2322_v12, %v2321_v32  ;;  %v2446_v63 = vld [vmem:[%s7399_s3 + $0x408] sm:$0xff]  ;;  %v572_v27 = vld [vmem:[#allocation2 + $0x51] sm:$0xff] }
 0x171   : > { %4218 = vmatprep.subr.bf16.mxu0 %v7402_v3  ;;  %3949 = vmatprep.mubr.f32.mxu1 %v5873_v42  ;;  %v582_v32 = vld [vmem:[#allocation2 + $0xc9] sm:$0xff] }
 0x173   : > { %1344 = vmatmul.mubr.f32.gmra.mrb[18].mxu0 %v4978_v19  ;;  %3950 = vmatmul.mubr.f32.gmra.mrb[20].mxu1 %v5883_v48  ;;  %v6159_v19 = vpack.c.bf16 %v2446_v63, %v2445_v59  ;;  %v585_v59 = vld [vmem:[#allocation2 + $0xf1] sm:$0xff]  ;;  %v586_v63 = vld [vmem:[#allocation2 + $0xf9] sm:$0xff] }
 0x174   : > { %1348 = vmatprep.mubr.f32.mxu0 %v5802_v46  ;;  %4220 = vmatpush1.bf16.msra.mxu0 %v4219_v10  ;;  %v4225_v46 = vpack.c.bf16 %v752_v44, %v751_v1  ;;  %v539_v10 = vld [vmem:[#allocation2 + $0x48] sm:$0xff]  ;;  %v2325_v1 = vld [vmem:[%s7399_s3 + $0x40] sm:$0xff] }
 0x175   : > { %4221 = vmatprep.subr.bf16.mxu0 %v7402_v3  ;;  %3952 = vmatprep.mubr.f32.mxu1 %v5893_v53  ;;  %7432 = vst [vmem:[#allocation4_spill] sm:$0xff] %v6159_v19  ;;  %v2326_v44 = vld [vmem:[%s7399_s3 + $0x48] sm:$0xff] }
 0x177   : > { %1349 = vmatmul.mubr.f32.gmra.mrb[20].mxu0 %v4979_v16  ;;  %3953 = vmatmul.mubr.f32.gmra.mrb[22].mxu1 %v5903_v57  ;;  %v540_v16 = vld [vmem:[#allocation2 + $0x50] sm:$0xff] }
 0x178   : > { %1353 = vmatprep.mubr.f32.mxu0 %v5813_v6  ;;  %4223 = vmatpush1.bf16.msra.mxu0 %v4222_v21  ;;  %v4228_v6 = vpack.c.bf16 %v754_v43, %v753_v47  ;;  %v4281_v21 = vpack.c.bf16 %v2324_v26, %v2323_v58  ;;  %v4284_v47 = vpack.c.bf16 %v2326_v44, %v2325_v1  ;;  %v2327_v43 = vld [vmem:[%s7399_s3 + $0x50] sm:$0xff]  ;;  %v584_v58 = vld [vmem:[#allocation2 + $0xe1] sm:$0xff] }
 0x179   : > { %4224 = vmatprep.subr.bf16.mxu0 %v7402_v3  ;;  %3955 = vmatprep.mubr.f32.mxu1 %v5913_v62  ;;  %v552_v26 = vld [vmem:[#allocation2 + $0xe0] sm:$0xff]  ;;  %v555_v1 = vld [vmem:[#allocation2 + $0x108] sm:$0xff]  ;;  %v588_v44 = vld [vmem:[#allocation2 + $0x111] sm:$0xff] }
 0x17b   : > { %1354 = vmatmul.mubr.f32.gmra.mrb[22].mxu0 %v4980_v49  ;;  %3956 = vmatmul.mubr.f32.gmra.mrb[24].mxu1 %v5923_v8  ;;  %v2328_v49 = vld [vmem:[%s7399_s3 + $0x58] sm:$0xff] }
 0x17c   : > { %1358 = vmatprep.mubr.f32.mxu0 %v5824_v31  ;;  %4226 = vmatpush1.bf16.msra.mxu0 %v4225_v46  ;;  %v4231_v31 = vpack.c.bf16 %v756_v11, %v755_v25  ;;  %v573_v46 = vld [vmem:[#allocation2 + $0x61] sm:$0xff]  ;;  %v574_v25 = vld [vmem:[#allocation2 + $0x69] sm:$0xff]  ;;  %v4287_v11 = vpack.c.bf16 %v2328_v49, %v2327_v43 }
 0x17d   : > { %4227 = vmatprep.subr.bf16.mxu0 %v7402_v3  ;;  %3958 = vmatprep.mubr.f32.mxu1 %v5935_v0  ;;  %v2346_v43 = vld [vmem:[%s7399_s3 + $0xe8] sm:$0xff] }
 0x17f   : > { %1359 = vmatmul.mubr.f32.gmra.mrb[24].mxu0 %v4981_v50  ;;  %3959 = vmatmul.mubr.f32.gmra.mrb[26].mxu1 %v5947_v23  ;;  %v2329_v50 = vld [vmem:[%s7399_s3 + $0x60] sm:$0xff] }
 0x180   : > { %1363 = vmatprep.mubr.f32.mxu0 %v5835_v34  ;;  %4229 = vmatpush1.bf16.msra.mxu0 %v4228_v6  ;;  %v4234_v34 = vpack.c.bf16 %v758_v61, %v757_v51  ;;  %v541_v6 = vld [vmem:[#allocation2 + $0x60] sm:$0xff]  ;;  %v542_v51 = vld [vmem:[#allocation2 + $0x68] sm:$0xff] }
 0x181   : > { %4230 = vmatprep.subr.bf16.mxu0 %v7402_v3  ;;  %3961 = vmatprep.mubr.f32.mxu1 %v534_v17  ;;  %v575_v61 = vld [vmem:[#allocation2 + $0x79] sm:$0xff] }
 0x183   : > { %1364 = vmatmul.mubr.f32.gmra.mrb[26].mxu0 %v4982_v15  ;;  %3962 = vmatmul.mubr.f32.gmra.mrb[28].mxu1 %v535_v24 }
 0x184   : > { %1368 = vmatprep.mubr.f32.mxu0 %v5840_v37  ;;  %4232 = vmatpush1.bf16.msra.mxu0 %v4231_v31  ;;  %v4237_v37 = vpack.c.bf16 %v760_v28, %v759_v52  ;;  %v2330_v31 = vld [vmem:[%s7399_s3 + $0x68] sm:$0xff]  ;;  %v543_v52 = vld [vmem:[#allocation2 + $0x78] sm:$0xff] }
 0x185   : > { %4233 = vmatprep.subr.bf16.mxu0 %v7402_v3  ;;  %v4290_v15 = vpack.c.bf16 %v2330_v31, %v2329_v50  ;;  %v576_v28 = vld [vmem:[#allocation2 + $0x81] sm:$0xff]  ;;  %v2348_v50 = vld [vmem:[%s7399_s3 + $0xf8] sm:$0xff]  ;;  %v2447_v31 = vld [vmem:[%s7399_s3 + $0x410] sm:$0xff] }
 0x187   : > { %1369 = vmatmul.mubr.f32.gmra.mrb[28].mxu0 %v4983_v18  ;;  %v2333_v18 = vld [vmem:[%s7399_s3 + $0x80] sm:$0xff] }
 0x188   : > { %1373 = vmatprep.mubr.f32.mxu0 %v5845_v36  ;;  %4235 = vmatpush1.bf16.msra.mxu0 %v4234_v34  ;;  %v4988_v36 = vld [vmem:[#allocation2 + $0xf9] sm:$0xff]  ;;  %v2331_v34 = vld [vmem:[%s7399_s3 + $0x70] sm:$0xff] }
 0x189   : > { %4236 = vmatprep.subr.bf16.mxu0 %v7402_v3 }
 0x18b   : > { %1374 = vmatmul.mubr.f32.gmra.mrb[30].mxu0 %v4984_v56  ;;  %v544_v56 = vld [vmem:[#allocation2 + $0x80] sm:$0xff] }
 0x18c   : > { %1378 = vmatprep.mubr.f32.mxu0 %v5849_v7  ;;  %4238 = vmatpush1.bf16.msra.mxu0 %v4237_v37  ;;  %v4990_v7 = vld [vmem:[#allocation2 + $0x111] sm:$0xff]  ;;  %v2334_v37 = vld [vmem:[%s7399_s3 + $0x88] sm:$0xff] }
 0x18d   : > { %4464 = vmatprep.subr.bf16.mxu0 %v6159_v19 }
 0x18f   : > { %1379 = vmatmul.mubr.f32.gmra.mrb[32].mxu0 %v4985_v29  ;;  %v577_v29 = vld [vmem:[#allocation2 + $0x91] sm:$0xff] }
 0x190   : > { %1383 = vmatprep.mubr.f32.mxu0 %v5853_v2  ;;  %v4991_v2 = vld [vmem:[#allocation2 + $0x121] sm:$0xff] }
 0x193   : > { %1384 = vmatmul.mubr.f32.gmra.mrb[34].mxu0 %v4986_v33  ;;  %v4296_v33 = vpack.c.bf16 %v2334_v37, %v2333_v18  ;;  %v2449_v18 = vld [vmem:[%s7399_s3 + $0x420] sm:$0xff]  ;;  %v2450_v37 = vld [vmem:[%s7399_s3 + $0x428] sm:$0xff] }
 0x194   : > { %1388 = vmatprep.mubr.f32.mxu0 %v5857_v40  ;;  %v4992_v40 = vld [vmem:[#allocation2 + $0x129] sm:$0xff] }
 0x197   : > { %1389 = vmatmul.mubr.f32.gmra.mrb[36].mxu0 %v4987_v5  ;;  %v2335_v5 = vld [vmem:[%s7399_s3 + $0x90] sm:$0xff] }
 0x198   : > { %1393 = vmatprep.mubr.f32.mxu0 %v5861_v38  ;;  %v4993_v38 = vld [vmem:[#allocation2 + $0x139] sm:$0xff] }
 0x19b   : > { %1394 = vmatmul.mubr.f32.gmra.mrb[38].mxu0 %v4988_v36  ;;  %v2336_v36 = vld [vmem:[%s7399_s3 + $0x98] sm:$0xff] }
 0x19c   : > { %1398 = vmatprep.mubr.f32.mxu0 %v5865_v4  ;;  %v4994_v4 = vld [vmem:[#allocation2 + $0x141] sm:$0xff] }
 0x19f   : > { %1399 = vmatmul.mubr.f32.gmra.mrb[40].mxu0 %v4989_v60  ;;  %v545_v60 = vld [vmem:[#allocation2 + $0x90] sm:$0xff] }
 0x1a0   : > { %1403 = vmatprep.mubr.f32.mxu0 %v5869_v41  ;;  %v4995_v41 = vld [vmem:[#allocation2 + $0x151] sm:$0xff] }
 0x1a3   : > { %1404 = vmatmul.mubr.f32.gmra.mrb[42].mxu0 %v4990_v7  ;;  %v578_v7 = vld [vmem:[#allocation2 + $0x99] sm:$0xff] }
 0x1a4   : > { %1408 = vmatprep.mubr.f32.mxu0 %v5873_v42  ;;  %v4996_v42 = vld [vmem:[#allocation2 + $0x159] sm:$0xff] }
 0x1a7   : > { %1409 = vmatmul.mubr.f32.gmra.mrb[44].mxu0 %v4991_v2  ;;  %v4299_v2 = vpack.c.bf16 %v2336_v36, %v2335_v5  ;;  %v6271_v5 = vld [vmem:[#allocation2] sm:$0xff] }
 0x1a8   : > { %1413 = vmatprep.mubr.f32.mxu0 %v5883_v48  ;;  %v4997_v48 = vld [vmem:[#allocation2 + $0x169] sm:$0xff]  ;;  %v2061_v36 = vld [vmem:[#allocation3 + $0x9] sm:$0xff] }
 0x1ab   : > { %1414 = vmatmul.mubr.f32.gmra.mrb[46].mxu0 %v4992_v40  ;;  %v2337_v40 = vld [vmem:[%s7399_s3 + $0xa0] sm:$0xff] }
 0x1ac   : > { %1418 = vmatprep.mubr.f32.mxu0 %v5893_v53  ;;  %v4998_v53 = vld [vmem:[#allocation2 + $0x171] sm:$0xff] }
 0x1af   : > { %1419 = vmatmul.mubr.f32.gmra.mrb[48].mxu0 %v4993_v38  ;;  %v2338_v38 = vld [vmem:[%s7399_s3 + $0xa8] sm:$0xff] }
 0x1b0   : > { %1423 = vmatprep.mubr.f32.mxu0 %v5903_v57  ;;  %v631_v57 = vld [vmem:[#allocation2 + $0x19a] sm:$0xff] }
 0x1b1   : > { %3964 = vmatprep.mubr.f32.mxu1 %v631_v57  ;;  %v547_v57 = vld [vmem:[#allocation2 + $0xa8] sm:$0xff] }
 0x1b3   : > { %1424 = vmatmul.mubr.f32.gmra.mrb[50].mxu0 %v4994_v4  ;;  %v546_v4 = vld [vmem:[#allocation2 + $0x98] sm:$0xff] }
 0x1b4   : > { %1428 = vmatprep.mubr.f32.mxu0 %v5913_v62  ;;  %v632_v62 = vld [vmem:[#allocation2 + $0x1a2] sm:$0xff] }
 0x1b5   : > { %3965 = vmatmul.mubr.f32.gmra.mrb[30].mxu1 %v632_v62  ;;  %v580_v62 = vld [vmem:[#allocation2 + $0xb1] sm:$0xff] }
 0x1b7   : > { %1429 = vmatmul.mubr.f32.gmra.mrb[52].mxu0 %v4995_v41  ;;  %v579_v41 = vld [vmem:[#allocation2 + $0xa9] sm:$0xff] }
 0x1b8   : > { %1433 = vmatprep.mubr.f32.mxu0 %v5923_v8  ;;  %v2317_v8 = vld [vmem:[%s7399_s3] sm:$0xff] }
 0x1bb   : > { %1434 = vmatmul.mubr.f32.gmra.mrb[54].mxu0 %v4996_v42  ;;  %v4302_v42 = vpack.c.bf16 %v2338_v38, %v2337_v40  ;;  %v593_v38 = vld [vmem:[#allocation2 + $0x151] sm:$0xff] }
 0x1bc   : > { %1438 = vmatprep.mubr.f32.mxu0 %v5935_v0  ;;  %v2318_v0 = vld [vmem:[%s7399_s3 + $0x8] sm:$0xff] }
 0x1bd   : > { %v4272_v39 = vpack.c.bf16 %v2318_v0, %v2317_v8  ;;  %v2341_v8 = vld [vmem:[%s7399_s3 + $0xc0] sm:$0xff]  ;;  %v2342_v0 = vld [vmem:[%s7399_s3 + $0xc8] sm:$0xff] }
 0x1bf   : > { %1439 = vmatmul.mubr.f32.gmra.mrb[56].mxu0 %v4997_v48  ;;  %4273 = vmatpush1.bf16.msra.mxu1 %v4272_v39  ;;  %v2339_v48 = vld [vmem:[%s7399_s3 + $0xb0] sm:$0xff]  ;;  %v4308_v39 = vpack.c.bf16 %v2342_v0, %v2341_v8  ;;  %v2350_v8 = vld [vmem:[%s7399_s3 + $0x108] sm:$0xff] }
 0x1c0   : > { %1443 = vmatprep.mubr.f32.mxu0 %v5947_v23  ;;  %v2319_v23 = vld [vmem:[%s7399_s3 + $0x10] sm:$0xff]  ;;  %4274 = vmatprep.subr.bf16.mxu1 %v7402_v3 }
 0x1c1   : > { %v4275_v45 = vpack.c.bf16 %v2320_v14, %v2319_v23  ;;  %v548_v23 = vld [vmem:[#allocation2 + $0xb0] sm:$0xff] }
 0x1c2   : > { %v2343_v14 = vld [vmem:[%s7399_s3 + $0xd0] sm:$0xff] }
 0x1c3   : > { %1444 = vmatmul.mubr.f32.gmra.mrb[58].mxu0 %v4998_v53  ;;  %4276 = vmatpush1.bf16.msra.mxu1 %v4275_v45  ;;  %v2340_v53 = vld [vmem:[%s7399_s3 + $0xb8] sm:$0xff]  ;;  %v549_v45 = vld [vmem:[#allocation2 + $0xc0] sm:$0xff] }
 0x1c4   : > { %1448 = vmatprep.mubr.f32.mxu0 %v534_v17  ;;  %4277 = vmatprep.subr.bf16.mxu1 %v7402_v3  ;;  %v2332_v17 = vld [vmem:[%s7399_s3 + $0x78] sm:$0xff] }
 0x1c7   : > { %1449 = vmatmul.mubr.f32.gmra.mrb[60].mxu0 %v5652_v55  ;;  %v537_v55 = vld [vmem:[#allocation2 + $0x30] sm:$0xff]  ;;  %4279 = vmatpush1.bf16.msra.mxu1 %v4278_v35  ;;  %v551_v35 = vld [vmem:[#allocation2 + $0xd8] sm:$0xff] }
 0x1c8   : > { %1453 = vmatprep.mubr.f32.mxu0 %v535_v24  ;;  %4280 = vmatprep.subr.bf16.mxu1 %v7402_v3  ;;  %v4293_v24 = vpack.c.bf16 %v2332_v17, %v2331_v34  ;;  %v591_v17 = vld [vmem:[#allocation2 + $0x139] sm:$0xff] }
 0x1cb   : > { %1454 = vmatmul.mubr.f32.gmra.mrb[62].mxu0 %v5660_v20  ;;  %v570_v20 = vld [vmem:[#allocation2 + $0x39] sm:$0xff]  ;;  %4282 = vmatpush1.bf16.msra.mxu1 %v4281_v21  ;;  %v587_v21 = vld [vmem:[#allocation2 + $0x109] sm:$0xff] }
 0x1cc   : > { %1523 = vmatprep.mubr.f32.mxu0 %v569_v30  ;;  %4283 = vmatprep.subr.bf16.mxu1 %v7402_v3  ;;  %v4305_v30 = vpack.c.bf16 %v2340_v53, %v2339_v48  ;;  %v2454_v48 = vld [vmem:[%s7399_s3 + $0x448] sm:$0xff]  ;;  %v561_v53 = vld [vmem:[#allocation2 + $0x150] sm:$0xff] }
 0x1cf   : > { %1524 = vmatmul.mubr.f32.vlgmr.msra.gmra.mrb[0].mxu0 %v537_v55  ;;  %4285 = vmatpush1.bf16.msra.mxu1 %v4284_v47  ;;  %v581_v55 = vld [vmem:[#allocation2 + $0xc1] sm:$0xff] }
 0x1d0   : > { %1528 = vmatprep.mubr.f32.mxu0 %v570_v20  ;;  %4466 = vmatpush3.bf16.msra.mxu0 %v6159_v19  ;;  %v2344_v20 = vld [vmem:[%s7399_s3 + $0xd8] sm:$0xff]  ;;  %v2345_v47 = vld [vmem:[%s7399_s3 + $0xe0] sm:$0xff] }
 0x1d1   : > { %4286 = vmatprep.subr.bf16.mxu1 %v7402_v3  ;;  %v4311_v12 = vpack.c.bf16 %v2344_v20, %v2343_v14  ;;  %v4314_v49 = vpack.c.bf16 %v2346_v43, %v2345_v47  ;;  %v595_v20 = vld [vmem:[#allocation2 + $0x169] sm:$0xff]  ;;  %v2353_v47 = vld [vmem:[%s7399_s3 + $0x120] sm:$0xff] }
 0x1d2   : > { %v2354_v43 = vld [vmem:[%s7399_s3 + $0x128] sm:$0xff] }
 0x1d3   : > { %1529 = vmatmul.mubr.f32.gmra.mrb[2].mxu0 %v538_v54  ;;  %4288 = vmatpush1.bf16.msra.mxu1 %v4287_v11  ;;  %v550_v54 = vld [vmem:[#allocation2 + $0xc8] sm:$0xff]  ;;  %v2347_v11 = vld [vmem:[%s7399_s3 + $0xf0] sm:$0xff] }
 0x1d4   : > { %1533 = vmatprep.mubr.f32.mxu0 %v571_v22  ;;  %4289 = vmatprep.subr.bf16.mxu1 %v7402_v3  ;;  %v583_v22 = vld [vmem:[#allocation2 + $0xd9] sm:$0xff] }
 0x1d7   : > { %1534 = vmatmul.mubr.f32.gmra.mrb[4].mxu0 %v539_v10  ;;  %4291 = vmatpush1.bf16.msra.mxu1 %v4290_v15  ;;  %v553_v10 = vld [vmem:[#allocation2 + $0xf0] sm:$0xff]  ;;  %v558_v15 = vld [vmem:[#allocation2 + $0x128] sm:$0xff] }
 0x1d8   : > { %1538 = vmatprep.mubr.f32.mxu0 %v572_v27  ;;  %4292 = vmatprep.subr.bf16.mxu1 %v7402_v3  ;;  %v554_v27 = vld [vmem:[#allocation2 + $0xf8] sm:$0xff] }
 0x1db   : > { %1539 = vmatmul.mubr.f32.gmra.mrb[6].mxu0 %v540_v16  ;;  %4294 = vmatpush1.bf16.msra.mxu1 %v4293_v24  ;;  %v556_v16 = vld [vmem:[#allocation2 + $0x110] sm:$0xff] }
 0x1dc   : > { %1543 = vmatprep.mubr.f32.mxu0 %v573_v46  ;;  %4295 = vmatprep.subr.bf16.mxu1 %v7402_v3  ;;  %v589_v46 = vld [vmem:[#allocation2 + $0x121] sm:$0xff] }
 0x1df   : > { %1544 = vmatmul.mubr.f32.gmra.mrb[8].mxu0 %v541_v6  ;;  %4297 = vmatpush1.bf16.msra.mxu1 %v4296_v33  ;;  %v557_v6 = vld [vmem:[#allocation2 + $0x120] sm:$0xff] }
 0x1e0   : > { %1548 = vmatprep.mubr.f32.mxu0 %v574_v25  ;;  %4298 = vmatprep.subr.bf16.mxu1 %v7402_v3  ;;  %v590_v25 = vld [vmem:[#allocation2 + $0x129] sm:$0xff]  ;;  %v592_v33 = vld [vmem:[#allocation2 + $0x141] sm:$0xff] }
 0x1e3   : > { %1549 = vmatmul.mubr.f32.gmra.mrb[10].mxu0 %v542_v51  ;;  %4300 = vmatpush1.bf16.msra.mxu1 %v4299_v2  ;;  %v2448_v51 = vld [vmem:[%s7399_s3 + $0x418] sm:$0xff]  ;;  %v560_v2 = vld [vmem:[#allocation2 + $0x140] sm:$0xff] }
 0x1e4   : > { %1553 = vmatprep.mubr.f32.mxu0 %v575_v61  ;;  %4301 = vmatprep.subr.bf16.mxu1 %v7402_v3  ;;  %v4317_v61 = vpack.c.bf16 %v2348_v50, %v2347_v11  ;;  %v6254_v34 = vpack.c.bf16 %v2448_v51, %v2447_v31  ;;  %v600_v31 = vld [vmem:[#allocation2 + $0x1a1] sm:$0xff]  ;;  %v2355_v51 = vld [vmem:[%s7399_s3 + $0x130] sm:$0xff] }
 0x1e6   : > { %7433 = vst [vmem:[#allocation5_spill] sm:$0xff] %v6254_v34  ;;  %4468 = vmatprep.subr.bf16.mxu0 %v6254_v34 }
 0x1e7   : > { %1554 = vmatmul.mubr.f32.gmra.mrb[12].mxu0 %v543_v52  ;;  %4303 = vmatpush1.bf16.msra.mxu1 %v4302_v42  ;;  %v2453_v42 = vld [vmem:[%s7399_s3 + $0x440] sm:$0xff] }
 0x1e8   : > { %1558 = vmatprep.mubr.f32.mxu0 %v576_v28  ;;  %4304 = vmatprep.subr.bf16.mxu1 %v7402_v3  ;;  %v2060_v28 = vld [vmem:[#allocation3 + $0x1] sm:$0xff] }
 0x1e9   : > { %2532 = vmatprep.mubr.f32.mxu1 %v2060_v28  ;;  %4470 = vmatpush3.bf16.msra.mxu0 %v6254_v34  ;;  %v2358_v28 = vld [vmem:[%s7399_s3 + $0x148] sm:$0xff] }
 0x1eb   : > { %1559 = vmatmul.mubr.f32.gmra.mrb[14].mxu0 %v544_v56  ;;  %4306 = vmatpush1.bf16.msra.mxu1 %v4305_v30  ;;  %v559_v56 = vld [vmem:[#allocation2 + $0x138] sm:$0xff]  ;;  %v2349_v30 = vld [vmem:[%s7399_s3 + $0x100] sm:$0xff] }
 0x1ec   : > { %1563 = vmatprep.mubr.f32.mxu0 %v577_v29  ;;  %4307 = vmatprep.subr.bf16.mxu1 %v7402_v3  ;;  %v6269_v29 = vpack.c.bf16 %v2450_v37, %v2449_v18  ;;  %v4320_v0 = vpack.c.bf16 %v2350_v8, %v2349_v30  ;;  %v2364_v30 = vld [vmem:[%s7399_s3 + $0x178] sm:$0xff] }
 0x1ee   : > { %7434 = vst [vmem:[#allocation6_spill] sm:$0xff] %v6269_v29  ;;  %4472 = vmatprep.subr.bf16.mxu0 %v6269_v29 }
 0x1ef   : > { %1564 = vmatmul.mubr.f32.gmra.mrb[16].mxu0 %v545_v60  ;;  %4309 = vmatpush1.bf16.msra.mxu1 %v4308_v39  ;;  %v2451_v60 = vld [vmem:[%s7399_s3 + $0x430] sm:$0xff]  ;;  %v562_v39 = vld [vmem:[#allocation2 + $0x158] sm:$0xff] }
 0x1f0   : > { %1568 = vmatprep.mubr.f32.mxu0 %v578_v7  ;;  %4310 = vmatprep.subr.bf16.mxu1 %v7402_v3  ;;  %v2452_v7 = vld [vmem:[%s7399_s3 + $0x438] sm:$0xff] }
 0x1f1   : > { %4474 = vmatpush3.bf16.msra.mxu0 %v6269_v29  ;;  %v6282_v40 = vpack.c.bf16 %v2452_v7, %v2451_v60 }
 0x1f3   : > { %1569 = vmatmul.mubr.f32.gmra.mrb[18].mxu0 %v546_v4  ;;  %4312 = vmatpush1.bf16.msra.mxu1 %v4311_v12  ;;  %7435 = vst [vmem:[#allocation7_spill] sm:$0xff] %v6282_v40  ;;  %v2457_v12 = vld [vmem:[%s7399_s3 + $0x460] sm:$0xff] }
 0x1f4   : > { %1573 = vmatprep.mubr.f32.mxu0 %v579_v41  ;;  %4313 = vmatprep.subr.bf16.mxu1 %v7402_v3 }
 0x1f5   : > { %4476 = vmatprep.subr.bf16.mxu0 %v6282_v40 }
 0x1f6   : > { %4478 = vmatpush3.bf16.msra.mxu0 %v6282_v40 }
 0x1f7   : > { %1574 = vmatmul.mubr.f32.gmra.mrb[20].mxu0 %v547_v57  ;;  %4315 = vmatpush1.bf16.msra.mxu1 %v4314_v49  ;;  %v6297_v57 = vpack.c.bf16 %v2454_v48, %v2453_v42  ;;  %v4326_v49 = vpack.c.bf16 %v2354_v43, %v2353_v47  ;;  %v2371_v43 = vld [vmem:[%s7399_s3 + $0x1b0] sm:$0xff] }
 0x1f8   : > { %1578 = vmatprep.mubr.f32.mxu0 %v580_v62  ;;  %4316 = vmatprep.subr.bf16.mxu1 %v7402_v3  ;;  %v594_v62 = vld [vmem:[#allocation2 + $0x159] sm:$0xff] }
 0x1f9   : > { %7436 = vst [vmem:[#allocation8_spill] sm:$0xff] %v6297_v57  ;;  %4480 = vmatprep.subr.bf16.mxu0 %v6297_v57 }
 0x1fa   : > { %4482 = vmatpush3.bf16.msra.mxu0 %v6297_v57 }
 0x1fb   : > { %1579 = vmatmul.mubr.f32.gmra.mrb[22].mxu0 %v548_v23  ;;  %4318 = vmatpush1.bf16.msra.mxu1 %v4317_v61  ;;  %v2455_v23 = vld [vmem:[%s7399_s3 + $0x450] sm:$0xff] }
 0x1fc   : > { %1583 = vmatprep.mubr.f32.mxu0 %v581_v55  ;;  %4319 = vmatprep.subr.bf16.mxu1 %v7402_v3  ;;  %v2456_v55 = vld [vmem:[%s7399_s3 + $0x458] sm:$0xff] }
 0x1fd   : > { %v6312_v14 = vpack.c.bf16 %v2456_v55, %v2455_v23  ;;  %v2365_v55 = vld [vmem:[%s7399_s3 + $0x180] sm:$0xff] }
 0x1fe   : > { %2533 = vmatmul.mubr.f32.vlgmr.msra.gmra.mrb[32].mxu1 %v6271_v5 }
 0x1ff   : > { %1584 = vmatmul.mubr.f32.gmra.mrb[24].mxu0 %v549_v45  ;;  %2537 = vmatprep.mubr.f32.mxu1 %v2061_v36  ;;  %7437 = vst [vmem:[#allocation9_spill] sm:$0xff] %v6312_v14 }
 0x200   : > { %1588 = vmatprep.mubr.f32.mxu0 %v582_v32  ;;  %4321 = vmatpush1.bf16.msra.mxu1 %v4320_v0 }
 0x201   : > { %4322 = vmatprep.subr.bf16.mxu1 %v7402_v3  ;;  %4484 = vmatprep.subr.bf16.mxu0 %v6312_v14 }
 0x202   : > { %2538 = vmatmul.mubr.f32.gmra.mrb[34].mxu1 %v6271_v5  ;;  %4486 = vmatpush3.bf16.msra.mxu0 %v6312_v14 }
 0x203   : > { %1589 = vmatmul.mubr.f32.gmra.mrb[26].mxu0 %v550_v54  ;;  %v2458_v54 = vld [vmem:[%s7399_s3 + $0x468] sm:$0xff] }
 0x204   : > { %1593 = vmatprep.mubr.f32.mxu0 %v583_v22  ;;  %v563_v22 = vld [vmem:[#allocation2 + $0x168] sm:$0xff] }
 0x207   : > { %1594 = vmatmul.mubr.f32.gmra.mrb[28].mxu0 %v551_v35  ;;  %v6327_v35 = vpack.c.bf16 %v2458_v54, %v2457_v12 }
 0x208   : > { %1598 = vmatprep.mubr.f32.mxu0 %v584_v58  ;;  %v596_v58 = vld [vmem:[#allocation2 + $0x171] sm:$0xff] }
 0x209   : > { %7438 = vst [vmem:[#allocation10_spill] sm:$0xff] %v6327_v35  ;;  %4488 = vmatprep.subr.bf16.mxu0 %v6327_v35 }
 0x20a   : > { %4490 = vmatpush3.bf16.msra.mxu0 %v6327_v35 }
 0x20b   : > { %1599 = vmatmul.mubr.f32.gmra.mrb[30].mxu0 %v552_v26  ;;  %v2351_v26 = vld [vmem:[%s7399_s3 + $0x110] sm:$0xff] }
 0x20c   : > { %1603 = vmatprep.mubr.f32.mxu0 %v585_v59  ;;  %v2352_v59 = vld [vmem:[%s7399_s3 + $0x118] sm:$0xff] }
 0x20f   : > { %1604 = vmatmul.mubr.f32.gmra.mrb[32].mxu0 %v553_v10  ;;  %v4323_v10 = vpack.c.bf16 %v2352_v59, %v2351_v26 }
 0x210   : > { %1608 = vmatprep.mubr.f32.mxu0 %v586_v63  ;;  %v2459_v63 = vld [vmem:[%s7399_s3 + $0x470] sm:$0xff] }
 0x211   : > { %4324 = vmatpush1.bf16.msra.mxu1 %v4323_v10 }
 0x212   : > { %4325 = vmatprep.subr.bf16.mxu1 %v7402_v3 }
 0x213   : > { %1609 = vmatmul.mubr.f32.gmra.mrb[34].mxu0 %v554_v27  ;;  %v2460_v27 = vld [vmem:[%s7399_s3 + $0x478] sm:$0xff] }
 0x214   : > { %1613 = vmatprep.mubr.f32.mxu0 %v587_v21  ;;  %v564_v21 = vld [vmem:[#allocation2 + $0x170] sm:$0xff] }
 0x215   : > { %4327 = vmatpush1.bf16.msra.mxu1 %v4326_v49  ;;  %v2372_v49 = vld [vmem:[%s7399_s3 + $0x1b8] sm:$0xff] }
 0x216   : > { %4328 = vmatprep.subr.bf16.mxu1 %v7402_v3 }
 0x217   : > { %1614 = vmatmul.mubr.f32.gmra.mrb[36].mxu0 %v555_v1  ;;  %v6343_v1 = vpack.c.bf16 %v2460_v27, %v2459_v63  ;;  %v2369_v63 = vld [vmem:[%s7399_s3 + $0x1a0] sm:$0xff]  ;;  %v2370_v27 = vld [vmem:[%s7399_s3 + $0x1a8] sm:$0xff] }
 0x218   : > { %1618 = vmatprep.mubr.f32.mxu0 %v588_v44 }
 0x219   : > { %7439 = vst [vmem:[#allocation11_spill] sm:$0xff] %v6343_v1  ;;  %4492 = vmatprep.subr.bf16.mxu0 %v6343_v1 }
 0x21a   : > { %4494 = vmatpush3.bf16.msra.mxu0 %v6343_v1 }
 0x21b   : > { %1619 = vmatmul.mubr.f32.gmra.mrb[38].mxu0 %v556_v16 }
 0x21c   : > { %1623 = vmatprep.mubr.f32.mxu0 %v589_v46  ;;  %v5000_v46 = vld [vmem:[#allocation2 + $0x181] sm:$0xff] }
 0x21e   : > { %v6257_v52 = vpop.f32.mrb[0].mxu1 }
 0x21f   : > { %1624 = vmatmul.mubr.f32.gmra.mrb[40].mxu0 %v557_v6  ;;  %v6260_v24 = vpop.f32.mrb[1].mxu1  ;;  %v5001_v6 = vld [vmem:[#allocation2 + $0x189] sm:$0xff] }
 0x220   : > { %1628 = vmatprep.mubr.f32.mxu0 %v590_v25  ;;  %v599_v25 = vld [vmem:[#allocation2 + $0x199] sm:$0xff] }
 0x222   : > { %v6286_v4 = vpop.f32.mrb[2].mxu1 }
 0x223   : > { %1629 = vmatmul.mubr.f32.gmra.mrb[42].mxu0 %v558_v15  ;;  %v6288_v41 = vpop.f32.mrb[3].mxu1 }
 0x224   : > { %1633 = vmatprep.mubr.f32.mxu0 %v591_v17  ;;  %v2357_v17 = vld [vmem:[%s7399_s3 + $0x140] sm:$0xff] }
 0x225   : > { %v4332_v18 = vpack.c.bf16 %v2358_v28, %v2357_v17 }
 0x226   : > { %v6317_v45 = vpop.f32.mrb[4].mxu1 }
 0x227   : > { %1634 = vmatmul.mubr.f32.gmra.mrb[44].mxu0 %v559_v56  ;;  %v6319_v32 = vpop.f32.mrb[5].mxu1 }
 0x228   : > { %1638 = vmatprep.mubr.f32.mxu0 %v592_v33  ;;  %v2359_v33 = vld [vmem:[%s7399_s3 + $0x150] sm:$0xff] }
 0x22a   : > { %v6348_v44 = vpop.f32.mrb[6].mxu1 }
 0x22b   : > { %1639 = vmatmul.mubr.f32.gmra.mrb[46].mxu0 %v560_v2  ;;  %v6350_v16 = vpop.f32.mrb[7].mxu1  ;;  %v2361_v2 = vld [vmem:[%s7399_s3 + $0x160] sm:$0xff] }
 0x22c   : > { %1643 = vmatprep.mubr.f32.mxu0 %v593_v38  ;;  %v2362_v38 = vld [vmem:[%s7399_s3 + $0x168] sm:$0xff] }
 0x22d   : > { %v4338_v42 = vpack.c.bf16 %v2362_v38, %v2361_v2  ;;  %v2377_v38 = vld [vmem:[%s7399_s3 + $0x1e0] sm:$0xff] }
 0x22e   : > { %v6361_v11 = vpop.f32.mrb[8].mxu1 }
 0x22f   : > { %1644 = vmatmul.mubr.f32.gmra.mrb[48].mxu0 %v561_v53  ;;  %v6364_v50 = vpop.f32.mrb[9].mxu1 }
 0x230   : > { %1648 = vmatprep.mubr.f32.mxu0 %v594_v62  ;;  %v2363_v62 = vld [vmem:[%s7399_s3 + $0x170] sm:$0xff] }
 0x231   : > { %v4341_v8 = vpack.c.bf16 %v2364_v30, %v2363_v62  ;;  %v6498_v30 = vld [vmem:[%s7398_s2] ss:$0 sm:$0xff] }
 0x233   : > { %1649 = vmatmul.mubr.f32.gmra.mrb[50].mxu0 %v562_v39  ;;  %v2366_v39 = vld [vmem:[%s7399_s3 + $0x188] sm:$0xff] }
 0x234   : > { %1653 = vmatprep.mubr.f32.mxu0 %v595_v20  ;;  %v4344_v20 = vpack.c.bf16 %v2366_v39, %v2365_v55 }
 0x237   : > { %1654 = vmatmul.mubr.f32.gmra.mrb[52].mxu0 %v563_v22  ;;  %v2367_v22 = vld [vmem:[%s7399_s3 + $0x190] sm:$0xff] }
 0x238   : > { %1658 = vmatprep.mubr.f32.mxu0 %v596_v58  ;;  %v2368_v58 = vld [vmem:[%s7399_s3 + $0x198] sm:$0xff] }
 0x239   : > { %v4347_v26 = vpack.c.bf16 %v2368_v58, %v2367_v22  ;;  %v2380_v22 = vld [vmem:[%s7399_s3 + $0x1f8] sm:$0xff] }
 0x23b   : > { %1659 = vmatmul.mubr.f32.gmra.mrb[54].mxu0 %v564_v21  ;;  %v4350_v21 = vpack.c.bf16 %v2370_v27, %v2369_v63 }
 0x23c   : > { %1663 = vmatprep.mubr.f32.mxu0 %v5000_v46 }
 0x23f   : > { %1664 = vmatmul.mubr.f32.gmra.mrb[56].mxu0 %v5931_v9  ;;  %v2356_v9 = vld [vmem:[%s7399_s3 + $0x138] sm:$0xff] }
 0x240   : > { %1668 = vmatprep.mubr.f32.mxu0 %v5001_v6  ;;  %v4329_v61 = vpack.c.bf16 %v2356_v9, %v2355_v51  ;;  %v4353_v6 = vpack.c.bf16 %v2372_v49, %v2371_v43  ;;  %v2373_v51 = vld [vmem:[%s7399_s3 + $0x1c0] sm:$0xff]  ;;  %v2374_v9 = vld [vmem:[%s7399_s3 + $0x1c8] sm:$0xff] }
 0x242   : > { %4330 = vmatpush1.bf16.msra.mxu1 %v4329_v61  ;;  %v4356_v61 = vpack.c.bf16 %v2374_v9, %v2373_v51 }
 0x243   : > { %1669 = vmatmul.mubr.f32.gmra.mrb[58].mxu0 %v5943_v13  ;;  %4331 = vmatprep.subr.bf16.mxu1 %v7402_v3  ;;  %v6374_v13 = vpop.f32.mrb[10].mxu1 }
 0x244   : > { %1673 = vmatprep.mubr.f32.mxu0 %v599_v25  ;;  %v6377_v15 = vpop.f32.mrb[11].mxu1 }
 0x245   : > { %v6386_v37 = vpop.f32.mrb[12].mxu1 }
 0x246   : > { %4333 = vmatpush1.bf16.msra.mxu1 %v4332_v18  ;;  %v6388_v56 = vpop.f32.mrb[13].mxu1  ;;  %v2375_v18 = vld [vmem:[%s7399_s3 + $0x1d0] sm:$0xff] }
 0x247   : > { %1674 = vmatmul.mubr.f32.gmra.mrb[60].mxu0 %v6271_v5  ;;  %4334 = vmatprep.subr.bf16.mxu1 %v7402_v3  ;;  %v6397_v60 = vpop.f32.mrb[14].mxu1 }
 0x248   : > { %1678 = vmatprep.mubr.f32.mxu0 %v600_v31  ;;  %v6399_v7 = vpop.f32.mrb[15].mxu1 }
 0x249   : > { %v6408_v48 = vpop.f32.mrb[16].mxu1 }
 0x24a   : > { %v6410_v53 = vpop.f32.mrb[17].mxu1 }
 0x24b   : > { %1679 = vmatmul.mubr.f32.gmra.mrb[62].mxu0 %v6271_v5  ;;  %v2360_v5 = vld [vmem:[%s7399_s3 + $0x158] sm:$0xff]  ;;  %v6419_v0 = vpop.f32.mrb[18].mxu1 }
 0x24c   : > { %v4335_v36 = vpack.c.bf16 %v2360_v5, %v2359_v33  ;;  %v6421_v23 = vpop.f32.mrb[19].mxu1  ;;  %v2376_v33 = vld [vmem:[%s7399_s3 + $0x1d8] sm:$0xff] }
 0x24d   : > { %v6430_v12 = vpop.f32.mrb[20].mxu1  ;;  %v4359_v5 = vpack.c.bf16 %v2376_v33, %v2375_v18 }
 0x24e   : > { %4336 = vmatpush1.bf16.msra.mxu1 %v4335_v36  ;;  %v6432_v54 = vpop.f32.mrb[21].mxu1 }
 0x24f   : > { %4337 = vmatprep.subr.bf16.mxu1 %v7402_v3  ;;  %v6441_v59 = vpop.f32.mrb[22].mxu1 }
 0x250   : > { %v6443_v10 = vpop.f32.mrb[23].mxu1 }
 0x251   : > { %v6452_v46 = vpop.f32.mrb[24].mxu1 }
 0x252   : > { %4339 = vmatpush1.bf16.msra.mxu1 %v4338_v42  ;;  %v6454_v47 = vpop.f32.mrb[25].mxu1  ;;  %v2378_v42 = vld [vmem:[%s7399_s3 + $0x1e8] sm:$0xff] }
 0x253   : > { %4340 = vmatprep.subr.bf16.mxu1 %v7402_v3  ;;  %v6463_v25 = vpop.f32.mrb[26].mxu1  ;;  %v4362_v62 = vpack.c.bf16 %v2378_v42, %v2377_v38 }
 0x254   : > { %v6465_v31 = vpop.f32.mrb[27].mxu1 }
 0x256   : > { %4342 = vmatpush1.bf16.msra.mxu1 %v4341_v8  ;;  %v6474_v17 = vpop.f32.mrb[28].mxu1 }
 0x257   : > { %4343 = vmatprep.subr.bf16.mxu1 %v7402_v3  ;;  %v6476_v28 = vpop.f32.mrb[29].mxu1 }
 0x25a   : > { %4345 = vmatpush1.bf16.msra.mxu1 %v4344_v20  ;;  %v2379_v20 = vld [vmem:[%s7399_s3 + $0x1f0] sm:$0xff] }
 0x25b   : > { %4346 = vmatprep.subr.bf16.mxu1 %v7402_v3  ;;  %v4365_v58 = vpack.c.bf16 %v2380_v22, %v2379_v20 }
 0x25e   : > { %4348 = vmatpush1.bf16.msra.mxu1 %v4347_v26 }
 0x25f   : > { %4349 = vmatprep.subr.bf16.mxu1 %v7402_v3 }
 0x262   : > { %4351 = vmatpush1.bf16.msra.mxu1 %v4350_v21 }
 0x263   : > { %4352 = vmatprep.subr.bf16.mxu1 %v7402_v3 }
 0x266   : > { %4354 = vmatpush1.bf16.msra.mxu1 %v4353_v6 }
 0x267   : > { %4355 = vmatprep.subr.bf16.mxu1 %v7402_v3 }
 0x26a   : > { %4357 = vmatpush1.bf16.msra.mxu1 %v4356_v61 }
 0x26b   : > { %4358 = vmatprep.subr.bf16.mxu1 %v7402_v3 }
 0x26e   : > { %4360 = vmatpush1.bf16.msra.mxu1 %v4359_v5 }
 0x26f   : > { %4361 = vmatprep.subr.bf16.mxu1 %v7402_v3 }
 0x272   : > { %4363 = vmatpush1.bf16.msra.mxu1 %v4362_v62 }
 0x273   : > { %4364 = vmatprep.subr.bf16.mxu1 %v7402_v3 }
 0x276   : > { %4366 = vmatpush1.bf16.msra.mxu1 %v4365_v58 }
 0x277   : > { %4367 = vmatprep.subr.bf16.mxu1 %v7402_v3 }
 0x288   : > { %v6485_v36 = vpop.f32.mrb[30].mxu1 }
 0x289   : > { %v6487_v2 = vpop.f32.mrb[31].mxu1 }
 0x2a2   : > { %v1525_v8 = vpop.f32.mrb[0].mxu0 }
 0x2a3   : > { %v4511_v55 = vadd.f32 %v6498_v30, %v1525_v8  ;;  %v1527_v39 = vpop.f32.mrb[1].mxu0 }
 0x2a5   : > { %v1751_v26 = vadd.f32 %v4511_v55, %v6260_v24 }
 0x2a6   : > { %v1530_v63 = vpop.f32.mrb[2].mxu0 }
 0x2a7   : > { %v1909_v27 = vmax.f32 %v1751_v26, 0.0  ;;  %v4512_v21 = vadd.f32 %v6498_v30, %v1530_v63  ;;  %v1532_v43 = vpop.f32.mrb[3].mxu0 }
 0x2a9   : > { %1996 = vst [vmem:[#allocation3 + $0x19] sm:$0xff] %v1909_v27  ;;  %v1756_v49 = vadd.f32 %v4512_v21, %v6257_v52  ;;  %2542 = vmatprep.mubr.f32.mxu1 %v1909_v27 }
 0x2aa   : > { %v1535_v6 = vpop.f32.mrb[4].mxu0 }
 0x2ab   : > { %v1910_v51 = vmax.f32 %v1756_v49, 0.0  ;;  %v4513_v9 = vadd.f32 %v6498_v30, %v1535_v6  ;;  %v1537_v61 = vpop.f32.mrb[5].mxu0 }
 0x2ad   : > { %1997 = vst [vmem:[#allocation3 + $0x21] sm:$0xff] %v1910_v51  ;;  %v1761_v24 = vadd.f32 %v4513_v9, %v6288_v41 }
 0x2ae   : > { %v1540_v18 = vpop.f32.mrb[6].mxu0 }
 0x2af   : > { %v1911_v33 = vmax.f32 %v1761_v24, 0.0  ;;  %v4514_v5 = vadd.f32 %v6498_v30, %v1540_v18  ;;  %v1542_v38 = vpop.f32.mrb[7].mxu0 }
 0x2b0   : > { %v6515_v42 = vld [vmem:[#allocation3 + $0x18] sm:$0xff] }
 0x2b1   : > { %1998 = vst [vmem:[#allocation3 + $0x31] sm:$0xff] %v1911_v33  ;;  %v1766_v62 = vadd.f32 %v4514_v5, %v6286_v4  ;;  %2543 = vmatmul.mubr.f32.gmra.mrb[36].mxu1 %v6515_v42 }
 0x2b2   : > { %v1545_v52 = vpop.f32.mrb[8].mxu0  ;;  %2547 = vmatprep.mubr.f32.mxu1 %v1910_v51 }
 0x2b3   : > { %v1912_v8 = vmax.f32 %v1766_v62, 0.0  ;;  %v4515_v55 = vadd.f32 %v6498_v30, %v1545_v52  ;;  %v1547_v39 = vpop.f32.mrb[9].mxu0 }
 0x2b4   : > { %v6520_v20 = vld [vmem:[#allocation3 + $0x20] sm:$0xff] }
 0x2b5   : > { %1999 = vst [vmem:[#allocation3 + $0x39] sm:$0xff] %v1912_v8  ;;  %v1771_v41 = vadd.f32 %v4515_v55, %v6319_v32  ;;  %2548 = vmatmul.mubr.f32.gmra.mrb[38].mxu1 %v6520_v20 }
 0x2b6   : > { %v1550_v22 = vpop.f32.mrb[10].mxu0  ;;  %2552 = vmatprep.mubr.f32.mxu1 %v1911_v33 }
 0x2b7   : > { %v1913_v58 = vmax.f32 %v1771_v41, 0.0  ;;  %v4516_v4 = vadd.f32 %v6498_v30, %v1550_v22  ;;  %v1552_v26 = vpop.f32.mrb[11].mxu0 }
 0x2b8   : > { %v6525_v63 = vld [vmem:[#allocation3 + $0x30] sm:$0xff] }
 0x2b9   : > { %2000 = vst [vmem:[#allocation3 + $0x49] sm:$0xff] %v1913_v58  ;;  %v1776_v27 = vadd.f32 %v4516_v4, %v6317_v45  ;;  %2553 = vmatmul.mubr.f32.gmra.mrb[40].mxu1 %v6525_v63 }
 0x2ba   : > { %v1555_v21 = vpop.f32.mrb[12].mxu0  ;;  %2557 = vmatprep.mubr.f32.mxu1 %v1912_v8 }
 0x2bb   : > { %v1914_v43 = vmax.f32 %v1776_v27, 0.0  ;;  %v4517_v32 = vadd.f32 %v6498_v30, %v1555_v21  ;;  %v1557_v49 = vpop.f32.mrb[13].mxu0 }
 0x2bc   : > { %v6530_v6 = vld [vmem:[#allocation3 + $0x32] sm:$0xff]  ;;  %v6534_v9 = vld [vmem:[#allocation3 + $0x3a] sm:$0xff] }
 0x2bd   : > { %v6532_v51 = vld [vmem:[#allocation3 + $0x38] sm:$0xff]  ;;  %2001 = vst [vmem:[#allocation3 + $0x51] sm:$0xff] %v1914_v43  ;;  %v1781_v61 = vadd.f32 %v4517_v32, %v6350_v16  ;;  %3999 = vmatprep.mubr.f32.mxu0 %v6530_v6 }
 0x2be   : > { %2558 = vmatmul.mubr.f32.gmra.mrb[42].mxu1 %v6532_v51  ;;  %v1560_v45 = vpop.f32.mrb[14].mxu0  ;;  %4000 = vmatmul.mubr.f32.vlgmr.msra.gmra.mrb[64].mxu0 %v6534_v9 }
 0x2bf   : > { %2562 = vmatprep.mubr.f32.mxu1 %v1913_v58  ;;  %v1915_v24 = vmax.f32 %v1781_v61, 0.0  ;;  %v4518_v18 = vadd.f32 %v6498_v30, %v1560_v45  ;;  %v1562_v33 = vpop.f32.mrb[15].mxu0 }
 0x2c0   : > { %v6541_v5 = vld [vmem:[#allocation3 + $0x48] sm:$0xff] }
 0x2c1   : > { %2002 = vst [vmem:[#allocation3 + $0x61] sm:$0xff] %v1915_v24  ;;  %v1786_v38 = vadd.f32 %v4518_v18, %v6348_v44 }
 0x2c2   : > { %2563 = vmatmul.mubr.f32.gmra.mrb[44].mxu1 %v6541_v5  ;;  %v1565_v16 = vpop.f32.mrb[16].mxu0 }
 0x2c3   : > { %2567 = vmatprep.mubr.f32.mxu1 %v1914_v43  ;;  %v1916_v62 = vmax.f32 %v1786_v38, 0.0  ;;  %v4519_v52 = vadd.f32 %v6498_v30, %v1565_v16  ;;  %v1567_v8 = vpop.f32.mrb[17].mxu0 }
 0x2c4   : > { %v6546_v55 = vld [vmem:[#allocation3 + $0x4a] sm:$0xff]  ;;  %v6550_v41 = vld [vmem:[#allocation3 + $0x52] sm:$0xff] }
 0x2c5   : > { %v6548_v39 = vld [vmem:[#allocation3 + $0x50] sm:$0xff]  ;;  %2003 = vst [vmem:[#allocation3 + $0x69] sm:$0xff] %v1916_v62  ;;  %v1791_v22 = vadd.f32 %v4519_v52, %v6364_v50  ;;  %4002 = vmatprep.mubr.f32.mxu0 %v6546_v55 }
 0x2c6   : > { %2568 = vmatmul.mubr.f32.gmra.mrb[46].mxu1 %v6548_v39  ;;  %v1570_v44 = vpop.f32.mrb[18].mxu0  ;;  %4003 = vmatmul.mubr.f32.gmra.mrb[66].mxu0 %v6550_v41 }
 0x2c7   : > { %2572 = vmatprep.mubr.f32.mxu1 %v1915_v24  ;;  %v1917_v58 = vmax.f32 %v1791_v22, 0.0  ;;  %v4520_v4 = vadd.f32 %v6498_v30, %v1570_v44  ;;  %v1572_v26 = vpop.f32.mrb[19].mxu0 }
 0x2c8   : > { %v6557_v27 = vld [vmem:[#allocation3 + $0x60] sm:$0xff] }
 0x2c9   : > { %2004 = vst [vmem:[#allocation3 + $0x79] sm:$0xff] %v1917_v58  ;;  %v1796_v21 = vadd.f32 %v4520_v4, %v6361_v11 }
 0x2ca   : > { %2573 = vmatmul.mubr.f32.gmra.mrb[48].mxu1 %v6557_v27  ;;  %v1575_v50 = vpop.f32.mrb[20].mxu0 }
 0x2cb   : > { %2577 = vmatprep.mubr.f32.mxu1 %v1916_v62  ;;  %v1918_v43 = vmax.f32 %v1796_v21, 0.0  ;;  %v4521_v32 = vadd.f32 %v6498_v30, %v1575_v50  ;;  %v1577_v49 = vpop.f32.mrb[21].mxu0 }
 0x2cc   : > { %v6562_v61 = vld [vmem:[#allocation3 + $0x62] sm:$0xff]  ;;  %v6566_v24 = vld [vmem:[#allocation3 + $0x6a] sm:$0xff] }
 0x2cd   : > { %v6564_v45 = vld [vmem:[#allocation3 + $0x68] sm:$0xff]  ;;  %2005 = vst [vmem:[#allocation3 + $0x81] sm:$0xff] %v1918_v43  ;;  %v1801_v18 = vadd.f32 %v4521_v32, %v6377_v15  ;;  %4005 = vmatprep.mubr.f32.mxu0 %v6562_v61 }
 0x2ce   : > { %2578 = vmatmul.mubr.f32.gmra.mrb[50].mxu1 %v6564_v45  ;;  %v1580_v11 = vpop.f32.mrb[22].mxu0  ;;  %4006 = vmatmul.mubr.f32.gmra.mrb[68].mxu0 %v6566_v24 }
 0x2cf   : > { %2582 = vmatprep.mubr.f32.mxu1 %v1917_v58  ;;  %v1919_v33 = vmax.f32 %v1801_v18, 0.0  ;;  %v4522_v38 = vadd.f32 %v6498_v30, %v1580_v11  ;;  %v1582_v16 = vpop.f32.mrb[23].mxu0 }
 0x2d0   : > { %v6573_v62 = vld [vmem:[#allocation3 + $0x78] sm:$0xff] }
 0x2d1   : > { %2006 = vst [vmem:[#allocation3 + $0x91] sm:$0xff] %v1919_v33  ;;  %v1806_v52 = vadd.f32 %v4522_v38, %v6374_v13 }
 0x2d2   : > { %2583 = vmatmul.mubr.f32.gmra.mrb[52].mxu1 %v6573_v62  ;;  %v1585_v15 = vpop.f32.mrb[24].mxu0 }
 0x2d3   : > { %2587 = vmatprep.mubr.f32.mxu1 %v1918_v43  ;;  %v1920_v8 = vmax.f32 %v1806_v52, 0.0  ;;  %v4523_v22 = vadd.f32 %v6498_v30, %v1585_v15  ;;  %v1587_v44 = vpop.f32.mrb[25].mxu0 }
 0x2d4   : > { %v6578_v4 = vld [vmem:[#allocation3 + $0x7a] sm:$0xff]  ;;  %v6582_v26 = vld [vmem:[#allocation3 + $0x82] sm:$0xff] }
 0x2d5   : > { %v6580_v58 = vld [vmem:[#allocation3 + $0x80] sm:$0xff]  ;;  %2007 = vst [vmem:[#allocation3 + $0x99] sm:$0xff] %v1920_v8  ;;  %v1811_v21 = vadd.f32 %v4523_v22, %v6388_v56  ;;  %4008 = vmatprep.mubr.f32.mxu0 %v6578_v4 }
 0x2d6   : > { %2588 = vmatmul.mubr.f32.gmra.mrb[54].mxu1 %v6580_v58  ;;  %v1590_v13 = vpop.f32.mrb[26].mxu0  ;;  %4009 = vmatmul.mubr.f32.gmra.mrb[70].mxu0 %v6582_v26 }
 0x2d7   : > { %2592 = vmatprep.mubr.f32.mxu1 %v1919_v33  ;;  %v1921_v50 = vmax.f32 %v1811_v21, 0.0  ;;  %v4524_v43 = vadd.f32 %v6498_v30, %v1590_v13  ;;  %v1592_v32 = vpop.f32.mrb[27].mxu0 }
 0x2d8   : > { %v6589_v49 = vld [vmem:[#allocation3 + $0x90] sm:$0xff] }
 0x2d9   : > { %2008 = vst [vmem:[#allocation3 + $0xa9] sm:$0xff] %v1921_v50  ;;  %v1816_v18 = vadd.f32 %v4524_v43, %v6386_v37 }
 0x2da   : > { %2593 = vmatmul.mubr.f32.gmra.mrb[56].mxu1 %v6589_v49  ;;  %v1595_v56 = vpop.f32.mrb[28].mxu0 }
 0x2db   : > { %2597 = vmatprep.mubr.f32.mxu1 %v1920_v8  ;;  %v1922_v11 = vmax.f32 %v1816_v18, 0.0  ;;  %v4525_v38 = vadd.f32 %v6498_v30, %v1595_v56  ;;  %v1597_v16 = vpop.f32.mrb[29].mxu0 }
 0x2dc   : > { %v6594_v52 = vld [vmem:[#allocation3 + $0x92] sm:$0xff]  ;;  %v6598_v15 = vld [vmem:[#allocation3 + $0x9a] sm:$0xff] }
 0x2dd   : > { %v6596_v33 = vld [vmem:[#allocation3 + $0x98] sm:$0xff]  ;;  %2009 = vst [vmem:[#allocation3 + $0xb1] sm:$0xff] %v1922_v11  ;;  %v1821_v22 = vadd.f32 %v4525_v38, %v6399_v7  ;;  %4011 = vmatprep.mubr.f32.mxu0 %v6594_v52 }
 0x2de   : > { %2598 = vmatmul.mubr.f32.gmra.mrb[58].mxu1 %v6596_v33  ;;  %v1600_v37 = vpop.f32.mrb[30].mxu0  ;;  %4012 = vmatmul.mubr.f32.gmra.mrb[72].mxu0 %v6598_v15 }
 0x2df   : > { %2602 = vmatprep.mubr.f32.mxu1 %v1921_v50  ;;  %v1923_v8 = vmax.f32 %v1821_v22, 0.0  ;;  %v4526_v44 = vadd.f32 %v6498_v30, %v1600_v37  ;;  %v1602_v21 = vpop.f32.mrb[31].mxu0 }
 0x2e0   : > { %v6605_v13 = vld [vmem:[#allocation3 + $0xa8] sm:$0xff] }
 0x2e1   : > { %2010 = vst [vmem:[#allocation3 + $0xc1] sm:$0xff] %v1923_v8  ;;  %v1826_v43 = vadd.f32 %v4526_v44, %v6397_v60 }
 0x2e2   : > { %2603 = vmatmul.mubr.f32.gmra.mrb[60].mxu1 %v6605_v13  ;;  %v1605_v7 = vpop.f32.mrb[32].mxu0 }
 0x2e3   : > { %2607 = vmatprep.mubr.f32.mxu1 %v1922_v11  ;;  %v1924_v32 = vmax.f32 %v1826_v43, 0.0  ;;  %v4527_v18 = vadd.f32 %v6498_v30, %v1605_v7  ;;  %v1607_v56 = vpop.f32.mrb[33].mxu0 }
 0x2e4   : > { %v6610_v38 = vld [vmem:[#allocation3 + $0xaa] sm:$0xff]  ;;  %v6614_v16 = vld [vmem:[#allocation3 + $0xb2] sm:$0xff] }
 0x2e5   : > { %v6612_v50 = vld [vmem:[#allocation3 + $0xb0] sm:$0xff]  ;;  %2011 = vst [vmem:[#allocation3 + $0xc9] sm:$0xff] %v1924_v32  ;;  %v1831_v22 = vadd.f32 %v4527_v18, %v6410_v53  ;;  %4014 = vmatprep.mubr.f32.mxu0 %v6610_v38 }
 0x2e6   : > { %2608 = vmatmul.mubr.f32.gmra.mrb[62].mxu1 %v6612_v50  ;;  %v1610_v60 = vpop.f32.mrb[34].mxu0  ;;  %4015 = vmatmul.mubr.f32.gmra.mrb[74].mxu0 %v6614_v16 }
 0x2e7   : > { %2612 = vmatprep.mubr.f32.mxu1 %v1923_v8  ;;  %v1925_v11 = vmax.f32 %v1831_v22, 0.0  ;;  %v4528_v37 = vadd.f32 %v6498_v30, %v1610_v60  ;;  %v1612_v44 = vpop.f32.mrb[35].mxu0 }
 0x2e8   : > { %v6621_v21 = vld [vmem:[#allocation3 + $0xc0] sm:$0xff] }
 0x2e9   : > { %2012 = vst [vmem:[#allocation3 + $0xd9] sm:$0xff] %v1925_v11  ;;  %v1836_v43 = vadd.f32 %v4528_v37, %v6408_v48 }
 0x2ea   : > { %2613 = vmatmul.mubr.f32.gmra.mrb[64].mxu1 %v6621_v21  ;;  %v1615_v53 = vpop.f32.mrb[36].mxu0 }
 0x2eb   : > { %2617 = vmatprep.mubr.f32.mxu1 %v1924_v32  ;;  %v1926_v7 = vmax.f32 %v1836_v43, 0.0  ;;  %v4529_v18 = vadd.f32 %v6498_v30, %v1615_v53  ;;  %v1617_v56 = vpop.f32.mrb[37].mxu0 }
 0x2ec   : > { %v6626_v3 = vld [vmem:[#allocation3 + $0xc2] sm:$0xff]  ;;  %v6630_v22 = vld [vmem:[#allocation3 + $0xca] sm:$0xff] }
 0x2ed   : > { %v6628_v8 = vld [vmem:[#allocation3 + $0xc8] sm:$0xff]  ;;  %2013 = vst [vmem:[#allocation3 + $0xe1] sm:$0xff] %v1926_v7  ;;  %v1841_v60 = vadd.f32 %v4529_v18, %v6421_v23  ;;  %4017 = vmatprep.mubr.f32.mxu0 %v6626_v3 }
 0x2ee   : > { %2618 = vmatmul.mubr.f32.gmra.mrb[66].mxu1 %v6628_v8  ;;  %v1620_v48 = vpop.f32.mrb[38].mxu0  ;;  %4018 = vmatmul.mubr.f32.gmra.mrb[76].mxu0 %v6630_v22 }
 0x2ef   : > { %2622 = vmatprep.mubr.f32.mxu1 %v1925_v11  ;;  %v1927_v32 = vmax.f32 %v1841_v60, 0.0  ;;  %v4530_v37 = vadd.f32 %v6498_v30, %v1620_v48  ;;  %v1622_v44 = vpop.f32.mrb[39].mxu0 }
 0x2f0   : > { %v6637_v43 = vld [vmem:[#allocation3 + $0xd8] sm:$0xff] }
 0x2f1   : > { %2014 = vst [vmem:[#allocation3 + $0xf1] sm:$0xff] %v1927_v32  ;;  %v1846_v53 = vadd.f32 %v4530_v37, %v6419_v0 }
 0x2f2   : > { %2623 = vmatmul.mubr.f32.gmra.mrb[68].mxu1 %v6637_v43  ;;  %v1625_v23 = vpop.f32.mrb[40].mxu0 }
 0x2f3   : > { %2627 = vmatprep.mubr.f32.mxu1 %v1926_v7  ;;  %v1928_v18 = vmax.f32 %v1846_v53, 0.0  ;;  %v4531_v56 = vadd.f32 %v6498_v30, %v1625_v23  ;;  %v1627_v1 = vpop.f32.mrb[41].mxu0 }
 0x2f4   : > { %v6642_v35 = vld [vmem:[#allocation3 + $0xda] sm:$0xff]  ;;  %v6646_v60 = vld [vmem:[#allocation3 + $0xe2] sm:$0xff] }
 0x2f5   : > { %v6644_v11 = vld [vmem:[#allocation3 + $0xe0] sm:$0xff]  ;;  %2015 = vst [vmem:[#allocation3 + $0xf9] sm:$0xff] %v1928_v18  ;;  %v1851_v48 = vadd.f32 %v4531_v56, %v6432_v54  ;;  %4020 = vmatprep.mubr.f32.mxu0 %v6642_v35 }
 0x2f6   : > { %2628 = vmatmul.mubr.f32.gmra.mrb[70].mxu1 %v6644_v11  ;;  %v1630_v0 = vpop.f32.mrb[42].mxu0  ;;  %4021 = vmatmul.mubr.f32.gmra.mrb[78].mxu0 %v6646_v60 }
 0x2f7   : > { %2632 = vmatprep.mubr.f32.mxu1 %v1927_v32  ;;  %v1929_v7 = vmax.f32 %v1851_v48, 0.0  ;;  %v4532_v1 = vadd.f32 %v6498_v30, %v1630_v0  ;;  %v1632_v37 = vpop.f32.mrb[43].mxu0 }
 0x2f8   : > { %v6653_v44 = vld [vmem:[#allocation3 + $0xf0] sm:$0xff] }
 0x2f9   : > { %2016 = vst [vmem:[#allocation3 + $0x109] sm:$0xff] %v1929_v7  ;;  %v1856_v53 = vadd.f32 %v4532_v1, %v6430_v12 }
 0x2fa   : > { %2633 = vmatmul.mubr.f32.gmra.mrb[72].mxu1 %v6653_v44  ;;  %v1635_v54 = vpop.f32.mrb[44].mxu0 }
 0x2fb   : > { %2637 = vmatprep.mubr.f32.mxu1 %v1928_v18  ;;  %v1930_v23 = vmax.f32 %v1856_v53, 0.0  ;;  %v4533_v56 = vadd.f32 %v6498_v30, %v1635_v54  ;;  %v1637_v14 = vpop.f32.mrb[45].mxu0 }
 0x2fc   : > { %v6658_v57 = vld [vmem:[#allocation3 + $0xf2] sm:$0xff]  ;;  %v6662_v48 = vld [vmem:[#allocation3 + $0xfa] sm:$0xff] }
 0x2fd   : > { %v6660_v32 = vld [vmem:[#allocation3 + $0xf8] sm:$0xff]  ;;  %2017 = vst [vmem:[#allocation3 + $0x111] sm:$0xff] %v1930_v23  ;;  %v1861_v0 = vadd.f32 %v4533_v56, %v6443_v10  ;;  %4023 = vmatprep.mubr.f32.mxu0 %v6658_v57 }
 0x2fe   : > { %2638 = vmatmul.mubr.f32.gmra.mrb[74].mxu1 %v6660_v32  ;;  %v1640_v12 = vpop.f32.mrb[46].mxu0  ;;  %4024 = vmatmul.mubr.f32.gmra.mrb[80].mxu0 %v6662_v48 }
 0x2ff   : > { %2642 = vmatprep.mubr.f32.mxu1 %v1929_v7  ;;  %v1931_v18 = vmax.f32 %v1861_v0, 0.0  ;;  %v4534_v14 = vadd.f32 %v6498_v30, %v1640_v12  ;;  %v1642_v1 = vpop.f32.mrb[47].mxu0 }
 0x300   : > { %v6669_v37 = vld [vmem:[#allocation3 + $0x108] sm:$0xff] }
 0x301   : > { %2018 = vst [vmem:[#allocation3 + $0x121] sm:$0xff] %v1931_v18  ;;  %v1866_v53 = vadd.f32 %v4534_v14, %v6441_v59 }
 0x302   : > { %2643 = vmatmul.mubr.f32.gmra.mrb[76].mxu1 %v6669_v37  ;;  %v1645_v10 = vpop.f32.mrb[48].mxu0 }
 0x303   : > { %2647 = vmatprep.mubr.f32.mxu1 %v1930_v23  ;;  %v1932_v54 = vmax.f32 %v1866_v53, 0.0  ;;  %v4535_v56 = vadd.f32 %v6498_v30, %v1645_v10  ;;  %v1647_v40 = vpop.f32.mrb[49].mxu0 }
 0x304   : > { %v6674_v29 = vld [vmem:[#allocation3 + $0x10a] sm:$0xff]  ;;  %v6678_v0 = vld [vmem:[#allocation3 + $0x112] sm:$0xff] }
 0x305   : > { %v6676_v7 = vld [vmem:[#allocation3 + $0x110] sm:$0xff]  ;;  %2019 = vst [vmem:[#allocation3 + $0x129] sm:$0xff] %v1932_v54  ;;  %v1871_v12 = vadd.f32 %v4535_v56, %v6454_v47  ;;  %4026 = vmatprep.mubr.f32.mxu0 %v6674_v29 }
 0x306   : > { %2648 = vmatmul.mubr.f32.gmra.mrb[78].mxu1 %v6676_v7  ;;  %v1650_v59 = vpop.f32.mrb[50].mxu0  ;;  %4027 = vmatmul.mubr.f32.gmra.mrb[82].mxu0 %v6678_v0 }
 0x307   : > { %2652 = vmatprep.mubr.f32.mxu1 %v1931_v18  ;;  %v6684_v23 = vmax.f32 %v1871_v12, 0.0  ;;  %v4536_v40 = vadd.f32 %v6498_v30, %v1650_v59  ;;  %v1652_v14 = vpop.f32.mrb[51].mxu0 }
 0x308   : > { %v6687_v1 = vld [vmem:[#allocation3 + $0x120] sm:$0xff] }
 0x309   : > { %7440 = vst [vmem:[#allocation12_spill] sm:$0xff] %v6684_v23  ;;  %2020 = vst [vmem:[#allocation3 + $0x139] sm:$0xff] %v6684_v23  ;;  %v1876_v53 = vadd.f32 %v4536_v40, %v6452_v46 }
 0x30a   : > { %2653 = vmatmul.mubr.f32.gmra.mrb[80].mxu1 %v6687_v1  ;;  %v1655_v47 = vpop.f32.mrb[52].mxu0 }
 0x30b   : > { %2657 = vmatprep.mubr.f32.mxu1 %v1932_v54  ;;  %v6692_v10 = vmax.f32 %v1876_v53, 0.0  ;;  %v4537_v56 = vadd.f32 %v6498_v30, %v1655_v47  ;;  %v1657_v18 = vpop.f32.mrb[53].mxu0 }
 0x30c   : > { %v6695_v12 = vld [vmem:[#allocation3 + $0x122] sm:$0xff]  ;;  %v6699_v59 = vld [vmem:[#allocation3 + $0x12a] sm:$0xff] }
 0x30d   : > { %7441 = vst [vmem:[#allocation13_spill] sm:$0xff] %v6692_v10  ;;  %v6697_v34 = vld [vmem:[#allocation3 + $0x128] sm:$0xff]  ;;  %2021 = vst [vmem:[#allocation3 + $0x141] sm:$0xff] %v6692_v10  ;;  %v1881_v14 = vadd.f32 %v4537_v56, %v6465_v31  ;;  %4029 = vmatprep.mubr.f32.mxu0 %v6695_v12 }
 0x30e   : > { %2658 = vmatmul.mubr.f32.gmra.mrb[82].mxu1 %v6697_v34  ;;  %v1660_v46 = vpop.f32.mrb[54].mxu0  ;;  %4030 = vmatmul.mubr.f32.gmra.mrb[84].mxu0 %v6699_v59 }
 0x30f   : > { %2662 = vmatprep.mubr.f32.mxu1 %v6684_v23  ;;  %v6707_v54 = vmax.f32 %v1881_v14, 0.0  ;;  %v4538_v40 = vadd.f32 %v6498_v30, %v1660_v46  ;;  %v1662_v53 = vpop.f32.mrb[55].mxu0 }
 0x310   : > { %v6710_v47 = vld [vmem:[#allocation3 + $0x138] sm:$0xff] }
 0x311   : > { %7442 = vst [vmem:[#allocation14_spill] sm:$0xff] %v6707_v54  ;;  %2022 = vst [vmem:[#allocation3 + $0x151] sm:$0xff] %v6707_v54  ;;  %v1886_v31 = vadd.f32 %v4538_v40, %v6463_v25 }
 0x312   : > { %2663 = vmatmul.mubr.f32.gmra.mrb[84].mxu1 %v6710_v47  ;;  %v1665_v56 = vpop.f32.mrb[56].mxu0 }
 0x313   : > { %2667 = vmatprep.mubr.f32.mxu1 %v6692_v10  ;;  %v6716_v18 = vmax.f32 %v1886_v31, 0.0  ;;  %v4539_v23 = vadd.f32 %v6498_v30, %v1665_v56  ;;  %v1667_v14 = vpop.f32.mrb[57].mxu0 }
 0x314   : > { %v6719_v19 = vld [vmem:[#allocation3 + $0x13a] sm:$0xff]  ;;  %v6723_v53 = vld [vmem:[#allocation3 + $0x142] sm:$0xff] }
 0x315   : > { %7443 = vst [vmem:[#allocation15_spill] sm:$0xff] %v6716_v18  ;;  %7444 = vst [vmem:[#allocation16_spill] sm:$0xff] %v6719_v19  ;;  %v6721_v46 = vld [vmem:[#allocation3 + $0x140] sm:$0xff]  ;;  %v1891_v25 = vadd.f32 %v4539_v23, %v6476_v28  ;;  %4032 = vmatprep.mubr.f32.mxu0 %v6719_v19 }
 0x316   : > { %7445 = vst [vmem:[#allocation17_spill] sm:$0xff] %v6723_v53  ;;  %2023 = vst [vmem:[#allocation3 + $0x159] sm:$0xff] %v6716_v18  ;;  %2668 = vmatmul.mubr.f32.gmra.mrb[86].mxu1 %v6721_v46  ;;  %v1670_v40 = vpop.f32.mrb[58].mxu0  ;;  %4033 = vmatmul.mubr.f32.gmra.mrb[86].mxu0 %v6723_v53 }
 0x317   : > { %2672 = vmatprep.mubr.f32.mxu1 %v6707_v54  ;;  %v6731_v31 = vmax.f32 %v1891_v25, 0.0  ;;  %v4540_v56 = vadd.f32 %v6498_v30, %v1670_v40  ;;  %v1672_v14 = vpop.f32.mrb[59].mxu0 }
 0x318   : > { %v6734_v10 = vld [vmem:[#allocation3 + $0x150] sm:$0xff] }
 0x319   : > { %2024 = vst [vmem:[#allocation3 + $0x169] sm:$0xff] %v6731_v31  ;;  %v1896_v28 = vadd.f32 %v4540_v56, %v6474_v17 }
 0x31a   : > { %2673 = vmatmul.mubr.f32.gmra.mrb[88].mxu1 %v6734_v10  ;;  %v1675_v23 = vpop.f32.mrb[60].mxu0 }
 0x31b   : > { %2677 = vmatprep.mubr.f32.mxu1 %v6716_v18  ;;  %v6740_v19 = vmax.f32 %v1896_v28, 0.0  ;;  %v4541_v54 = vadd.f32 %v6498_v30, %v1675_v23  ;;  %v1677_v25 = vpop.f32.mrb[61].mxu0 }
 0x31d   : > { %v6743_v53 = vld [vmem:[#allocation3 + $0x158] sm:$0xff]  ;;  %2025 = vst [vmem:[#allocation3 + $0x171] sm:$0xff] %v6740_v19  ;;  %v6747_v40 = vadd.f32 %v4541_v54, %v6487_v2  ;;  %v2381_v54 = vld [vmem:[%s7399_s3 + $0x200] sm:$0xff] }
 0x31e   : > { %2678 = vmatmul.mubr.f32.gmra.mrb[90].mxu1 %v6743_v53  ;;  %v1680_v17 = vpop.f32.mrb[62].mxu0 }
 0x31f   : > { %2682 = vmatprep.mubr.f32.mxu1 %v6731_v31  ;;  %v7428_v56 = vmax.f32 %v6747_v40, 0.0  ;;  %v4542_v14 = vadd.f32 %v6498_v30, %v1680_v17  ;;  %v1682_v28 = vpop.f32.mrb[63].mxu0  ;;  %v2382_v30 = vld [vmem:[%s7399_s3 + $0x208] sm:$0xff] }
 0x320   : > { %v6753_v18 = vld [vmem:[#allocation3 + $0x168] sm:$0xff]  ;;  %v4368_v17 = vpack.c.bf16 %v2382_v30, %v2381_v54  ;;  %v2386_v54 = vld [vmem:[%s7399_s3 + $0x228] sm:$0xff] }
 0x321   : > { %2026 = vst [vmem:[#allocation3 + $0x181] sm:$0xff] %v7428_v56  ;;  %v6758_v23 = vadd.f32 %v4542_v14, %v6485_v36  ;;  %v2092_v36 = vld [vmem:[#allocation3 + $0x2] sm:$0xff]  ;;  %v2093_v56 = vld [vmem:[#allocation3 + $0xa] sm:$0xff] }
 0x322   : > { %2683 = vmatmul.mubr.f32.gmra.mrb[92].mxu1 %v6753_v18  ;;  %v2383_v14 = vld [vmem:[%s7399_s3 + $0x210] sm:$0xff]  ;;  %v2384_v28 = vld [vmem:[%s7399_s3 + $0x218] sm:$0xff] }
 0x323   : > { %7446 = vst [vmem:[#allocation18_spill] sm:$0xff] %v6758_v23  ;;  %2687 = vmatprep.mubr.f32.mxu1 %v6740_v19  ;;  %v7429_v2 = vmax.f32 %v6758_v23, 0.0  ;;  %v7447_v23 = vmov 0.0|0.0  }
 0x324   : > { %v6769_v25 = vld [vmem:[#allocation3 + $0x170] sm:$0xff] }
 0x325   : > { %2027 = vst [vmem:[#allocation3 + $0x189] sm:$0xff] %v7429_v2  ;;  %v4371_v2 = vpack.c.bf16 %v2384_v28, %v2383_v14  ;;  %v6808_v14 = vld [vmem:[#allocation3 + $0x22] sm:$0xff] }
 0x326   : > { %2688 = vmatmul.mubr.f32.gmra.mrb[94].mxu1 %v6769_v25  ;;  %v2391_v28 = vld [vmem:[%s7399_s3 + $0x250] sm:$0xff] }
 0x327   : > { %2757 = vmatprep.mubr.f32.mxu1 %v6515_v42  ;;  %v2385_v42 = vld [vmem:[%s7399_s3 + $0x220] sm:$0xff] }
 0x328   : > { %v4374_v30 = vpack.c.bf16 %v2386_v54, %v2385_v42  ;;  %v2392_v42 = vld [vmem:[%s7399_s3 + $0x258] sm:$0xff] }
 0x329   : > { %v4383_v54 = vpack.c.bf16 %v2392_v42, %v2391_v28  ;;  %v2408_v28 = vld [vmem:[%s7399_s3 + $0x2d8] sm:$0xff]  ;;  %v2410_v42 = vld [vmem:[%s7399_s3 + $0x2e8] sm:$0xff] }
 0x32a   : > { %2758 = vmatmul.mubr.f32.vlgmr.msra.gmra.mrb[32].mxu1 %v2092_v36  ;;  %v2388_v36 = vld [vmem:[%s7399_s3 + $0x238] sm:$0xff] }
 0x32b   : > { %2762 = vmatprep.mubr.f32.mxu1 %v6520_v20  ;;  %4369 = vmatpush1.bf16.msra.mxu1 %v4368_v17  ;;  %v2387_v20 = vld [vmem:[%s7399_s3 + $0x230] sm:$0xff] }
 0x32c   : > { %4370 = vmatprep.subr.bf16.mxu1 %v7447_v23  ;;  %v6797_v17 = vld [vmem:[#allocation3 + $0x1a] sm:$0xff] }
 0x32e   : > { %2763 = vmatmul.mubr.f32.gmra.mrb[34].mxu1 %v2093_v56  ;;  %v2389_v56 = vld [vmem:[%s7399_s3 + $0x240] sm:$0xff] }
 0x32f   : > { %2767 = vmatprep.mubr.f32.mxu1 %v6525_v63  ;;  %4372 = vmatpush1.bf16.msra.mxu1 %v4371_v2  ;;  %v4377_v63 = vpack.c.bf16 %v2388_v36, %v2387_v20  ;;  %v2390_v2 = vld [vmem:[%s7399_s3 + $0x248] sm:$0xff]  ;;  %v2396_v20 = vld [vmem:[%s7399_s3 + $0x278] sm:$0xff] }
 0x330   : > { %4373 = vmatprep.subr.bf16.mxu1 %v7447_v23  ;;  %v2398_v36 = vld [vmem:[%s7399_s3 + $0x288] sm:$0xff] }
 0x332   : > { %2768 = vmatmul.mubr.f32.gmra.mrb[36].mxu1 %v6797_v17 }
 0x333   : > { %2772 = vmatprep.mubr.f32.mxu1 %v6532_v51  ;;  %4375 = vmatpush1.bf16.msra.mxu1 %v4374_v30  ;;  %v4380_v51 = vpack.c.bf16 %v2390_v2, %v2389_v56  ;;  %v2394_v30 = vld [vmem:[%s7399_s3 + $0x268] sm:$0xff]  ;;  %v2404_v2 = vld [vmem:[%s7399_s3 + $0x2b8] sm:$0xff] }
 0x334   : > { %4376 = vmatprep.subr.bf16.mxu1 %v7447_v23  ;;  %v2402_v56 = vld [vmem:[%s7399_s3 + $0x2a8] sm:$0xff] }
 0x336   : > { %2773 = vmatmul.mubr.f32.gmra.mrb[38].mxu1 %v6808_v14 }
 0x337   : > { %2777 = vmatprep.mubr.f32.mxu1 %v6541_v5  ;;  %4378 = vmatpush1.bf16.msra.mxu1 %v4377_v63  ;;  %v2393_v5 = vld [vmem:[%s7399_s3 + $0x260] sm:$0xff]  ;;  %v2400_v63 = vld [vmem:[%s7399_s3 + $0x298] sm:$0xff] }
 0x338   : > { %4379 = vmatprep.subr.bf16.mxu1 %v7447_v23 }
 0x33a   : > { %2778 = vmatmul.mubr.f32.gmra.mrb[40].mxu1 %v6530_v6  ;;  %v4386_v6 = vpack.c.bf16 %v2394_v30, %v2393_v5 }
 0x33b   : > { %2782 = vmatprep.mubr.f32.mxu1 %v6548_v39  ;;  %4381 = vmatpush1.bf16.msra.mxu1 %v4380_v51  ;;  %v2395_v39 = vld [vmem:[%s7399_s3 + $0x270] sm:$0xff]  ;;  %v2406_v51 = vld [vmem:[%s7399_s3 + $0x2c8] sm:$0xff] }
 0x33c   : > { %4382 = vmatprep.subr.bf16.mxu1 %v7447_v23 }
 0x33e   : > { %2783 = vmatmul.mubr.f32.gmra.mrb[42].mxu1 %v6534_v9  ;;  %v4389_v9 = vpack.c.bf16 %v2396_v20, %v2395_v39  ;;  %v2418_v39 = vld [vmem:[%s7399_s3 + $0x328] sm:$0xff]  ;;  %v2157_v20 = vld [vmem:[#allocation3 + $0x21] sm:$0xff] }
 0x33f   : > { %2787 = vmatprep.mubr.f32.mxu1 %v6557_v27  ;;  %4384 = vmatpush1.bf16.msra.mxu1 %v4383_v54  ;;  %v2397_v27 = vld [vmem:[%s7399_s3 + $0x280] sm:$0xff]  ;;  %v2412_v54 = vld [vmem:[%s7399_s3 + $0x2f8] sm:$0xff] }
 0x340   : > { %4385 = vmatprep.subr.bf16.mxu1 %v7447_v23 }
 0x342   : > { %2788 = vmatmul.mubr.f32.gmra.mrb[44].mxu1 %v6546_v55  ;;  %v4392_v55 = vpack.c.bf16 %v2398_v36, %v2397_v27  ;;  %v2420_v36 = vld [vmem:[%s7399_s3 + $0x338] sm:$0xff] }
 0x343   : > { %2792 = vmatprep.mubr.f32.mxu1 %v6564_v45  ;;  %4387 = vmatpush1.bf16.msra.mxu1 %v4386_v6  ;;  %v2399_v45 = vld [vmem:[%s7399_s3 + $0x290] sm:$0xff] }
 0x344   : > { %4388 = vmatprep.subr.bf16.mxu1 %v7447_v23 }
 0x346   : > { %2793 = vmatmul.mubr.f32.gmra.mrb[46].mxu1 %v6550_v41  ;;  %v4395_v41 = vpack.c.bf16 %v2400_v63, %v2399_v45  ;;  %v2191_v63 = vld [vmem:[#allocation3 + $0x3a] sm:$0xff] }
 0x347   : > { %2797 = vmatprep.mubr.f32.mxu1 %v6573_v62  ;;  %4390 = vmatpush1.bf16.msra.mxu1 %v4389_v9  ;;  %v2401_v62 = vld [vmem:[%s7399_s3 + $0x2a0] sm:$0xff] }
 0x348   : > { %4391 = vmatprep.subr.bf16.mxu1 %v7447_v23  ;;  %v2190_v9 = vld [vmem:[#allocation3 + $0x32] sm:$0xff] }
 0x34a   : > { %2798 = vmatmul.mubr.f32.gmra.mrb[48].mxu1 %v6562_v61  ;;  %v4398_v61 = vpack.c.bf16 %v2402_v56, %v2401_v62  ;;  %v2421_v56 = vld [vmem:[%s7399_s3 + $0x340] sm:$0xff] }
 0x34b   : > { %2802 = vmatprep.mubr.f32.mxu1 %v6580_v58  ;;  %4393 = vmatpush1.bf16.msra.mxu1 %v4392_v55  ;;  %v2403_v58 = vld [vmem:[%s7399_s3 + $0x2b0] sm:$0xff]  ;;  %v7002_v55 = vld [vmem:[#allocation3 + $0x31] sm:$0xff] }
 0x34c   : > { %4394 = vmatprep.subr.bf16.mxu1 %v7447_v23 }
 0x34e   : > { %2803 = vmatmul.mubr.f32.gmra.mrb[50].mxu1 %v6566_v24  ;;  %v4401_v24 = vpack.c.bf16 %v2404_v2, %v2403_v58  ;;  %v7016_v58 = vld [vmem:[#allocation3 + $0x39] sm:$0xff]  ;;  %v2192_v2 = vld [vmem:[#allocation3 + $0x4a] sm:$0xff] }
 0x34f   : > { %2807 = vmatprep.mubr.f32.mxu1 %v6589_v49  ;;  %4396 = vmatpush1.bf16.msra.mxu1 %v4395_v41  ;;  %v2405_v49 = vld [vmem:[%s7399_s3 + $0x2c0] sm:$0xff] }
 0x350   : > { %4397 = vmatprep.subr.bf16.mxu1 %v7447_v23 }
 0x352   : > { %2808 = vmatmul.mubr.f32.gmra.mrb[52].mxu1 %v6578_v4  ;;  %v4404_v4 = vpack.c.bf16 %v2406_v51, %v2405_v49  ;;  %v2423_v49 = vld [vmem:[%s7399_s3 + $0x350] sm:$0xff]  ;;  %v2424_v51 = vld [vmem:[%s7399_s3 + $0x358] sm:$0xff] }
 0x353   : > { %2812 = vmatprep.mubr.f32.mxu1 %v6596_v33  ;;  %4399 = vmatpush1.bf16.msra.mxu1 %v4398_v61  ;;  %v2407_v33 = vld [vmem:[%s7399_s3 + $0x2d0] sm:$0xff]  ;;  %v2422_v61 = vld [vmem:[%s7399_s3 + $0x348] sm:$0xff] }
 0x354   : > { %4400 = vmatprep.subr.bf16.mxu1 %v7447_v23 }
 0x356   : > { %2813 = vmatmul.mubr.f32.gmra.mrb[54].mxu1 %v6582_v26  ;;  %v4407_v26 = vpack.c.bf16 %v2408_v28, %v2407_v33  ;;  %v2193_v28 = vld [vmem:[#allocation3 + $0x52] sm:$0xff] }
 0x357   : > { %2817 = vmatprep.mubr.f32.mxu1 %v6605_v13  ;;  %4402 = vmatpush1.bf16.msra.mxu1 %v4401_v24  ;;  %v2409_v13 = vld [vmem:[%s7399_s3 + $0x2e0] sm:$0xff]  ;;  %v4428_v24 = vpack.c.bf16 %v2422_v61, %v2421_v56  ;;  %v2197_v56 = vld [vmem:[#allocation3 + $0x82] sm:$0xff] }
 0x358   : > { %4403 = vmatprep.subr.bf16.mxu1 %v7447_v23 }
 0x35a   : > { %2818 = vmatmul.mubr.f32.gmra.mrb[56].mxu1 %v6594_v52  ;;  %v4410_v52 = vpack.c.bf16 %v2410_v42, %v2409_v13  ;;  %v4431_v13 = vpack.c.bf16 %v2424_v51, %v2423_v49  ;;  %v2425_v42 = vld [vmem:[%s7399_s3 + $0x360] sm:$0xff]  ;;  %v2434_v49 = vld [vmem:[%s7399_s3 + $0x3a8] sm:$0xff]  ;;  %v7088_v51 = vld [vmem:[#allocation3 + $0x81] sm:$0xff] }
 0x35b   : > { %2822 = vmatprep.mubr.f32.mxu1 %v6612_v50  ;;  %4405 = vmatpush1.bf16.msra.mxu1 %v4404_v4  ;;  %v2411_v50 = vld [vmem:[%s7399_s3 + $0x2f0] sm:$0xff]  ;;  %v7026_v4 = vld [vmem:[#allocation3 + $0x49] sm:$0xff] }
 0x35c   : > { %4406 = vmatprep.subr.bf16.mxu1 %v7447_v23 }
 0x35e   : > { %2823 = vmatmul.mubr.f32.gmra.mrb[58].mxu1 %v6598_v15  ;;  %v4413_v15 = vpack.c.bf16 %v2412_v54, %v2411_v50  ;;  %v7040_v50 = vld [vmem:[#allocation3 + $0x51] sm:$0xff]  ;;  %v2194_v54 = vld [vmem:[#allocation3 + $0x62] sm:$0xff] }
 0x35f   : > { %2827 = vmatprep.mubr.f32.mxu1 %v6621_v21  ;;  %4408 = vmatpush1.bf16.msra.mxu1 %v4407_v26  ;;  %v6943_v21 = vld [vmem:[#allocation3 + $0x152] sm:$0xff] }
 0x360   : > { %4409 = vmatprep.subr.bf16.mxu1 %v7447_v23 }
 0x362   : > { %2828 = vmatmul.mubr.f32.gmra.mrb[60].mxu1 %v6610_v38  ;;  %v7448_v38 = vld [vmem:[#allocation16_spill] sm:$0xff] }
 0x363   : > { %2832 = vmatprep.mubr.f32.mxu1 %v6628_v8  ;;  %4411 = vmatpush1.bf16.msra.mxu1 %v4410_v52  ;;  %v2426_v52 = vld [vmem:[%s7399_s3 + $0x368] sm:$0xff] }
 0x364   : > { %4412 = vmatprep.subr.bf16.mxu1 %v7447_v23 }
 0x366   : > { %2833 = vmatmul.mubr.f32.gmra.mrb[62].mxu1 %v6614_v16 }
 0x367   : > { %2837 = vmatprep.mubr.f32.mxu1 %v6637_v43  ;;  %4414 = vmatpush1.bf16.msra.mxu1 %v4413_v15  ;;  %v6951_v43 = vld [vmem:[#allocation3 + $0x15a] sm:$0xff]  ;;  %v4434_v15 = vpack.c.bf16 %v2426_v52, %v2425_v42  ;;  %v2436_v52 = vld [vmem:[%s7399_s3 + $0x3b8] sm:$0xff] }
 0x368   : > { %4415 = vmatprep.subr.bf16.mxu1 %v7447_v23  ;;  %v2435_v42 = vld [vmem:[%s7399_s3 + $0x3b0] sm:$0xff] }
 0x36a   : > { %2838 = vmatmul.mubr.f32.gmra.mrb[64].mxu1 %v6626_v3 }
 0x36b   : > { %2842 = vmatprep.mubr.f32.mxu1 %v6644_v11  ;;  %v6954_v11 = vld [vmem:[#allocation3 + $0x180] sm:$0xff] }
 0x36e   : > { %2843 = vmatmul.mubr.f32.gmra.mrb[66].mxu1 %v6630_v22 }
 0x36f   : > { %2847 = vmatprep.mubr.f32.mxu1 %v6653_v44  ;;  %v6957_v44 = vld [vmem:[#allocation3 + $0x16a] sm:$0xff] }
 0x372   : > { %2848 = vmatmul.mubr.f32.gmra.mrb[68].mxu1 %v6642_v35 }
 0x373   : > { %2852 = vmatprep.mubr.f32.mxu1 %v6660_v32 }
 0x376   : > { %2853 = vmatmul.mubr.f32.gmra.mrb[70].mxu1 %v6646_v60 }
 0x377   : > { %2857 = vmatprep.mubr.f32.mxu1 %v6669_v37  ;;  %v6962_v37 = vld [vmem:[#allocation3 + $0x188] sm:$0xff] }
 0x37a   : > { %2858 = vmatmul.mubr.f32.gmra.mrb[72].mxu1 %v6658_v57 }
 0x37b   : > { %2862 = vmatprep.mubr.f32.mxu1 %v6676_v7 }
 0x37e   : > { %2863 = vmatmul.mubr.f32.gmra.mrb[74].mxu1 %v6662_v48 }
 0x37f   : > { %2867 = vmatprep.mubr.f32.mxu1 %v6687_v1  ;;  %v2413_v1 = vld [vmem:[%s7399_s3 + $0x300] sm:$0xff] }
 0x382   : > { %2868 = vmatmul.mubr.f32.gmra.mrb[76].mxu1 %v6674_v29 }
 0x383   : > { %2872 = vmatprep.mubr.f32.mxu1 %v6697_v34  ;;  %v7449_v34 = vld [vmem:[#allocation17_spill] sm:$0xff] }
 0x386   : > { %2873 = vmatmul.mubr.f32.gmra.mrb[78].mxu1 %v6678_v0 }
 0x387   : > { %2877 = vmatprep.mubr.f32.mxu1 %v6710_v47  ;;  %v6973_v47 = vld [vmem:[#allocation3 + $0x172] sm:$0xff] }
 0x38a   : > { %2878 = vmatmul.mubr.f32.gmra.mrb[80].mxu1 %v6695_v12 }
 0x38b   : > { %2882 = vmatprep.mubr.f32.mxu1 %v6721_v46  ;;  %v2415_v46 = vld [vmem:[%s7399_s3 + $0x310] sm:$0xff] }
 0x38e   : > { %2883 = vmatmul.mubr.f32.gmra.mrb[82].mxu1 %v6699_v59 }
 0x38f   : > { %2887 = vmatprep.mubr.f32.mxu1 %v6734_v10  ;;  %v2414_v10 = vld [vmem:[%s7399_s3 + $0x308] sm:$0xff] }
 0x391   : > { %v6935_v3 = vpop.f32.mrb[64].mxu0 }
 0x392   : > { %2888 = vmatmul.mubr.f32.gmra.mrb[84].mxu1 %v7448_v38  ;;  %v6938_v16 = vpop.f32.mrb[65].mxu0 }
 0x393   : > { %2892 = vmatprep.mubr.f32.mxu1 %v6743_v53  ;;  %v2416_v53 = vld [vmem:[%s7399_s3 + $0x318] sm:$0xff] }
 0x394   : > { %v4419_v6 = vpack.c.bf16 %v2416_v53, %v2415_v46  ;;  %v2195_v53 = vld [vmem:[#allocation3 + $0x6a] sm:$0xff] }
 0x396   : > { %2893 = vmatmul.mubr.f32.gmra.mrb[86].mxu1 %v7449_v34 }
 0x397   : > { %2897 = vmatprep.mubr.f32.mxu1 %v6753_v18  ;;  %v4416_v18 = vpack.c.bf16 %v2414_v10, %v2413_v1  ;;  %v2427_v1 = vld [vmem:[%s7399_s3 + $0x370] sm:$0xff]  ;;  %v2428_v10 = vld [vmem:[%s7399_s3 + $0x378] sm:$0xff] }
 0x399   : > { %v6945_v8 = vpop.f32.mrb[66].mxu0 }
 0x39a   : > { %2898 = vmatmul.mubr.f32.gmra.mrb[88].mxu1 %v6943_v21  ;;  %v6948_v22 = vpop.f32.mrb[67].mxu0 }
 0x39b   : > { %2902 = vmatprep.mubr.f32.mxu1 %v6769_v25  ;;  %v2156_v25 = vld [vmem:[#allocation3 + $0x19] sm:$0xff] }
 0x39e   : > { %2903 = vmatmul.mubr.f32.gmra.mrb[90].mxu1 %v6951_v43 }
 0x39f   : > { %2907 = vmatprep.mubr.f32.mxu1 %v6954_v11 }
 0x3a1   : > { %v6959_v32 = vpop.f32.mrb[68].mxu0 }
 0x3a2   : > { %2908 = vmatmul.mubr.f32.gmra.mrb[92].mxu1 %v6957_v44  ;;  %v6964_v7 = vpop.f32.mrb[69].mxu0 }
 0x3a3   : > { %2912 = vmatprep.mubr.f32.mxu1 %v6962_v37 }
 0x3a6   : > { %2913 = vmatmul.mubr.f32.gmra.mrb[94].mxu1 %v6973_v47 }
 0x3a7   : > { %2982 = vmatprep.mubr.f32.mxu1 %v6797_v17  ;;  %v2417_v17 = vld [vmem:[%s7399_s3 + $0x320] sm:$0xff] }
 0x3a8   : > { %v4422_v27 = vpack.c.bf16 %v2418_v39, %v2417_v17  ;;  %v2429_v17 = vld [vmem:[%s7399_s3 + $0x380] sm:$0xff]  ;;  %v2430_v39 = vld [vmem:[%s7399_s3 + $0x388] sm:$0xff] }
 0x3a9   : > { %v6983_v5 = vpop.f32.mrb[70].mxu0 }
 0x3aa   : > { %2983 = vmatmul.mubr.f32.vlgmr.msra.gmra.mrb[32].mxu1 %v2156_v25  ;;  %v6985_v30 = vpop.f32.mrb[71].mxu0 }
 0x3ab   : > { %2987 = vmatprep.mubr.f32.mxu1 %v6808_v14  ;;  %4417 = vmatpush1.bf16.msra.mxu1 %v4416_v18  ;;  %v2419_v14 = vld [vmem:[%s7399_s3 + $0x330] sm:$0xff] }
 0x3ac   : > { %4418 = vmatprep.subr.bf16.mxu1 %v7447_v23  ;;  %v4425_v62 = vpack.c.bf16 %v2420_v36, %v2419_v14  ;;  %v7050_v18 = vld [vmem:[#allocation3 + $0x61] sm:$0xff] }
 0x3ad   : > { %v2431_v14 = vld [vmem:[%s7399_s3 + $0x390] sm:$0xff]  ;;  %v2432_v36 = vld [vmem:[%s7399_s3 + $0x398] sm:$0xff] }
 0x3ae   : > { %2988 = vmatmul.mubr.f32.gmra.mrb[34].mxu1 %v2157_v20  ;;  %v7064_v20 = vld [vmem:[#allocation3 + $0x69] sm:$0xff] }
 0x3af   : > { %2992 = vmatprep.mubr.f32.mxu1 %v2190_v9  ;;  %4420 = vmatpush1.bf16.msra.mxu1 %v4419_v6  ;;  %v4437_v6 = vpack.c.bf16 %v2428_v10, %v2427_v1  ;;  %v2196_v9 = vld [vmem:[#allocation3 + $0x7a] sm:$0xff] }
 0x3b0   : > { %4421 = vmatprep.subr.bf16.mxu1 %v7447_v23  ;;  %v2199_v1 = vld [vmem:[#allocation3 + $0x9a] sm:$0xff] }
 0x3b1   : > { %v7004_v45 = vpop.f32.mrb[72].mxu0 }
 0x3b2   : > { %2993 = vmatmul.mubr.f32.gmra.mrb[36].mxu1 %v7002_v55  ;;  %v7007_v41 = vpop.f32.mrb[73].mxu0 }
 0x3b3   : > { %2997 = vmatprep.mubr.f32.mxu1 %v2191_v63  ;;  %4423 = vmatpush1.bf16.msra.mxu1 %v4422_v27  ;;  %v4440_v27 = vpack.c.bf16 %v2430_v39, %v2429_v17  ;;  %v7074_v63 = vld [vmem:[#allocation3 + $0x79] sm:$0xff] }
 0x3b4   : > { %4424 = vmatprep.subr.bf16.mxu1 %v7447_v23  ;;  %v2438_v17 = vld [vmem:[%s7399_s3 + $0x3c8] sm:$0xff] }
 0x3b5   : > { %v7112_v39 = vld [vmem:[#allocation3 + $0x99] sm:$0xff] }
 0x3b6   : > { %2998 = vmatmul.mubr.f32.gmra.mrb[38].mxu1 %v7016_v58 }
 0x3b7   : > { %3002 = vmatprep.mubr.f32.mxu1 %v2192_v2  ;;  %4426 = vmatpush1.bf16.msra.mxu1 %v4425_v62  ;;  %v4443_v2 = vpack.c.bf16 %v2432_v36, %v2431_v14  ;;  %v2439_v14 = vld [vmem:[%s7399_s3 + $0x3d0] sm:$0xff]  ;;  %v2440_v36 = vld [vmem:[%s7399_s3 + $0x3d8] sm:$0xff] }
 0x3b8   : > { %4427 = vmatprep.subr.bf16.mxu1 %v7447_v23 }
 0x3b9   : > { %v7028_v33 = vpop.f32.mrb[74].mxu0 }
 0x3ba   : > { %3003 = vmatmul.mubr.f32.gmra.mrb[40].mxu1 %v7026_v4  ;;  %v7031_v26 = vpop.f32.mrb[75].mxu0 }
 0x3bb   : > { %3007 = vmatprep.mubr.f32.mxu1 %v2193_v28  ;;  %4429 = vmatpush1.bf16.msra.mxu1 %v4428_v24  ;;  %v2433_v24 = vld [vmem:[%s7399_s3 + $0x3a0] sm:$0xff] }
 0x3bc   : > { %4430 = vmatprep.subr.bf16.mxu1 %v7447_v23  ;;  %v2198_v28 = vld [vmem:[#allocation3 + $0x92] sm:$0xff] }
 0x3be   : > { %3008 = vmatmul.mubr.f32.gmra.mrb[42].mxu1 %v7040_v50 }
 0x3bf   : > { %3012 = vmatprep.mubr.f32.mxu1 %v2194_v54  ;;  %4432 = vmatpush1.bf16.msra.mxu1 %v4431_v13  ;;  %v4446_v13 = vpack.c.bf16 %v2434_v49, %v2433_v24  ;;  %v7098_v54 = vld [vmem:[#allocation3 + $0x91] sm:$0xff] }
 0x3c0   : > { %4433 = vmatprep.subr.bf16.mxu1 %v7447_v23  ;;  %v2201_v24 = vld [vmem:[#allocation3 + $0xb2] sm:$0xff] }
 0x3c1   : > { %v7052_v46 = vpop.f32.mrb[76].mxu0 }
 0x3c2   : > { %3013 = vmatmul.mubr.f32.gmra.mrb[44].mxu1 %v7050_v18  ;;  %v7055_v25 = vpop.f32.mrb[77].mxu0 }
 0x3c3   : > { %3017 = vmatprep.mubr.f32.mxu1 %v2195_v53  ;;  %4435 = vmatpush1.bf16.msra.mxu1 %v4434_v15  ;;  %v4449_v53 = vpack.c.bf16 %v2436_v52, %v2435_v42  ;;  %v2442_v42 = vld [vmem:[%s7399_s3 + $0x3e8] sm:$0xff] }
 0x3c4   : > { %4436 = vmatprep.subr.bf16.mxu1 %v7447_v23  ;;  %v7136_v52 = vld [vmem:[#allocation3 + $0xb1] sm:$0xff] }
 0x3c6   : > { %3018 = vmatmul.mubr.f32.gmra.mrb[46].mxu1 %v7064_v20 }
 0x3c7   : > { %3022 = vmatprep.mubr.f32.mxu1 %v2196_v9  ;;  %4438 = vmatpush1.bf16.msra.mxu1 %v4437_v6  ;;  %v2437_v6 = vld [vmem:[%s7399_s3 + $0x3c0] sm:$0xff] }
 0x3c8   : > { %4439 = vmatprep.subr.bf16.mxu1 %v7447_v23  ;;  %v2200_v9 = vld [vmem:[#allocation3 + $0xaa] sm:$0xff] }
 0x3c9   : > { %v7076_v62 = vpop.f32.mrb[78].mxu0 }
 0x3ca   : > { %3023 = vmatmul.mubr.f32.gmra.mrb[48].mxu1 %v7074_v63  ;;  %v7079_v61 = vpop.f32.mrb[79].mxu0 }
 0x3cb   : > { %3027 = vmatprep.mubr.f32.mxu1 %v2197_v56  ;;  %4441 = vmatpush1.bf16.msra.mxu1 %v4440_v27  ;;  %v4452_v27 = vpack.c.bf16 %v2438_v17, %v2437_v6  ;;  %v7122_v56 = vld [vmem:[#allocation3 + $0xa9] sm:$0xff]  ;;  %v2443_v6 = vld [vmem:[%s7399_s3 + $0x3f0] sm:$0xff] }
 0x3cc   : > { %4442 = vmatprep.subr.bf16.mxu1 %v7447_v23  ;;  %v2444_v17 = vld [vmem:[%s7399_s3 + $0x3f8] sm:$0xff] }
 0x3ce   : > { %3028 = vmatmul.mubr.f32.gmra.mrb[50].mxu1 %v7088_v51 }
 0x3cf   : > { %3032 = vmatprep.mubr.f32.mxu1 %v2198_v28  ;;  %4444 = vmatpush1.bf16.msra.mxu1 %v4443_v2  ;;  %v4455_v28 = vpack.c.bf16 %v2440_v36, %v2439_v14  ;;  %v2203_v14 = vld [vmem:[#allocation3 + $0xca] sm:$0xff] }
 0x3d0   : > { %4445 = vmatprep.subr.bf16.mxu1 %v7447_v23 }
 0x3d1   : > { %v7100_v15 = vpop.f32.mrb[80].mxu0 }
 0x3d2   : > { %3033 = vmatmul.mubr.f32.gmra.mrb[52].mxu1 %v7098_v54  ;;  %v7103_v10 = vpop.f32.mrb[81].mxu0 }
 0x3d3   : > { %3037 = vmatprep.mubr.f32.mxu1 %v2199_v1  ;;  %4447 = vmatpush1.bf16.msra.mxu1 %v4446_v13  ;;  %v2441_v13 = vld [vmem:[%s7399_s3 + $0x3e0] sm:$0xff]  ;;  %v2202_v1 = vld [vmem:[#allocation3 + $0xc2] sm:$0xff] }
 0x3d4   : > { %4448 = vmatprep.subr.bf16.mxu1 %v7447_v23 }
 0x3d6   : > { %3038 = vmatmul.mubr.f32.gmra.mrb[54].mxu1 %v7112_v39 }
 0x3d7   : > { %3042 = vmatprep.mubr.f32.mxu1 %v2200_v9  ;;  %4450 = vmatpush1.bf16.msra.mxu1 %v4449_v53  ;;  %v4458_v53 = vpack.c.bf16 %v2442_v42, %v2441_v13  ;;  %v7146_v9 = vld [vmem:[#allocation3 + $0xc1] sm:$0xff]  ;;  %v7450_v13 = vld [vmem:[#allocation4_spill] sm:$0xff]  ;;  %v7159_v42 = vld [vmem:[#allocation3 + $0xd9] sm:$0xff] }
 0x3d8   : > { %4451 = vmatprep.subr.bf16.mxu1 %v7447_v23 }
 0x3d9   : > { %v7124_v2 = vpop.f32.mrb[82].mxu0 }
 0x3da   : > { %3043 = vmatmul.mubr.f32.gmra.mrb[56].mxu1 %v7122_v56  ;;  %v7127_v49 = vpop.f32.mrb[83].mxu0 }
 0x3db   : > { %3047 = vmatprep.mubr.f32.mxu1 %v2201_v24  ;;  %4453 = vmatpush1.bf16.msra.mxu1 %v4452_v27  ;;  %v4461_v24 = vpack.c.bf16 %v2444_v17, %v2443_v6  ;;  %v7179_v6 = vld [vmem:[#allocation3 + $0x109] sm:$0xff] }
 0x3dc   : > { %4454 = vmatprep.subr.bf16.mxu1 %v7447_v23  ;;  %v7454_v17 = vld [vmem:[#allocation15_spill] sm:$0xff] }
 0x3de   : > { %3048 = vmatmul.mubr.f32.gmra.mrb[58].mxu1 %v7136_v52 }
 0x3df   : > { %3052 = vmatprep.mubr.f32.mxu1 %v2202_v1  ;;  %4456 = vmatpush1.bf16.msra.mxu1 %v4455_v28  ;;  %v7154_v28 = vld [vmem:[#allocation3 + $0xc9] sm:$0xff] }
 0x3e0   : > { %4457 = vmatprep.subr.bf16.mxu1 %v7447_v23 }
 0x3e1   : > { %v7148_v27 = vpop.f32.mrb[84].mxu0 }
 0x3e2   : > { %3053 = vmatmul.mubr.f32.gmra.mrb[60].mxu1 %v7146_v9  ;;  %v7151_v36 = vpop.f32.mrb[85].mxu0 }
 0x3e3   : > { %3057 = vmatprep.mubr.f32.mxu1 %v2203_v14  ;;  %4459 = vmatpush1.bf16.msra.mxu1 %v4458_v53  ;;  %v7175_v53 = vld [vmem:[#allocation3 + $0xf9] sm:$0xff] }
 0x3e4   : > { %4460 = vmatprep.subr.bf16.mxu1 %v7447_v23  ;;  %v7167_v23 = vld [vmem:[#allocation3 + $0xe1] sm:$0xff] }
 0x3e6   : > { %3058 = vmatmul.mubr.f32.gmra.mrb[62].mxu1 %v7154_v28 }
 0x3e7   : > { %3062 = vmatprep.mubr.f32.mxu1 %v6642_v35  ;;  %4462 = vmatpush1.bf16.msra.mxu1 %v4461_v24  ;;  %v7171_v35 = vld [vmem:[#allocation3 + $0xf1] sm:$0xff]  ;;  %v7456_v24 = vld [vmem:[#allocation18_spill] sm:$0xff] }
 0x3e8   : > { %4495 = vmatprep.subr.bf16.mxu1 %v7450_v13 }
 0x3e9   : > { %v7161_v1 = vpop.f32.mrb[86].mxu0 }
 0x3ea   : > { %3063 = vmatmul.mubr.f32.gmra.mrb[64].mxu1 %v7159_v42  ;;  %v7164_v14 = vpop.f32.mrb[87].mxu0 }
 0x3eb   : > { %3067 = vmatprep.mubr.f32.mxu1 %v6646_v60  ;;  %v7183_v60 = vld [vmem:[#allocation3 + $0x111] sm:$0xff] }
 0x3ee   : > { %3068 = vmatmul.mubr.f32.gmra.mrb[66].mxu1 %v7167_v23 }
 0x3ef   : > { %3072 = vmatprep.mubr.f32.mxu1 %v6658_v57  ;;  %v7187_v57 = vld [vmem:[#allocation3 + $0x121] sm:$0xff] }
 0x3f2   : > { %3073 = vmatmul.mubr.f32.gmra.mrb[68].mxu1 %v7171_v35 }
 0x3f3   : > { %3077 = vmatprep.mubr.f32.mxu1 %v6662_v48  ;;  %v7191_v48 = vld [vmem:[#allocation3 + $0x129] sm:$0xff] }
 0x3f6   : > { %3078 = vmatmul.mubr.f32.gmra.mrb[70].mxu1 %v7175_v53 }
 0x3f7   : > { %3082 = vmatprep.mubr.f32.mxu1 %v6674_v29  ;;  %v7451_v29 = vld [vmem:[#allocation12_spill] sm:$0xff] }
 0x3fa   : > { %3083 = vmatmul.mubr.f32.gmra.mrb[72].mxu1 %v7179_v6 }
 0x3fb   : > { %3087 = vmatprep.mubr.f32.mxu1 %v6678_v0  ;;  %v7452_v0 = vld [vmem:[#allocation13_spill] sm:$0xff] }
 0x3fe   : > { %3088 = vmatmul.mubr.f32.gmra.mrb[74].mxu1 %v7183_v60 }
 0x3ff   : > { %3092 = vmatprep.mubr.f32.mxu1 %v6695_v12  ;;  %v7453_v12 = vld [vmem:[#allocation14_spill] sm:$0xff] }
 0x402   : > { %3093 = vmatmul.mubr.f32.gmra.mrb[76].mxu1 %v7187_v57 }
 0x403   : > { %3097 = vmatprep.mubr.f32.mxu1 %v6699_v59  ;;  %v7206_v59 = vld [vmem:[#allocation3 + $0x182] sm:$0xff] }
 0x406   : > { %3098 = vmatmul.mubr.f32.gmra.mrb[78].mxu1 %v7191_v48 }
 0x407   : > { %3102 = vmatprep.mubr.f32.mxu1 %v7448_v38  ;;  %v7455_v38 = vmax.f32 %v6747_v40, 0.0  ;;  %v7459_v40 = vld [vmem:[#allocation6_spill] sm:$0xff] }
 0x40a   : > { %3103 = vmatmul.mubr.f32.gmra.mrb[80].mxu1 %v7451_v29  ;;  %v7457_v29 = vmax.f32 %v7456_v24, 0.0  ;;  %v7464_v24 = vld [vmem:[#allocation11_spill] sm:$0xff] }
 0x40b   : > { %3107 = vmatprep.mubr.f32.mxu1 %v7449_v34  ;;  %v7211_v34 = vld [vmem:[#allocation3 + $0x18a] sm:$0xff] }
 0x40e   : > { %3108 = vmatmul.mubr.f32.gmra.mrb[82].mxu1 %v7452_v0  ;;  %v2222_v0 = vld [vmem:[#allocation3 + $0x38] sm:$0xff] }
 0x40f   : > { %3112 = vmatprep.mubr.f32.mxu1 %v6943_v21 }
 0x412   : > { %3113 = vmatmul.mubr.f32.gmra.mrb[84].mxu1 %v7453_v12  ;;  %v2223_v12 = vld [vmem:[#allocation3 + $0x48] sm:$0xff] }
 0x413   : > { %3117 = vmatprep.mubr.f32.mxu1 %v6951_v43 }
 0x416   : > { %3118 = vmatmul.mubr.f32.gmra.mrb[86].mxu1 %v7454_v17  ;;  %v7462_v17 = vld [vmem:[#allocation9_spill] sm:$0xff] }
 0x417   : > { %3122 = vmatprep.mubr.f32.mxu1 %v6957_v44 }
 0x41a   : > { %3123 = vmatmul.mubr.f32.gmra.mrb[88].mxu1 %v6731_v31  ;;  %v2221_v31 = vld [vmem:[#allocation3 + $0x30] sm:$0xff] }
 0x41b   : > { %3127 = vmatprep.mubr.f32.mxu1 %v6973_v47 }
 0x41e   : > { %3128 = vmatmul.mubr.f32.gmra.mrb[90].mxu1 %v6740_v19  ;;  %v7458_v19 = vld [vmem:[#allocation5_spill] sm:$0xff] }
 0x41f   : > { %3132 = vmatprep.mubr.f32.mxu1 %v7206_v59 }
 0x422   : > { %3133 = vmatmul.mubr.f32.gmra.mrb[92].mxu1 %v7455_v38  ;;  %v7463_v38 = vld [vmem:[#allocation10_spill] sm:$0xff] }
 0x423   : > { %3137 = vmatprep.mubr.f32.mxu1 %v7211_v34 }
 0x426   : > { %3138 = vmatmul.mubr.f32.gmra.mrb[94].mxu1 %v7457_v29  ;;  %v2229_v29 = vld [vmem:[#allocation3 + $0x90] sm:$0xff] }
 0x427   : > { %3207 = vmatprep.mubr.f32.mxu1 %v7002_v55  ;;  %v7460_v55 = vld [vmem:[#allocation7_spill] sm:$0xff] }
 0x42a   : > { %3208 = vmatmul.mubr.f32.vlgmr.msra.gmra.mrb[32].mxu1 %v2221_v31  ;;  %v2231_v31 = vld [vmem:[#allocation3 + $0xa8] sm:$0xff] }
 0x42b   : > { %3212 = vmatprep.mubr.f32.mxu1 %v7016_v58  ;;  %4503 = vmatpush3.bf16.msra.mxu1 %v7450_v13  ;;  %v2224_v58 = vld [vmem:[#allocation3 + $0x50] sm:$0xff] }
 0x42c   : > { %4496 = vmatprep.subr.bf16.mxu1 %v7458_v19  ;;  %v7461_v13 = vld [vmem:[#allocation8_spill] sm:$0xff] }
 0x42e   : > { %3213 = vmatmul.mubr.f32.gmra.mrb[34].mxu1 %v2222_v0  ;;  %v2275_v0 = vld [vmem:[#allocation3 + $0x139] sm:$0xff] }
 0x42f   : > { %3217 = vmatprep.mubr.f32.mxu1 %v7026_v4  ;;  %4504 = vmatpush3.bf16.msra.mxu1 %v7458_v19  ;;  %v2225_v4 = vld [vmem:[#allocation3 + $0x60] sm:$0xff] }
 0x430   : > { %4497 = vmatprep.subr.bf16.mxu1 %v7459_v40  ;;  %v2233_v19 = vld [vmem:[#allocation3 + $0xc0] sm:$0xff] }
 0x432   : > { %3218 = vmatmul.mubr.f32.gmra.mrb[36].mxu1 %v2223_v12  ;;  %v2277_v12 = vld [vmem:[#allocation3 + $0x151] sm:$0xff] }
 0x433   : > { %3222 = vmatprep.mubr.f32.mxu1 %v7040_v50  ;;  %4505 = vmatpush3.bf16.msra.mxu1 %v7459_v40  ;;  %v2226_v50 = vld [vmem:[#allocation3 + $0x68] sm:$0xff] }
 0x434   : > { %4498 = vmatprep.subr.bf16.mxu1 %v7460_v55  ;;  %v2276_v40 = vld [vmem:[#allocation3 + $0x141] sm:$0xff] }
 0x436   : > { %3223 = vmatmul.mubr.f32.gmra.mrb[38].mxu1 %v2224_v58  ;;  %v2279_v58 = vld [vmem:[#allocation3 + $0x169] sm:$0xff] }
 0x437   : > { %3227 = vmatprep.mubr.f32.mxu1 %v7050_v18  ;;  %4506 = vmatpush3.bf16.msra.mxu1 %v7460_v55  ;;  %v2227_v18 = vld [vmem:[#allocation3 + $0x78] sm:$0xff] }
 0x438   : > { %4499 = vmatprep.subr.bf16.mxu1 %v7461_v13  ;;  %v2278_v55 = vld [vmem:[#allocation3 + $0x159] sm:$0xff] }
 0x43a   : > { %3228 = vmatmul.mubr.f32.gmra.mrb[40].mxu1 %v2225_v4  ;;  %v2248_v4 = vld [vmem:[#allocation3 + $0x170] sm:$0xff] }
 0x43b   : > { %3232 = vmatprep.mubr.f32.mxu1 %v7064_v20  ;;  %4507 = vmatpush3.bf16.msra.mxu1 %v7461_v13  ;;  %v2228_v20 = vld [vmem:[#allocation3 + $0x80] sm:$0xff]  ;;  %v2280_v13 = vld [vmem:[#allocation3 + $0x171] sm:$0xff] }
 0x43c   : > { %4500 = vmatprep.subr.bf16.mxu1 %v7462_v17 }
 0x43e   : > { %3233 = vmatmul.mubr.f32.gmra.mrb[42].mxu1 %v2226_v50  ;;  %v2282_v50 = vld [vmem:[#allocation3 + $0x189] sm:$0xff] }
 0x43f   : > { %3237 = vmatprep.mubr.f32.mxu1 %v7074_v63  ;;  %4508 = vmatpush3.bf16.msra.mxu1 %v7462_v17  ;;  %v2230_v63 = vld [vmem:[#allocation3 + $0x98] sm:$0xff]  ;;  %v2281_v17 = vld [vmem:[#allocation3 + $0x181] sm:$0xff] }
 0x440   : > { %4501 = vmatprep.subr.bf16.mxu1 %v7463_v38 }
 0x442   : > { %3238 = vmatmul.mubr.f32.gmra.mrb[44].mxu1 %v2227_v18  ;;  %v2284_v18 = vld [vmem:[#allocation3 + $0x1a1] sm:$0xff] }
 0x443   : > { %3242 = vmatprep.mubr.f32.mxu1 %v7088_v51  ;;  %4509 = vmatpush3.bf16.msra.mxu1 %v7463_v38  ;;  %v2232_v51 = vld [vmem:[#allocation3 + $0xb0] sm:$0xff]  ;;  %v2283_v38 = vld [vmem:[#allocation3 + $0x199] sm:$0xff] }
 0x444   : > { %4502 = vmatprep.subr.bf16.mxu1 %v7464_v24 }
 0x446   : > { %3243 = vmatmul.mubr.f32.gmra.mrb[46].mxu1 %v2228_v20 }
 0x447   : > { %3247 = vmatprep.mubr.f32.mxu1 %v7098_v54  ;;  %4510 = vmatpush3.bf16.msra.mxu1 %v7464_v24  ;;  %v2234_v54 = vld [vmem:[#allocation3 + $0xc8] sm:$0xff]  ;;  %v5002_v24 = vld [vmem:[#allocation2] sm:$0xff] }
 0x44a   : > { %3248 = vmatmul.mubr.f32.gmra.mrb[48].mxu1 %v2229_v29 }
 0x44b   : > { %3252 = vmatprep.mubr.f32.mxu1 %v7112_v39  ;;  %v2235_v39 = vld [vmem:[#allocation3 + $0xd8] sm:$0xff] }
 0x44e   : > { %3253 = vmatmul.mubr.f32.gmra.mrb[50].mxu1 %v2230_v63 }
 0x44f   : > { %3257 = vmatprep.mubr.f32.mxu1 %v7122_v56  ;;  %v2236_v56 = vld [vmem:[#allocation3 + $0xe0] sm:$0xff] }
 0x452   : > { %3258 = vmatmul.mubr.f32.gmra.mrb[52].mxu1 %v2231_v31 }
 0x453   : > { %3262 = vmatprep.mubr.f32.mxu1 %v7136_v52  ;;  %v2237_v52 = vld [vmem:[#allocation3 + $0xf0] sm:$0xff] }
 0x456   : > { %3263 = vmatmul.mubr.f32.gmra.mrb[54].mxu1 %v2232_v51  ;;  %v3594_v51 = vld [vmem:[%s5219_s15 + $0x8] sm:$0xff] }
 0x457   : > { %3267 = vmatprep.mubr.f32.mxu1 %v7146_v9  ;;  %v2238_v9 = vld [vmem:[#allocation3 + $0xf8] sm:$0xff] }
 0x45a   : > { %3268 = vmatmul.mubr.f32.gmra.mrb[56].mxu1 %v2233_v19 }
 0x45b   : > { %3272 = vmatprep.mubr.f32.mxu1 %v7154_v28  ;;  %v2239_v28 = vld [vmem:[#allocation3 + $0x108] sm:$0xff] }
 0x45e   : > { %3273 = vmatmul.mubr.f32.gmra.mrb[58].mxu1 %v2234_v54 }
 0x45f   : > { %3277 = vmatprep.mubr.f32.mxu1 %v7159_v42  ;;  %v2240_v42 = vld [vmem:[#allocation3 + $0x110] sm:$0xff] }
 0x462   : > { %3278 = vmatmul.mubr.f32.gmra.mrb[60].mxu1 %v2235_v39 }
 0x463   : > { %3282 = vmatprep.mubr.f32.mxu1 %v7167_v23  ;;  %v2241_v23 = vld [vmem:[#allocation3 + $0x120] sm:$0xff] }
 0x466   : > { %3283 = vmatmul.mubr.f32.gmra.mrb[62].mxu1 %v2236_v56 }
 0x467   : > { %3287 = vmatprep.mubr.f32.mxu1 %v7171_v35  ;;  %v2242_v35 = vld [vmem:[#allocation3 + $0x128] sm:$0xff] }
 0x46a   : > { %3288 = vmatmul.mubr.f32.gmra.mrb[64].mxu1 %v2237_v52 }
 0x46b   : > { %3292 = vmatprep.mubr.f32.mxu1 %v7175_v53  ;;  %v2243_v53 = vld [vmem:[#allocation3 + $0x138] sm:$0xff] }
 0x46e   : > { %3293 = vmatmul.mubr.f32.gmra.mrb[66].mxu1 %v2238_v9  ;;  %v3595_v9 = vld [vmem:[%s5219_s15 + $0x10] sm:$0xff] }
 0x46f   : > { %3297 = vmatprep.mubr.f32.mxu1 %v7179_v6  ;;  %v2244_v6 = vld [vmem:[#allocation3 + $0x140] sm:$0xff] }
 0x472   : > { %3298 = vmatmul.mubr.f32.gmra.mrb[68].mxu1 %v2239_v28 }
 0x473   : > { %3302 = vmatprep.mubr.f32.mxu1 %v7183_v60  ;;  %v2245_v60 = vld [vmem:[#allocation3 + $0x150] sm:$0xff] }
 0x476   : > { %3303 = vmatmul.mubr.f32.gmra.mrb[70].mxu1 %v2240_v42 }
 0x477   : > { %3307 = vmatprep.mubr.f32.mxu1 %v7187_v57  ;;  %v2246_v57 = vld [vmem:[#allocation3 + $0x158] sm:$0xff] }
 0x47a   : > { %3308 = vmatmul.mubr.f32.gmra.mrb[72].mxu1 %v2241_v23 }
 0x47b   : > { %3312 = vmatprep.mubr.f32.mxu1 %v7191_v48  ;;  %v2247_v48 = vld [vmem:[#allocation3 + $0x168] sm:$0xff] }
 0x47e   : > { %3313 = vmatmul.mubr.f32.gmra.mrb[74].mxu1 %v2242_v35 }
 0x47f   : > { %3317 = vmatprep.mubr.f32.mxu1 %v2275_v0 }
 0x482   : > { %3318 = vmatmul.mubr.f32.gmra.mrb[76].mxu1 %v2243_v53 }
 0x483   : > { %3322 = vmatprep.mubr.f32.mxu1 %v2276_v40 }
 0x486   : > { %3323 = vmatmul.mubr.f32.gmra.mrb[78].mxu1 %v2244_v6 }
 0x487   : > { %3327 = vmatprep.mubr.f32.mxu1 %v2277_v12 }
 0x48a   : > { %3328 = vmatmul.mubr.f32.gmra.mrb[80].mxu1 %v2245_v60 }
 0x48b   : > { %3332 = vmatprep.mubr.f32.mxu1 %v2278_v55 }
 0x48e   : > { %3333 = vmatmul.mubr.f32.gmra.mrb[82].mxu1 %v2246_v57 }
 0x48f   : > { %3337 = vmatprep.mubr.f32.mxu1 %v2279_v58 }
 0x492   : > { %3338 = vmatmul.mubr.f32.gmra.mrb[84].mxu1 %v2247_v48 }
 0x493   : > { %3342 = vmatprep.mubr.f32.mxu1 %v2280_v13 }
 0x496   : > { %3343 = vmatmul.mubr.f32.gmra.mrb[86].mxu1 %v2248_v4 }
 0x497   : > { %3347 = vmatprep.mubr.f32.mxu1 %v2281_v17 }
 0x49a   : > { %3348 = vmatmul.mubr.f32.gmra.mrb[88].mxu1 %v6954_v11  ;;  %v2315_v11 = vld [vmem:[#allocation3 + $0x19a] sm:$0xff] }
 0x49b   : > { %3352 = vmatprep.mubr.f32.mxu1 %v2282_v50 }
 0x49e   : > { %3353 = vmatmul.mubr.f32.gmra.mrb[90].mxu1 %v6962_v37  ;;  %v2316_v37 = vld [vmem:[#allocation3 + $0x1a2] sm:$0xff] }
 0x49f   : > { %3357 = vmatprep.mubr.f32.mxu1 %v2283_v38 }
 0x4a2   : > { %3358 = vmatmul.mubr.f32.gmra.mrb[92].mxu1 %v5002_v24 }
 0x4a3   : > { %3362 = vmatprep.mubr.f32.mxu1 %v2284_v18 }
 0x4a6   : > { %3363 = vmatmul.mubr.f32.gmra.mrb[94].mxu1 %v5002_v24 }
 0x4a7   : > { %4035 = vmatprep.mubr.f32.mxu1 %v6943_v21  ;;  %v7264_v21 = vld [vmem:[%s7400_s4] ss:$0 sm:$0xff] }
 0x4aa   : > { %4036 = vmatmul.mubr.f32.vlgmr.msra.gmra.mrb[96].mxu1 %v6951_v43 }
 0x4ab   : > { %4038 = vmatprep.mubr.f32.mxu1 %v6957_v44 }
 0x4ae   : > { %4039 = vmatmul.mubr.f32.gmra.mrb[98].mxu1 %v6973_v47  ;;  %v3593_v47 = vld [vmem:[%s5219_s15] sm:$0xff] }
 0x4af   : > { %4041 = vmatprep.mubr.f32.mxu1 %v7206_v59 }
 0x4b2   : > { %4042 = vmatmul.mubr.f32.gmra.mrb[100].mxu1 %v7211_v34 }
 0x4b3   : > { %4044 = vmatprep.mubr.f32.mxu1 %v2315_v11 }
 0x4b6   : > { %4045 = vmatmul.mubr.f32.gmra.mrb[102].mxu1 %v2316_v37 }
 0x4fd   : > { %v3209_v43 = vpop.f32.mrb[32].mxu1 }
 0x4fe   : > { %v4543_v44 = vadd.f32 %v7264_v21, %v3209_v43  ;;  %v3211_v20 = vpop.f32.mrb[33].mxu1 }
 0x500   : > { %v3435_v59 = vadd.f32 %v4543_v44, %v6938_v16 }
 0x501   : > { %v3214_v29 = vpop.f32.mrb[34].mxu1 }
 0x502   : > { %v3625_v63 = vadd.f32 %v3593_v47, %v3435_v59  ;;  %v4544_v34 = vadd.f32 %v7264_v21, %v3214_v29  ;;  %v3216_v31 = vpop.f32.mrb[35].mxu1 }
 0x504   : > { %v3657_v19 = vmax.f32 %v3625_v63, 0.0  ;;  %v3440_v54 = vadd.f32 %v4544_v34, %v6935_v3  ;;  %v3596_v3 = vld [vmem:[%s5219_s15 + $0x18] sm:$0xff] }
 0x505   : > { %v3219_v39 = vpop.f32.mrb[36].mxu1 }
 0x506   : > { %3689 = vst [vmem:[%s7275_s14] sm:$0xff] %v3657_v19  ;;  %v3626_v16 = vadd.f32 %v3594_v51, %v3440_v54  ;;  %v4545_v56 = vadd.f32 %v7264_v21, %v3219_v39  ;;  %v3221_v52 = vpop.f32.mrb[37].mxu1 }
 0x508   : > { %v3658_v28 = vmax.f32 %v3626_v16, 0.0  ;;  %v3445_v42 = vadd.f32 %v4545_v56, %v6948_v22  ;;  %v3597_v22 = vld [vmem:[%s5219_s15 + $0x20] sm:$0xff] }
 0x509   : > { %v3224_v23 = vpop.f32.mrb[38].mxu1 }
 0x50a   : > { %3690 = vst [vmem:[%s7275_s14 + $0x8] sm:$0xff] %v3658_v28  ;;  %v3627_v35 = vadd.f32 %v3595_v9, %v3445_v42  ;;  %v4546_v0 = vadd.f32 %v7264_v21, %v3224_v23  ;;  %v3226_v53 = vpop.f32.mrb[39].mxu1 }
 0x50c   : > { %v3659_v40 = vmax.f32 %v3627_v35, 0.0  ;;  %v3450_v6 = vadd.f32 %v4546_v0, %v6945_v8  ;;  %v3598_v8 = vld [vmem:[%s5219_s15 + $0x28] sm:$0xff] }
 0x50d   : > { %v3229_v12 = vpop.f32.mrb[40].mxu1 }
 0x50e   : > { %3691 = vst [vmem:[%s7275_s14 + $0x10] sm:$0xff] %v3659_v40  ;;  %v3628_v60 = vadd.f32 %v3596_v3, %v3450_v6  ;;  %v4547_v55 = vadd.f32 %v7264_v21, %v3229_v12  ;;  %v3231_v57 = vpop.f32.mrb[41].mxu1 }
 0x510   : > { %v3660_v58 = vmax.f32 %v3628_v60, 0.0  ;;  %v3455_v48 = vadd.f32 %v4547_v55, %v6964_v7  ;;  %v3599_v7 = vld [vmem:[%s5219_s15 + $0x30] sm:$0xff] }
 0x511   : > { %v3234_v13 = vpop.f32.mrb[42].mxu1 }
 0x512   : > { %3692 = vst [vmem:[%s7275_s14 + $0x18] sm:$0xff] %v3660_v58  ;;  %v3629_v4 = vadd.f32 %v3597_v22, %v3455_v48  ;;  %v4548_v17 = vadd.f32 %v7264_v21, %v3234_v13  ;;  %v3236_v50 = vpop.f32.mrb[43].mxu1 }
 0x514   : > { %v3661_v38 = vmax.f32 %v3629_v4, 0.0  ;;  %v3460_v18 = vadd.f32 %v4548_v17, %v6959_v32  ;;  %v3600_v32 = vld [vmem:[%s5219_s15 + $0x38] sm:$0xff] }
 0x515   : > { %v3239_v24 = vpop.f32.mrb[44].mxu1 }
 0x516   : > { %3693 = vst [vmem:[%s7275_s14 + $0x20] sm:$0xff] %v3661_v38  ;;  %v3630_v11 = vadd.f32 %v3598_v8, %v3460_v18  ;;  %v4549_v37 = vadd.f32 %v7264_v21, %v3239_v24  ;;  %v3241_v43 = vpop.f32.mrb[45].mxu1 }
 0x518   : > { %v3662_v44 = vmax.f32 %v3630_v11, 0.0  ;;  %v3465_v20 = vadd.f32 %v4549_v37, %v6985_v30  ;;  %v3601_v30 = vld [vmem:[%s5219_s15 + $0x40] sm:$0xff] }
 0x519   : > { %v3244_v47 = vpop.f32.mrb[46].mxu1 }
 0x51a   : > { %3694 = vst [vmem:[%s7275_s14 + $0x28] sm:$0xff] %v3662_v44  ;;  %v3631_v59 = vadd.f32 %v3599_v7, %v3465_v20  ;;  %v4550_v29 = vadd.f32 %v7264_v21, %v3244_v47  ;;  %v3246_v63 = vpop.f32.mrb[47].mxu1 }
 0x51c   : > { %v3663_v34 = vmax.f32 %v3631_v59, 0.0  ;;  %v3470_v31 = vadd.f32 %v4550_v29, %v6983_v5  ;;  %v3602_v5 = vld [vmem:[%s5219_s15 + $0x48] sm:$0xff] }
 0x51d   : > { %v3249_v51 = vpop.f32.mrb[48].mxu1 }
 0x51e   : > { %3695 = vst [vmem:[%s7275_s14 + $0x30] sm:$0xff] %v3663_v34  ;;  %v3632_v19 = vadd.f32 %v3600_v32, %v3470_v31  ;;  %v4551_v54 = vadd.f32 %v7264_v21, %v3249_v51  ;;  %v3251_v39 = vpop.f32.mrb[49].mxu1 }
 0x520   : > { %v3664_v16 = vmax.f32 %v3632_v19, 0.0  ;;  %v3475_v56 = vadd.f32 %v4551_v54, %v7007_v41  ;;  %v3603_v41 = vld [vmem:[%s5219_s15 + $0x50] sm:$0xff] }
 0x521   : > { %v3254_v52 = vpop.f32.mrb[50].mxu1 }
 0x522   : > { %3696 = vst [vmem:[%s7275_s14 + $0x38] sm:$0xff] %v3664_v16  ;;  %v3633_v9 = vadd.f32 %v3601_v30, %v3475_v56  ;;  %v4552_v28 = vadd.f32 %v7264_v21, %v3254_v52  ;;  %v3256_v42 = vpop.f32.mrb[51].mxu1 }
 0x524   : > { %v3665_v23 = vmax.f32 %v3633_v9, 0.0  ;;  %v3480_v35 = vadd.f32 %v4552_v28, %v7004_v45  ;;  %v3604_v45 = vld [vmem:[%s5219_s15 + $0x58] sm:$0xff] }
 0x525   : > { %v3259_v0 = vpop.f32.mrb[52].mxu1 }
 0x526   : > { %3697 = vst [vmem:[%s7275_s14 + $0x40] sm:$0xff] %v3665_v23  ;;  %v3634_v53 = vadd.f32 %v3602_v5, %v3480_v35  ;;  %v4553_v3 = vadd.f32 %v7264_v21, %v3259_v0  ;;  %v3261_v40 = vpop.f32.mrb[53].mxu1 }
 0x528   : > { %v3666_v6 = vmax.f32 %v3634_v53, 0.0  ;;  %v3485_v12 = vadd.f32 %v4553_v3, %v7031_v26  ;;  %v3605_v26 = vld [vmem:[%s5219_s15 + $0x60] sm:$0xff] }
 0x529   : > { %v3264_v60 = vpop.f32.mrb[54].mxu1 }
 0x52a   : > { %3698 = vst [vmem:[%s7275_s14 + $0x48] sm:$0xff] %v3666_v6  ;;  %v3635_v55 = vadd.f32 %v3603_v41, %v3485_v12  ;;  %v4554_v57 = vadd.f32 %v7264_v21, %v3264_v60  ;;  %v3266_v22 = vpop.f32.mrb[55].mxu1 }
 0x52c   : > { %v3667_v58 = vmax.f32 %v3635_v55, 0.0  ;;  %v3490_v48 = vadd.f32 %v4554_v57, %v7028_v33  ;;  %v3606_v33 = vld [vmem:[%s5219_s15 + $0x68] sm:$0xff] }
 0x52d   : > { %v3269_v13 = vpop.f32.mrb[56].mxu1 }
 0x52e   : > { %3699 = vst [vmem:[%s7275_s14 + $0x50] sm:$0xff] %v3667_v58  ;;  %v3636_v4 = vadd.f32 %v3604_v45, %v3490_v48  ;;  %v4555_v17 = vadd.f32 %v7264_v21, %v3269_v13  ;;  %v3271_v50 = vpop.f32.mrb[57].mxu1 }
 0x530   : > { %v3668_v8 = vmax.f32 %v3636_v4, 0.0  ;;  %v3495_v38 = vadd.f32 %v4555_v17, %v7055_v25  ;;  %v3607_v25 = vld [vmem:[%s5219_s15 + $0x70] sm:$0xff] }
 0x531   : > { %v3274_v18 = vpop.f32.mrb[58].mxu1 }
 0x532   : > { %3700 = vst [vmem:[%s7275_s14 + $0x58] sm:$0xff] %v3668_v8  ;;  %v3637_v24 = vadd.f32 %v3605_v26, %v3495_v38  ;;  %v4556_v11 = vadd.f32 %v7264_v21, %v3274_v18  ;;  %v3276_v37 = vpop.f32.mrb[59].mxu1 }
 0x534   : > { %v3669_v43 = vmax.f32 %v3637_v24, 0.0  ;;  %v3500_v7 = vadd.f32 %v4556_v11, %v7052_v46  ;;  %v3608_v46 = vld [vmem:[%s5219_s15 + $0x78] sm:$0xff] }
 0x535   : > { %v3279_v44 = vpop.f32.mrb[60].mxu1 }
 0x536   : > { %3701 = vst [vmem:[%s7275_s14 + $0x60] sm:$0xff] %v3669_v43  ;;  %v3638_v20 = vadd.f32 %v3606_v33, %v3500_v7  ;;  %v4557_v47 = vadd.f32 %v7264_v21, %v3279_v44  ;;  %v3281_v59 = vpop.f32.mrb[61].mxu1 }
 0x538   : > { %v3670_v29 = vmax.f32 %v3638_v20, 0.0  ;;  %v3505_v63 = vadd.f32 %v4557_v47, %v7079_v61  ;;  %v3609_v61 = vld [vmem:[%s5219_s15 + $0x80] sm:$0xff] }
 0x539   : > { %v3284_v32 = vpop.f32.mrb[62].mxu1 }
 0x53a   : > { %3702 = vst [vmem:[%s7275_s14 + $0x68] sm:$0xff] %v3670_v29  ;;  %v3639_v34 = vadd.f32 %v3607_v25, %v3505_v63  ;;  %v4558_v31 = vadd.f32 %v7264_v21, %v3284_v32  ;;  %v3286_v51 = vpop.f32.mrb[63].mxu1  ;;  %v3616_v32 = vld [vmem:[%s5219_s15 + $0xb8] sm:$0xff] }
 0x53c   : > { %v3671_v19 = vmax.f32 %v3639_v34, 0.0  ;;  %v3510_v54 = vadd.f32 %v4558_v31, %v7076_v62  ;;  %v3610_v62 = vld [vmem:[%s5219_s15 + $0x88] sm:$0xff] }
 0x53d   : > { %v3289_v39 = vpop.f32.mrb[64].mxu1 }
 0x53e   : > { %3703 = vst [vmem:[%s7275_s14 + $0x70] sm:$0xff] %v3671_v19  ;;  %v3640_v30 = vadd.f32 %v3608_v46, %v3510_v54  ;;  %v4559_v16 = vadd.f32 %v7264_v21, %v3289_v39  ;;  %v3291_v56 = vpop.f32.mrb[65].mxu1 }
 0x540   : > { %v3672_v52 = vmax.f32 %v3640_v30, 0.0  ;;  %v3515_v9 = vadd.f32 %v4559_v16, %v7103_v10  ;;  %v3611_v10 = vld [vmem:[%s5219_s15 + $0x90] sm:$0xff] }
 0x541   : > { %v3294_v28 = vpop.f32.mrb[66].mxu1 }
 0x542   : > { %3704 = vst [vmem:[%s7275_s14 + $0x78] sm:$0xff] %v3672_v52  ;;  %v3641_v42 = vadd.f32 %v3609_v61, %v3515_v9  ;;  %v4560_v5 = vadd.f32 %v7264_v21, %v3294_v28  ;;  %v3296_v23 = vpop.f32.mrb[67].mxu1 }
 0x544   : > { %v3673_v35 = vmax.f32 %v3641_v42, 0.0  ;;  %v3520_v0 = vadd.f32 %v4560_v5, %v7100_v15  ;;  %v3612_v15 = vld [vmem:[%s5219_s15 + $0x98] sm:$0xff] }
 0x545   : > { %v3299_v53 = vpop.f32.mrb[68].mxu1 }
 0x546   : > { %3705 = vst [vmem:[%s7275_s14 + $0x80] sm:$0xff] %v3673_v35  ;;  %v3642_v3 = vadd.f32 %v3610_v62, %v3520_v0  ;;  %v4561_v40 = vadd.f32 %v7264_v21, %v3299_v53  ;;  %v3301_v41 = vpop.f32.mrb[69].mxu1  ;;  %v3618_v53 = vld [vmem:[%s5219_s15 + $0xc8] sm:$0xff] }
 0x547   : > { %v3617_v41 = vld [vmem:[%s5219_s15 + $0xc0] sm:$0xff] }
 0x548   : > { %v3674_v6 = vmax.f32 %v3642_v3, 0.0  ;;  %v3525_v12 = vadd.f32 %v4561_v40, %v7127_v49  ;;  %v3613_v49 = vld [vmem:[%s5219_s15 + $0xa0] sm:$0xff] }
 0x549   : > { %v3304_v60 = vpop.f32.mrb[70].mxu1 }
 0x54a   : > { %3706 = vst [vmem:[%s7275_s14 + $0x88] sm:$0xff] %v3674_v6  ;;  %v3643_v55 = vadd.f32 %v3611_v10, %v3525_v12  ;;  %v4562_v57 = vadd.f32 %v7264_v21, %v3304_v60  ;;  %v3306_v22 = vpop.f32.mrb[71].mxu1 }
 0x54b   : > { %v3620_v22 = vld [vmem:[%s5219_s15 + $0xd8] sm:$0xff] }
 0x54c   : > { %v3675_v45 = vmax.f32 %v3643_v55, 0.0  ;;  %v3530_v58 = vadd.f32 %v4562_v57, %v7124_v2  ;;  %v3614_v2 = vld [vmem:[%s5219_s15 + $0xa8] sm:$0xff] }
 0x54d   : > { %v3309_v48 = vpop.f32.mrb[72].mxu1 }
 0x54e   : > { %3707 = vst [vmem:[%s7275_s14 + $0x90] sm:$0xff] %v3675_v45  ;;  %v3644_v13 = vadd.f32 %v3612_v15, %v3530_v58  ;;  %v4563_v4 = vadd.f32 %v7264_v21, %v3309_v48  ;;  %v3311_v17 = vpop.f32.mrb[73].mxu1  ;;  %v3619_v48 = vld [vmem:[%s5219_s15 + $0xd0] sm:$0xff] }
 0x550   : > { %v3676_v50 = vmax.f32 %v3644_v13, 0.0  ;;  %v3535_v26 = vadd.f32 %v4563_v4, %v7151_v36  ;;  %v3615_v36 = vld [vmem:[%s5219_s15 + $0xb0] sm:$0xff] }
 0x551   : > { %v3314_v8 = vpop.f32.mrb[74].mxu1 }
 0x552   : > { %3708 = vst [vmem:[%s7275_s14 + $0x98] sm:$0xff] %v3676_v50  ;;  %v3645_v38 = vadd.f32 %v3613_v49, %v3535_v26  ;;  %v4564_v18 = vadd.f32 %v7264_v21, %v3314_v8  ;;  %v3316_v24 = vpop.f32.mrb[75].mxu1 }
 0x554   : > { %v3677_v11 = vmax.f32 %v3645_v38, 0.0  ;;  %v3540_v37 = vadd.f32 %v4564_v18, %v7148_v27  ;;  %v3622_v38 = vld [vmem:[%s5219_s15 + $0xe8] sm:$0xff] }
 0x555   : > { %v3319_v33 = vpop.f32.mrb[76].mxu1 }
 0x556   : > { %3709 = vst [vmem:[%s7275_s14 + $0xa0] sm:$0xff] %v3677_v11  ;;  %v3646_v43 = vadd.f32 %v3614_v2, %v3540_v37  ;;  %v4565_v7 = vadd.f32 %v7264_v21, %v3319_v33  ;;  %v3321_v44 = vpop.f32.mrb[77].mxu1  ;;  %v3621_v11 = vld [vmem:[%s5219_s15 + $0xe0] sm:$0xff] }
 0x558   : > { %v3678_v20 = vmax.f32 %v3646_v43, 0.0  ;;  %v3545_v47 = vadd.f32 %v4565_v7, %v7164_v14 }
 0x559   : > { %v3324_v59 = vpop.f32.mrb[78].mxu1 }
 0x55a   : > { %3710 = vst [vmem:[%s7275_s14 + $0xa8] sm:$0xff] %v3678_v20  ;;  %v3647_v25 = vadd.f32 %v3615_v36, %v3545_v47  ;;  %v4566_v29 = vadd.f32 %v7264_v21, %v3324_v59  ;;  %v3326_v63 = vpop.f32.mrb[79].mxu1  ;;  %v3624_v47 = vld [vmem:[%s5219_s15 + $0xf8] sm:$0xff] }
 0x55b   : > { %v3623_v63 = vld [vmem:[%s5219_s15 + $0xf0] sm:$0xff] }
 0x55c   : > { %v3679_v27 = vmax.f32 %v3647_v25, 0.0  ;;  %v3550_v34 = vadd.f32 %v4566_v29, %v7161_v1 }
 0x55d   : > { %v3329_v31 = vpop.f32.mrb[80].mxu1 }
 0x55e   : > { %3711 = vst [vmem:[%s7275_s14 + $0xb0] sm:$0xff] %v3679_v27  ;;  %v3648_v51 = vadd.f32 %v3616_v32, %v3550_v34  ;;  %v3331_v46 = vpop.f32.mrb[81].mxu1  ;;  %v4567_v35 = vadd.f32 %v7264_v21, %v3329_v31 }
 0x560   : > { %v3680_v19 = vmax.f32 %v3648_v51, 0.0 }
 0x561   : > { %v3334_v54 = vpop.f32.mrb[82].mxu1 }
 0x562   : > { %3712 = vst [vmem:[%s7275_s14 + $0xb8] sm:$0xff] %v3680_v19  ;;  %v3336_v39 = vpop.f32.mrb[83].mxu1  ;;  %v4568_v62 = vadd.f32 %v7264_v21, %v3334_v54 }
 0x565   : > { %v3339_v14 = vpop.f32.mrb[84].mxu1 }
 0x566   : > { %v3341_v30 = vpop.f32.mrb[85].mxu1  ;;  %v4569_v60 = vadd.f32 %v7264_v21, %v3339_v14 }
 0x569   : > { %v3344_v16 = vpop.f32.mrb[86].mxu1 }
 0x56a   : > { %v3346_v56 = vpop.f32.mrb[87].mxu1  ;;  %v4570_v6 = vadd.f32 %v7264_v21, %v3344_v16 }
 0x56d   : > { %v3349_v61 = vpop.f32.mrb[88].mxu1 }
 0x56e   : > { %v3351_v52 = vpop.f32.mrb[89].mxu1  ;;  %v4571_v50 = vadd.f32 %v7264_v21, %v3349_v61 }
 0x571   : > { %v3354_v9 = vpop.f32.mrb[90].mxu1 }
 0x572   : > { %v3356_v28 = vpop.f32.mrb[91].mxu1  ;;  %v4572_v17 = vadd.f32 %v7264_v21, %v3354_v9 }
 0x575   : > { %v3359_v42 = vpop.f32.mrb[92].mxu1 }
 0x576   : > { %v3361_v1 = vpop.f32.mrb[93].mxu1  ;;  %v4573_v44 = vadd.f32 %v7264_v21, %v3359_v42 }
 0x579   : > { %v3364_v5 = vpop.f32.mrb[94].mxu1 }
 0x57a   : > { %v3366_v23 = vpop.f32.mrb[95].mxu1  ;;  %v4574_v43 = vadd.f32 %v7264_v21, %v3364_v5 }
 0x57d   : > { %v4037_v0 = vpop.f32.mrb[96].mxu1 }
 0x57e   : > { %v3560_v3 = vadd.f32 %v4568_v62, %v4037_v0  ;;  %v3554_v40 = vpop.f32.mrb[97].mxu1 }
 0x57f   : > { %v3555_v10 = vadd.f32 %v4567_v35, %v3554_v40 }
 0x580   : > { %v3650_v12 = vadd.f32 %v3618_v53, %v3560_v3 }
 0x581   : > { %v3649_v55 = vadd.f32 %v3617_v41, %v3555_v10  ;;  %v4040_v57 = vpop.f32.mrb[98].mxu1 }
 0x582   : > { %v3682_v15 = vmax.f32 %v3650_v12, 0.0  ;;  %v3570_v45 = vadd.f32 %v4570_v6, %v4040_v57  ;;  %v3564_v58 = vpop.f32.mrb[99].mxu1 }
 0x583   : > { %v3681_v13 = vmax.f32 %v3649_v55, 0.0  ;;  %v3565_v4 = vadd.f32 %v4569_v60, %v3564_v58 }
 0x584   : > { %3714 = vst [vmem:[%s7275_s14 + $0xc8] sm:$0xff] %v3682_v15  ;;  %v3652_v49 = vadd.f32 %v3620_v22, %v3570_v45 }
 0x585   : > { %3713 = vst [vmem:[%s7275_s14 + $0xc0] sm:$0xff] %v3681_v13  ;;  %v3651_v26 = vadd.f32 %v3619_v48, %v3565_v4  ;;  %v4043_v8 = vpop.f32.mrb[100].mxu1 }
 0x586   : > { %v3684_v18 = vmax.f32 %v3652_v49, 0.0  ;;  %v3580_v24 = vadd.f32 %v4572_v17, %v4043_v8  ;;  %v3574_v2 = vpop.f32.mrb[101].mxu1 }
 0x587   : > { %v3683_v37 = vmax.f32 %v3651_v26, 0.0  ;;  %v3575_v33 = vadd.f32 %v4571_v50, %v3574_v2 }
 0x588   : > { %3716 = vst [vmem:[%s7275_s14 + $0xd8] sm:$0xff] %v3684_v18  ;;  %v3654_v7 = vadd.f32 %v3622_v38, %v3580_v24 }
 0x589   : > { %3715 = vst [vmem:[%s7275_s14 + $0xd0] sm:$0xff] %v3683_v37  ;;  %v3653_v36 = vadd.f32 %v3621_v11, %v3575_v33  ;;  %v4046_v20 = vpop.f32.mrb[102].mxu1 }
 0x58a   : > { %v3686_v59 = vmax.f32 %v3654_v7, 0.0  ;;  %v3590_v25 = vadd.f32 %v4574_v43, %v4046_v20  ;;  %v3584_v29 = vpop.f32.mrb[103].mxu1 }
 0x58b   : > { %v3685_v32 = vmax.f32 %v3653_v36, 0.0  ;;  %v3585_v27 = vadd.f32 %v4573_v44, %v3584_v29 }
 0x58c   : > { %3718 = vst [vmem:[%s7275_s14 + $0xe8] sm:$0xff] %v3686_v59  ;;  %v3656_v34 = vadd.f32 %v3624_v47, %v3590_v25 }
 0x58d   : > { %3717 = vst [vmem:[%s7275_s14 + $0xe0] sm:$0xff] %v3685_v32  ;;  %v3655_v31 = vadd.f32 %v3623_v63, %v3585_v27 }
 0x58e   : > { %v3688_v51 = vmax.f32 %v3656_v34, 0.0 }
 0x58f   : > { %v3687_v46 = vmax.f32 %v3655_v31, 0.0 }
 0x590   : > { %3720 = vst [vmem:[%s7275_s14 + $0xf8] sm:$0xff] %v3688_v51 }
 0x591   : > { %3719 = vst [vmem:[%s7275_s14 + $0xf0] sm:$0xff] %v3687_v46 }
 0x592 PF: > { %s15_s18 = sadd.s32 1, %s5009_s18  }
 0x593   : > { %p12_p4 = scmp.ge.s32.totalorder %s15_s18, 4  }
 0x595   :  { %14 = sbr.rel (!%p12_p4) target bundleno = 1 (0x1), region = 74 }

</bundles_post_ra>
